<compile_context>
chip_gen: v5e
topology: v5e:2x2
jax: 0.10.0
libtpu: 0.0.40
codegen_flags: <defaults>
</compile_context>

<pallas_src>
import functools

import jax
import jax.numpy as jnp
from jax.experimental import pallas as pl
from jax.experimental.pallas import tpu as pltpu


# --------------------------------------------------------------------------- #
# Kernel                                                                      #
# --------------------------------------------------------------------------- #
def _vq_body(z, e_dist, e_lookup, half_esq,
             idx_ref, enc_ref, zq_ref, sq_ref, cnt_ref,
             *, n_valid, use_gather, mask_rows):
    """One (tile_n, D) row-tile of the VQ hot path.

    z        : (tN, D) f32   encoder rows (flattened NHWC)
    e_dist   : (K, D)        codebook operand for the distance matmul
                             (bf16 when mxu_dtype=bf16; cast hoisted to wrapper)
    e_lookup : (K, D) f32    codebook for the z_q lookup
    half_esq : (1, K) f32    0.5 * ||e_k||^2  (+inf on padded codes)
    idx_ref  : (1,1,tN) i32  argmin code index per row (lane-dense)
    enc_ref  : (tN, K)  i8   one-hot encodings
    zq_ref   : (tN, D)  f32  quantized rows
    sq_ref   : (1,1,1)  f32  per-tile partial sum((z_q - z)^2)
    cnt_ref  : (1,1,K)  f32  per-tile partial per-code counts
    """
    tn = z.shape[0]
    k = e_lookup.shape[0]

    # Reduced distance (argmin-equivalent): 0.5*||e||^2 - z.e^T.  The per-row
    # constant ||z||^2 and the global 2x scale never change the row-wise
    # argmin, so both are dropped.  dim-1/dim-1 contraction == z @ e.T with no
    # materialized transpose of the codebook.
    prod = jax.lax.dot_general(
        z.astype(e_dist.dtype), e_dist,
        dimension_numbers=(((1,), (1,)), ((), ())),
        preferred_element_type=jnp.float32)                       # (tN, K)
    dist = half_esq - prod                                        # (tN, K)

    # argmin over codes with first-occurrence tie-break (torch.argmin), using
    # a SINGLE masked-iota min reduction (reused for compare + index store).
    iota = jax.lax.broadcasted_iota(jnp.int32, dist.shape, 1)     # (tN, K)
    d_min = jnp.min(dist, axis=1, keepdims=True)                  # (tN, 1)
    masked_iota = jnp.where(dist <= d_min, iota, k)               # (tN, K)
    idx_col = jnp.min(masked_iota, axis=1, keepdims=True)         # (tN, 1)

    onehot = (iota == idx_col).astype(jnp.float32)                # (tN, K)

    if use_gather:
        # Large-K path: O(tN*D) row gather instead of a second tN*K*D matmul.
        zq = jnp.take(e_lookup, idx_col[:, 0], axis=0).astype(jnp.float32)
    else:
        zq = jnp.dot(onehot, e_lookup.astype(jnp.float32),
                     preferred_element_type=jnp.float32)          # (tN, D)

    # Lane-dense stores.
    idx_ref[...] = idx_col.reshape(1, 1, tn)
    enc_ref[...] = onehot.astype(enc_ref.dtype)     # int8: 4x less HBM traffic
    zq_ref[...] = zq.astype(zq_ref.dtype)

    # Per-tile partial statistics (reduced in the wrapper) -> grid stays
    # "parallel" (no revisited accumulator blocks).  Padded rows are masked.
    diff = zq - z
    counts = onehot
    if mask_rows:
        row0 = pl.program_id(0) * tn
        rid = row0 + jax.lax.broadcasted_iota(jnp.int32, (tn, 1), 0)
        valid = (rid < n_valid).astype(jnp.float32)               # (tN, 1)
        diff = diff * valid
        counts = onehot * valid

    sq_ref[...] = jnp.sum(diff * diff).reshape(1, 1, 1)
    cnt_ref[...] = jnp.sum(counts, axis=0).reshape(1, 1, k)


def _vq_kernel_fused(z_ref, emb_ref, esq_ref,
                     idx_ref, enc_ref, zq_ref, sq_ref, cnt_ref, **kw):
    # f32 MXU path: one resident codebook used for both matmuls.
    _vq_body(z_ref[...], emb_ref[...], emb_ref[...], esq_ref[...],
             idx_ref, enc_ref, zq_ref, sq_ref, cnt_ref, **kw)


def _vq_kernel_split(z_ref, emb_mxu_ref, emb_ref, esq_ref,
                     idx_ref, enc_ref, zq_ref, sq_ref, cnt_ref, **kw):
    # bf16 MXU path: codebook cast hoisted to the wrapper (no per-step K*D
    # VPU cast); f32 codebook kept for the z_q lookup.
    _vq_body(z_ref[...], emb_mxu_ref[...], emb_ref[...], esq_ref[...],
             idx_ref, enc_ref, zq_ref, sq_ref, cnt_ref, **kw)


# --------------------------------------------------------------------------- #
# Tiling / VMEM budgeting                                                     #
# --------------------------------------------------------------------------- #
def _vmem_limit_bytes():
    """Generation-aware scoped-VMEM limit: ~96 MiB on 128-MiB parts (v5e/v6e),
    ~48 MiB on v7x's 64-MiB per-core VMEM."""
    cap = 64 * 1024 * 1024                 # conservative fallback (v7x per-core)
    try:
        cap = int(pltpu.get_tpu_info().vmem_capacity_bytes)
    except Exception:
        pass
    return min(cap * 3 // 4, 96 * 1024 * 1024)


def _pick_tile_n(n, k, d, *, enc_bytes, split_codebook, vmem_limit):
    """Largest row tile whose full VMEM footprint (double-buffered I/O blocks,
    resident codebook, and the ~4 live (tile_n, K) in-kernel temporaries) fits
    the budget, preferring >= 2 grid steps (megacore sharding on v7x)."""
    budget = int(vmem_limit * 0.85)
    n_codebooks = 2 if split_codebook else 1
    resident = 2 * (n_codebooks * k * d * 4 + k * 4)   # codebook(s) + ||e||^2

    def footprint(t):
        io = 2 * (t * d * 4             # z in
                  + t * d * 4           # zq out
                  + t * k * enc_bytes   # one-hot out (int8)
                  + t * 4               # idx out
                  + 4 + k * 4)          # sq + cnt partials
        temps = 4 * t * k * 4 + 2 * t * d * 4   # dist/iota/masked/onehot + zq/diff
        return resident + io + temps

    candidates = [c for c in (4096, 2048, 1024, 512, 256, 128)
                  if footprint(c) <= budget]
    if not candidates:
        return 128                       # best effort at extreme K; may spill
    for c in candidates:                 # largest first; want >= 2 grid steps
        if c <= n and -(-n // c) >= 2:
            return c
    for c in reversed(candidates):       # tiny n: smallest tile covering n
        if c >= n:
            return c
    return candidates[0]


# --------------------------------------------------------------------------- #
# Wrapper                                                                     #
# --------------------------------------------------------------------------- #
@functools.partial(jax.jit,
                   static_argnames=("beta", "tile_n", "mxu_dtype", "use_gather"))
def vector_quantizer(z_nchw, embedding, *, beta: float, tile_n=None,
                     mxu_dtype=jnp.float32, use_gather=None):
    """Forward pass of VectorQuantizer.

    z_nchw    : (B, C, H, W) float32, C == embedding_dim
    embedding : (K, D) float32 codebook
    Returns (loss, z_q [NCHW], perplexity, min_encodings [N,K] f32,
             min_encoding_indices [N,1] i32).

    mxu_dtype: set jnp.bfloat16 for production shapes on v5e/v6e/v7x (halves
    MXU operand traffic; f32 accumulation keeps the argmin robust).  Kept f32
    here so the demo matches the f32 reference indices exactly.
    """
    b, c, h, w = z_nchw.shape
    k_orig, d = embedding.shape
    assert c == d

    # NCHW -> NHWC -> (N, D)
    z_flat = jnp.transpose(z_nchw, (0, 2, 3, 1)).reshape(-1, d).astype(jnp.float32)
    n_orig = z_flat.shape[0]

    emb = embedding.astype(jnp.float32)

    # Pad K to a lane multiple (128) so the (tile_n, K) slabs / count stores
    # stay lane-dense; padded codes get ||e||^2 = +inf so argmin ignores them.
    k = ((k_orig + 127) // 128) * 128
    emb_k = jnp.pad(emb, ((0, k - k_orig), (0, 0))) if k != k_orig else emb
    half_esq = 0.5 * jnp.sum(emb_k * emb_k, axis=1)
    if k != k_orig:
        half_esq = half_esq.at[k_orig:].set(jnp.inf)
    half_esq = half_esq[None, :]                                  # (1, K)

    if use_gather is None:
        use_gather = bool(k_orig >= 2048)
    split_codebook = (mxu_dtype != jnp.float32)
    enc_bytes = 1                                                 # int8 one-hot

    vmem_limit = _vmem_limit_bytes()
    if tile_n is None:
        tile_n = _pick_tile_n(n_orig, k, d, enc_bytes=enc_bytes,
                              split_codebook=split_codebook,
                              vmem_limit=vmem_limit)

    # Pad N to a multiple of tile_n; padded rows are masked out of the stats
    # inside the kernel and sliced off the outputs here.
    n_pad = (-n_orig) % tile_n
    mask_rows = bool(n_pad != 0)
    if n_pad:
        z_flat = jnp.pad(z_flat, ((0, n_pad), (0, 0)))
    n = n_orig + n_pad
    grid_n = n // tile_n

    out_shapes = (
        jax.ShapeDtypeStruct((grid_n, 1, tile_n), jnp.int32),     # indices (lane-dense)
        jax.ShapeDtypeStruct((n, k), jnp.int8),                   # one-hot (int8)
        jax.ShapeDtypeStruct((n, d), jnp.float32),                # z_q rows
        jax.ShapeDtypeStruct((grid_n, 1, 1), jnp.float32),        # partial sum((zq-z)^2)
        jax.ShapeDtypeStruct((grid_n, 1, k), jnp.float32),        # partial per-code counts
    )
    out_specs = (
        pl.BlockSpec((1, 1, tile_n), lambda i: (i, 0, 0)),
        pl.BlockSpec((tile_n, k), lambda i: (i, 0)),
        pl.BlockSpec((tile_n, d), lambda i: (i, 0)),
        pl.BlockSpec((1, 1, 1), lambda i: (i, 0, 0)),
        pl.BlockSpec((1, 1, k), lambda i: (i, 0, 0)),
    )
    kernel_kw = dict(n_valid=n_orig, use_gather=use_gather, mask_rows=mask_rows)

    if split_codebook:
        kernel = functools.partial(_vq_kernel_split, **kernel_kw)
        inputs = (z_flat, emb_k.astype(mxu_dtype), emb_k, half_esq)
        in_specs = [
            pl.BlockSpec((tile_n, d), lambda i: (i, 0)),          # z row tile
            pl.BlockSpec((k, d), lambda i: (0, 0)),               # bf16 codebook (dist)
            pl.BlockSpec((k, d), lambda i: (0, 0)),               # f32 codebook (lookup)
            pl.BlockSpec((1, k), lambda i: (0, 0)),               # 0.5*||e||^2
        ]
    else:
        kernel = functools.partial(_vq_kernel_fused, **kernel_kw)
        inputs = (z_flat, emb_k, half_esq)
        in_specs = [
            pl.BlockSpec((tile_n, d), lambda i: (i, 0)),          # z row tile
            pl.BlockSpec((k, d), lambda i: (0, 0)),               # codebook (constant)
            pl.BlockSpec((1, k), lambda i: (0, 0)),               # 0.5*||e||^2
        ]

    idx_rows, enc_i8, zq_flat, sq_part, cnt_part = pl.pallas_call(
        kernel,
        out_shape=out_shapes,
        grid=(grid_n,),
        in_specs=in_specs,
        out_specs=out_specs,
        compiler_params=pltpu.CompilerParams(
            dimension_semantics=("parallel",),                    # megacore-shardable
            vmem_limit_bytes=int(vmem_limit)),
    )(*inputs)

    idx = idx_rows.reshape(n)[:n_orig]
    min_encoding_indices = idx[:, None]
    # Cast back to f32 only to preserve the module's return signature; the
    # kernel-side writeback stays int8.
    min_encodings = enc_i8[:n_orig, :k_orig].astype(jnp.float32)
    zq_valid = zq_flat[:n_orig]

    # loss = mean((zq.detach()-z)^2) + beta*mean((zq-z.detach())^2)
    #      = (1 + beta) * mean((zq - z)^2)          (forward value)
    loss = (1.0 + beta) * jnp.sum(sq_part) / jnp.float32(n_orig * d)

    # TODO(synk): straight-through estimator and the distinct codebook /
    # beta*commitment gradients are backward-only (need jax.custom_vjp); the
    # forward value of z_q is exactly the codebook lookup.
    z_q = jnp.transpose(zq_valid.reshape(b, h, w, d), (0, 3, 1, 2))

    e_mean = jnp.sum(cnt_part, axis=(0, 1))[:k_orig] / jnp.float32(n_orig)
    perplexity = jnp.exp(-jnp.sum(e_mean * jnp.log(e_mean + 1e-10)))

    return loss, z_q, perplexity, min_encodings, min_encoding_indices


# --------------------------------------------------------------------------- #
# Pure-JAX reference + demo                                                   #
# --------------------------------------------------------------------------- #
def _reference(z_nchw, embedding, beta):
    """Pure-JAX reference mirroring the PyTorch forward."""
    b, c, h, w = z_nchw.shape
    k, d = embedding.shape
    z = jnp.transpose(z_nchw, (0, 2, 3, 1)).reshape(-1, d)
    d_red = jnp.sum(embedding ** 2, axis=1) - 2.0 * z @ embedding.T
    idx = jnp.argmin(d_red, axis=1)
    enc = jax.nn.one_hot(idx, k, dtype=jnp.float32)
    zq = enc @ embedding
    loss = jnp.mean((zq - z) ** 2) + beta * jnp.mean((zq - z) ** 2)
    zq_out = jnp.transpose(zq.reshape(b, h, w, d), (0, 3, 1, 2))
    e_mean = jnp.mean(enc, axis=0)
    perplexity = jnp.exp(-jnp.sum(e_mean * jnp.log(e_mean + 1e-10)))
    return loss, zq_out, perplexity, enc, idx[:, None].astype(jnp.int32)


def _check(z, embedding, beta):
    loss, z_q, ppl, enc, idx = jax.block_until_ready(
        vector_quantizer(z, embedding, beta=beta))
    r_loss, r_zq, r_ppl, r_enc, r_idx = _reference(z, embedding, beta)
    assert jnp.allclose(loss, r_loss, atol=1e-5, rtol=1e-5)
    assert jnp.allclose(z_q, r_zq, atol=1e-5, rtol=1e-5)
    assert jnp.allclose(ppl, r_ppl, atol=1e-4, rtol=1e-4)
    assert jnp.array_equal(idx, r_idx)
    assert jnp.array_equal(enc, r_enc)


if __name__ == "__main__":
    # Module hyperparameters (deterministic, in-script "init").
    num_embeddings = 16     # K
    embedding_dim = 4       # D == input channels
    beta = 0.25

    key = jax.random.PRNGKey(0)
    k_emb, k_z, k_z2 = jax.random.split(key, 3)

    # nn.Embedding weight ~ U(-1/K, 1/K)
    embedding = jax.random.uniform(
        k_emb, (num_embeddings, embedding_dim),
        minval=-1.0 / num_embeddings, maxval=1.0 / num_embeddings,
        dtype=jnp.float32)

    # Main demo: NCHW (B=2, C=4, H=16, W=16) -> N = 512 rows (aligned path).
    z = jax.random.normal(k_z, (2, embedding_dim, 16, 16), dtype=jnp.float32)
    _check(z, embedding, beta)

    # Ragged demo: (1, 4, 5, 5) -> N = 25 rows (exercises row padding + masking).
    z_odd = jax.random.normal(k_z2, (1, embedding_dim, 5, 5), dtype=jnp.float32)
    _check(z_odd, embedding, beta)

    print("KERNEL_OK")
</pallas_src>

<mosaic_0001>
module attributes {stable_mosaic.version = 11 : i64} {
  func.func @_vq_kernel_fused(%arg0: i32, %arg1: memref<256x4xf32, #tpu.memory_space<vmem>>, %arg2: memref<128x4xf32, #tpu.memory_space<vmem>>, %arg3: memref<1x128xf32, #tpu.memory_space<vmem>>, %arg4: memref<1x1x256xi32, #tpu.memory_space<vmem>>, %arg5: memref<256x128xi8, #tpu.memory_space<vmem>>, %arg6: memref<256x4xf32, #tpu.memory_space<vmem>>, %arg7: memref<1x1x1xf32, #tpu.memory_space<vmem>>, %arg8: memref<1x1x128xf32, #tpu.memory_space<vmem>>) attributes {dimension_semantics = [#tpu.dimension_semantics<parallel>], iteration_bounds = array<i64: 2>, scalar_prefetch = 0 : i64, scratch_operands = 0 : i64, tpu.core_type = #tpu.core_type<tc>, window_params = [{transform_indices = @transform_0, window_bounds = array<i64: 256, 4>}, {pipeline_mode = #tpu.pipeline_mode<synchronous>, transform_indices = @transform_1, window_bounds = array<i64: 128, 4>}, {pipeline_mode = #tpu.pipeline_mode<synchronous>, transform_indices = @transform_2, window_bounds = array<i64: 1, 128>}, {transform_indices = @transform_3, window_bounds = array<i64: 1, 1, 256>}, {transform_indices = @transform_4, window_bounds = array<i64: 256, 128>}, {transform_indices = @transform_5, window_bounds = array<i64: 256, 4>}, {transform_indices = @transform_6, window_bounds = array<i64: 1, 1, 1>}, {transform_indices = @transform_7, window_bounds = array<i64: 1, 1, 128>}]} {
    %c0 = arith.constant 0 : index
    %c0_0 = arith.constant 0 : index
    %0 = vector.load %arg1[%c0, %c0_0] : memref<256x4xf32, #tpu.memory_space<vmem>>, vector<256x4xf32>
    %c0_1 = arith.constant 0 : index
    %c0_2 = arith.constant 0 : index
    %1 = vector.load %arg2[%c0_1, %c0_2] : memref<128x4xf32, #tpu.memory_space<vmem>>, vector<128x4xf32>
    %c0_3 = arith.constant 0 : index
    %c0_4 = arith.constant 0 : index
    %2 = vector.load %arg2[%c0_3, %c0_4] : memref<128x4xf32, #tpu.memory_space<vmem>>, vector<128x4xf32>
    %c0_5 = arith.constant 0 : index
    %c0_6 = arith.constant 0 : index
    %3 = vector.load %arg3[%c0_5, %c0_6] : memref<1x128xf32, #tpu.memory_space<vmem>>, vector<1x128xf32>
    %cst = arith.constant dense<0.000000e+00> : vector<256x128xf32>
    %4 = tpu.matmul %0, %1, %cst {dimension_numbers = #tpu.dot_dimension_numbers<[1], [1], [0], [0], [0, 0, 1, 0], [], []>} : vector<256x4xf32>, vector<128x4xf32>, vector<256x128xf32> -> vector<256x128xf32>
    %5 = vector.broadcast %3 : vector<1x128xf32> to vector<256x128xf32>
    %6 = arith.subf %5, %4 : vector<256x128xf32>
    %7 = tpu.iota {dimensions = array<i32: 1>} : vector<256x128xi32>
    %cst_7 = arith.constant dense<0x7F800000> : vector<256xf32>
    %8 = vector.multi_reduction <minimumf>, %6, %cst_7 [1] : vector<256x128xf32> to vector<256xf32>
    %9 = vector.shape_cast %8 : vector<256xf32> to vector<256x1xf32>
    %10 = vector.broadcast %9 : vector<256x1xf32> to vector<256x128xf32>
    %11 = arith.cmpf ole, %6, %10 : vector<256x128xf32>
    %c128_i32 = arith.constant 128 : i32
    %12 = vector.broadcast %c128_i32 : i32 to vector<256x128xi32>
    %13 = arith.select %11, %7, %12 : vector<256x128xi1>, vector<256x128xi32>
    %cst_8 = arith.constant dense<2147483647> : vector<256xi32>
    %14 = vector.multi_reduction <minsi>, %13, %cst_8 [1] : vector<256x128xi32> to vector<256xi32>
    %15 = vector.shape_cast %14 : vector<256xi32> to vector<256x1xi32>
    %16 = vector.broadcast %15 : vector<256x1xi32> to vector<256x128xi32>
    %17 = arith.cmpi eq, %7, %16 : vector<256x128xi32>
    %18 = arith.extui %17 : vector<256x128xi1> to vector<256x128xi32>
    %19 = arith.sitofp %18 : vector<256x128xi32> to vector<256x128xf32>
    %cst_9 = arith.constant dense<0.000000e+00> : vector<256x4xf32>
    %20 = tpu.matmul %19, %2, %cst_9 {dimension_numbers = #tpu.dot_dimension_numbers<[1], [0], [0], [1], [0, 0, 1, 1], [], []>} : vector<256x128xf32>, vector<128x4xf32>, vector<256x4xf32> -> vector<256x4xf32>
    %21 = vector.shape_cast %15 : vector<256x1xi32> to vector<1x1x256xi32>
    %c0_10 = arith.constant 0 : index
    %c0_11 = arith.constant 0 : index
    %c0_12 = arith.constant 0 : index
    %22 = vector.load %arg4[%c0_10, %c0_11, %c0_12] : memref<1x1x256xi32, #tpu.memory_space<vmem>>, vector<1x1x256xi32>
    tpu.vector_store %arg4[%c0_10, %c0_11, %c0_12], %21 {strides = array<i32>} : memref<1x1x256xi32, #tpu.memory_space<vmem>>, vector<1x1x256xi32>,
    %23 = arith.fptosi %19 : vector<256x128xf32> to vector<256x128xi8>
    %c0_13 = arith.constant 0 : index
    %c0_14 = arith.constant 0 : index
    %24 = vector.load %arg5[%c0_13, %c0_14] : memref<256x128xi8, #tpu.memory_space<vmem>>, vector<256x128xi8>
    tpu.vector_store %arg5[%c0_13, %c0_14], %23 {strides = array<i32>} : memref<256x128xi8, #tpu.memory_space<vmem>>, vector<256x128xi8>,
    %c0_15 = arith.constant 0 : index
    %c0_16 = arith.constant 0 : index
    %25 = vector.load %arg6[%c0_15, %c0_16] : memref<256x4xf32, #tpu.memory_space<vmem>>, vector<256x4xf32>
    tpu.vector_store %arg6[%c0_15, %c0_16], %20 {strides = array<i32>} : memref<256x4xf32, #tpu.memory_space<vmem>>, vector<256x4xf32>,
    %26 = arith.subf %20, %0 : vector<256x4xf32>
    %27 = arith.mulf %26, %26 : vector<256x4xf32>
    %28 = vector.shape_cast %27 : vector<256x4xf32> to vector<1x256x4xf32>
    %cst_17 = arith.constant dense<0.000000e+00> : vector<1xf32>
    %29 = vector.multi_reduction <add>, %28, %cst_17 [1, 2] : vector<1x256x4xf32> to vector<1xf32>
    %30 = vector.shape_cast %29 : vector<1xf32> to vector<1x1x1xf32>
    %31 = vector.extract %30[0, 0, 0] : f32 from vector<1x1x1xf32>
    %32 = vector.broadcast %31 : f32 to vector<1x1x1xf32>
    %c0_18 = arith.constant 0 : index
    %c0_19 = arith.constant 0 : index
    %c0_20 = arith.constant 0 : index
    %33 = vector.load %arg7[%c0_18, %c0_19, %c0_20] : memref<1x1x1xf32, #tpu.memory_space<vmem>>, vector<1x1x1xf32>
    tpu.vector_store %arg7[%c0_18, %c0_19, %c0_20], %32 {strides = array<i32>} : memref<1x1x1xf32, #tpu.memory_space<vmem>>, vector<1x1x1xf32>,
    %cst_21 = arith.constant dense<0.000000e+00> : vector<128xf32>
    %34 = vector.multi_reduction <add>, %19, %cst_21 [0] : vector<256x128xf32> to vector<128xf32>
    %35 = vector.shape_cast %34 : vector<128xf32> to vector<1x1x128xf32>
    %c0_22 = arith.constant 0 : index
    %c0_23 = arith.constant 0 : index
    %c0_24 = arith.constant 0 : index
    %36 = vector.load %arg8[%c0_22, %c0_23, %c0_24] : memref<1x1x128xf32, #tpu.memory_space<vmem>>, vector<1x1x128xf32>
    tpu.vector_store %arg8[%c0_22, %c0_23, %c0_24], %35 {strides = array<i32>} : memref<1x1x128xf32, #tpu.memory_space<vmem>>, vector<1x1x128xf32>,
    return
  }
  func.func @transform_0(%arg0: i32) -> (i32, i32) {
    %c0_i32 = arith.constant 0 : i32
    %c0_i32_0 = arith.constant 0 : i32
    return %arg0, %c0_i32 : i32, i32
  }
  func.func @transform_1(%arg0: i32) -> (i32, i32) {
    %c0_i32 = arith.constant 0 : i32
    %c0_i32_0 = arith.constant 0 : i32
    %c0_i32_1 = arith.constant 0 : i32
    return %c0_i32, %c0_i32_0 : i32, i32
  }
  func.func @transform_2(%arg0: i32) -> (i32, i32) {
    %c0_i32 = arith.constant 0 : i32
    %c0_i32_0 = arith.constant 0 : i32
    %c0_i32_1 = arith.constant 0 : i32
    return %c0_i32, %c0_i32_0 : i32, i32
  }
  func.func @transform_3(%arg0: i32) -> (i32, i32, i32) {
    %c0_i32 = arith.constant 0 : i32
    %c0_i32_0 = arith.constant 0 : i32
    %c0_i32_1 = arith.constant 0 : i32
    return %arg0, %c0_i32, %c0_i32_0 : i32, i32, i32
  }
  func.func @transform_4(%arg0: i32) -> (i32, i32) {
    %c0_i32 = arith.constant 0 : i32
    %c0_i32_0 = arith.constant 0 : i32
    return %arg0, %c0_i32 : i32, i32
  }
  func.func @transform_5(%arg0: i32) -> (i32, i32) {
    %c0_i32 = arith.constant 0 : i32
    %c0_i32_0 = arith.constant 0 : i32
    return %arg0, %c0_i32 : i32, i32
  }
  func.func @transform_6(%arg0: i32) -> (i32, i32, i32) {
    %c0_i32 = arith.constant 0 : i32
    %c0_i32_0 = arith.constant 0 : i32
    %c0_i32_1 = arith.constant 0 : i32
    return %arg0, %c0_i32, %c0_i32_0 : i32, i32, i32
  }
  func.func @transform_7(%arg0: i32) -> (i32, i32, i32) {
    %c0_i32 = arith.constant 0 : i32
    %c0_i32_0 = arith.constant 0 : i32
    %c0_i32_1 = arith.constant 0 : i32
    return %arg0, %c0_i32, %c0_i32_0 : i32, i32, i32
  }
}

</mosaic_0001>

<bundles_post_ra>
// kernel: vector_quantizer.1
= control target key start
LH: loop header
LB: loop body
LE: loop exit
PB: predicated region body
PF: predicated region fallthrough
CT: control target
= control target key end

     0   :  { %13 = vsyncpa [#allocation3], 0  ;;  %s5227_s0 = inlined_call_operand.vmem [shape: f32[512,4], index: 0, kind: input, shape index: {}]   ;;  %s5228_s1 = inlined_call_operand.vmem [shape: f32[128,4], index: 1, kind: input, shape index: {}]   ;;  %s5229_s2 = inlined_call_operand.vmem [shape: f32[1,128], index: 2, kind: input, shape index: {}]   ;;  %s5230_s3 = inlined_call_operand.hbm [shape: s32[2,1,256], index: 3, kind: output, shape index: {0}]   ;;  %s5231_s4 = inlined_call_operand.vmem [shape: s8[512,128], index: 4, kind: output, shape index: {1}]   ;;  %s5232_s5 = inlined_call_operand.vmem [shape: f32[512,4], index: 5, kind: output, shape index: {2}]   ;;  %s5233_s6 = inlined_call_operand.vmem [shape: f32[2,1,1], index: 6, kind: output, shape index: {3}]   ;;  %s5234_s7 = inlined_call_operand.vmem [shape: f32[2,1,128], index: 7, kind: output, shape index: {4}]  }
   0x1   :  { %15 = vsyncpa [#allocation3 + $0x1], 0  ;;  %s3234_s24 = smov 0   ;;  %s3236_s25 = smov 0  }
   0x2   :  { %s3238_s26 = smov 0   ;;  %s3240_s27 = smov 0  }
   0x3 LB: > { %s3255_s28 = sadd.s32 4294967295, %s3189_s27   ;;  %s2792_s29 = sadd.s32 4294967294, %s3189_s27   ;;  %s3189_s27 = sphi %s3240_s27, %s5285_s27   ;;  %s3185_s26 = sphi %s3238_s26, %s5284_s26   ;;  %s3181_s25 = sphi %s3236_s25, %s5283_s25   ;;  %s3177_s24 = sphi %s3234_s24, %s5282_s24  }
   0x4   : > { %s3259_s30 = sadd.s32 1, %s3189_s27   ;;  %s96_s8 = sadd.s32 1, %s3185_s26 }
   0x5   : > { %s93_s9 = ssub.s32 %s3189_s27, %s3259_s30  ;;  %p106_p0 = scmp.ne.s32.totalorder %s3185_s26, %s3181_s25 }
   0x6   : > { %p94_p1 = scmp.eq.s32.totalorder %s93_s9, 0  ;;  %p107_p2 = scmp.eq.s32.totalorder %s3255_s28, 1 }
   0x7   : > { %p112_p3 = scmp.ne.s32.totalorder %s3181_s25, %s3177_s24  ;;  %p113_p4 = scmp.eq.s32.totalorder %s2792_s29, 1 }
   0x8   : > { %s3270_s10 = scalar_select %p94_p1, %s3185_s26, %s96_s8  }
   0x9   : > { %p3272_p5 = por %p107_p2, %p106_p0  ;;  %p3276_p6 = por %p113_p4, %p112_p3 }
   0xa   : > { %p2795_p7 = scmp.ge.s32.totalorder %s3189_s27, 1  ;;  %p250_p8 = scmp.lt.s32.totalorder %s3189_s27, 3 }
   0xc   : > { %p251_p9 = pnand %p2795_p7, %p250_p8 }
   0xe   : > { %254 = sbr.rel (%p251_p9) target bundleno = 1356 (0x54c), region = 32 }
  0x13   : > { %v3285_v0 = vld [vmem:[%s5228_s1 + $0x78] sm:$0xff]  ;;  %vm371_vm0 = vcmask 31744   ;;  %v3294_v1 = vld [vmem:[%s5228_s1 + $0x70] sm:$0xff]  ;;  %v3307_v2 = vld [vmem:[%s5228_s1 + $0x68] sm:$0xff]  ;;  %s2797_s17 = sshll.u32 %s3255_s28, 5  ;;  %p316_p11 = scmp.lt.s32.totalorder %s3255_s28, 1 }
  0x14   : > { %2803 = vmatpush.xpose.msk.msra.mxu0 %vm371_vm0, %v3285_v0  ;;  %2919 = vmatpush.xpose.msk.msra.mxu2 %vm371_vm0, %v3285_v0  ;;  %v3315_v3 = vld [vmem:[%s5228_s1 + $0x60] sm:$0xff]  ;;  %v3325_v4 = vld [vmem:[%s5228_s1 + $0x58] sm:$0xff]  ;;  %v3333_v5 = vld [vmem:[%s5228_s1 + $0x50] sm:$0xff]  ;;  %p299_p10 = scmp.lt.s32.totalorder %s2797_s17, 63  ;;  %s2916_s22 = sshll.u32 %s3255_s28, 1 }
  0x15   : > { %2920 = vmatpush.xpose.msk.msra.mxu3 %vm371_vm0, %v3285_v0  ;;  %2951 = vmatpush.msra.mxu1 %v3285_v0  ;;  %v3343_v6 = vld [vmem:[%s5228_s1 + $0x48] sm:$0xff]  ;;  %v3351_v7 = vld [vmem:[%s5228_s1 + $0x40] sm:$0xff]  ;;  %v3361_v8 = vld [vmem:[%s5228_s1 + $0x38] sm:$0xff]  ;;  %s2626_s9 = scalar_lea.hbm %s5230_s3, %s2916_s22  ;;  %s3147_s22 = scalar_lea.hbm %s5230_s3, 4 }
  0x16   : > { %v3369_v9 = vld [vmem:[%s5228_s1 + $0x30] sm:$0xff]  ;;  %v3379_v10 = vld [vmem:[%s5228_s1 + $0x28] sm:$0xff]  ;;  %v3387_v11 = vld [vmem:[%s5228_s1 + $0x20] sm:$0xff]  ;;  %s5287_s17 = smov (!%p299_p10, %s2797_s17), 63  ;;  %s2630_s14 = sshll.u32 %s2626_s9, 4  ;;  %s2631_s14 = int_to_ptr.hbm [resolvable:$true] %s2630_s14 }
  0x17   : > { %2953 = vmatpush.msra.mxu1 %v3294_v1  ;;  %v3397_v12 = vld [vmem:[%s5228_s1 + $0x18] sm:$0xff]  ;;  %v3405_v13 = vld [vmem:[%s5228_s1 + $0x10] sm:$0xff]  ;;  %v3415_v14 = vld [vmem:[%s5228_s1 + $0x8] sm:$0xff]  ;;  %s2798_s18 = sshll.u32 %s5287_s17, 3  ;;  %s2800_s29 = sshll.u32 %s5287_s17, 1 }
  0x18   : > { %2804 = vmatpush.xpose.msk.msra.mxu0 %vm371_vm0, %v3294_v1  ;;  %2921 = vmatpush.xpose.msk.msra.mxu2 %vm371_vm0, %v3294_v1  ;;  %v3423_v15 = vld [vmem:[%s5228_s1] sm:$0xff]  ;;  %s3475_s21 = scalar_lea.vmem %s5227_s0, %s2798_s18  ;;  %s4078_s13 = scalar_lea.vmem %s5231_s4, %s2800_s29 }
  0x19   : > { %2922 = vmatpush.xpose.msk.msra.mxu3 %vm371_vm0, %v3294_v1  ;;  %2955 = vmatpush.msra.mxu1 %v3307_v2  ;;  %v322_v16 = vld [vmem:[%s3475_s21] sm:$0xff]  ;;  %v335_v17 = vld [vmem:[%s3475_s21 + $0x68] sm:$0xff]  ;;  %v336_v19 = vld [vmem:[%s3475_s21 + $0x70] sm:$0xff]  ;;  %s4350_s16 = scalar_lea.vmem %s5232_s5, %s2798_s18 }
  0x1a   : > { %v323_v18 = vld [vmem:[%s3475_s21 + $0x8] sm:$0xff]  ;;  %v324_v20 = vld [vmem:[%s3475_s21 + $0x10] sm:$0xff]  ;;  %v337_v21 = vld [vmem:[%s3475_s21 + $0x78] sm:$0xff]  ;;  %s4885_s17 = scalar_select %p316_p11, %s3255_s28, 1 }
  0x1b   : > { %2957 = vmatpush.msra.mxu1 %v3315_v3  ;;  %v325_v22 = vld [vmem:[%s3475_s21 + $0x18] sm:$0xff]  ;;  %v338_v23 = vld [vmem:[%s3475_s21 + $0x80] sm:$0xff]  ;;  %v339_v25 = vld [vmem:[%s3475_s21 + $0x88] sm:$0xff] }
  0x1c   : > { %2805 = vmatpush.xpose.msk.msra.mxu0 %vm371_vm0, %v3307_v2  ;;  %2923 = vmatpush.xpose.msk.msra.mxu2 %vm371_vm0, %v3307_v2  ;;  %v326_v24 = vld [vmem:[%s3475_s21 + $0x20] sm:$0xff]  ;;  %v327_v26 = vld [vmem:[%s3475_s21 + $0x28] sm:$0xff]  ;;  %v340_v27 = vld [vmem:[%s3475_s21 + $0x90] sm:$0xff]  ;;  %s321_s20 = scalar_lea.vmem %s5234_s7, %s4885_s17 }
  0x1d   : > { %2924 = vmatpush.xpose.msk.msra.mxu3 %vm371_vm0, %v3307_v2  ;;  %2959 = vmatpush.msra.mxu1 %v3325_v4  ;;  %v328_v28 = vld [vmem:[%s3475_s21 + $0x30] sm:$0xff]  ;;  %v341_v29 = vld [vmem:[%s3475_s21 + $0x98] sm:$0xff]  ;;  %v342_v31 = vld [vmem:[%s3475_s21 + $0xa0] sm:$0xff] }
  0x1e   : > { %v329_v30 = vld [vmem:[%s3475_s21 + $0x38] sm:$0xff]  ;;  %v330_v32 = vld [vmem:[%s3475_s21 + $0x40] sm:$0xff]  ;;  %v343_v33 = vld [vmem:[%s3475_s21 + $0xa8] sm:$0xff] }
  0x1f   : > { %2961 = vmatpush.msra.mxu1 %v3333_v5  ;;  %v331_v34 = vld [vmem:[%s3475_s21 + $0x48] sm:$0xff]  ;;  %v344_v35 = vld [vmem:[%s3475_s21 + $0xb0] sm:$0xff]  ;;  %v345_v36 = vld [vmem:[%s3475_s21 + $0xb8] sm:$0xff] }
  0x20   : > { %2806 = vmatpush.xpose.msk.msra.mxu0 %vm371_vm0, %v3315_v3  ;;  %2925 = vmatpush.xpose.msk.msra.mxu2 %vm371_vm0, %v3315_v3  ;;  %v332_v37 = vld [vmem:[%s3475_s21 + $0x50] sm:$0xff]  ;;  %v346_v38 = vld [vmem:[%s3475_s21 + $0xc0] sm:$0xff]  ;;  %v333_v39 = vld [vmem:[%s3475_s21 + $0x58] sm:$0xff] }
  0x21   : > { %2926 = vmatpush.xpose.msk.msra.mxu3 %vm371_vm0, %v3315_v3  ;;  %2963 = vmatpush.msra.mxu1 %v3343_v6  ;;  %v347_v40 = vld [vmem:[%s3475_s21 + $0xc8] sm:$0xff]  ;;  %v334_v41 = vld [vmem:[%s3475_s21 + $0x60] sm:$0xff]  ;;  %v348_v42 = vld [vmem:[%s3475_s21 + $0xd0] sm:$0xff] }
  0x22   : > { %v349_v43 = vld [vmem:[%s3475_s21 + $0xd8] sm:$0xff]  ;;  %v3576_v44 = vld [vmem:[%s5229_s2] ss:$0 sm:$0xff] }
  0x23   : > { %2965 = vmatpush.msra.mxu1 %v3351_v7 }
  0x24   : > { %2807 = vmatpush.xpose.msk.msra.mxu0 %vm371_vm0, %v3325_v4  ;;  %2927 = vmatpush.xpose.msk.msra.mxu2 %vm371_vm0, %v3325_v4 }
  0x25   : > { %2928 = vmatpush.xpose.msk.msra.mxu3 %vm371_vm0, %v3325_v4  ;;  %2967 = vmatpush.msra.mxu1 %v3361_v8 }
  0x27   : > { %2969 = vmatpush.msra.mxu1 %v3369_v9 }
  0x28   : > { %2808 = vmatpush.xpose.msk.msra.mxu0 %vm371_vm0, %v3333_v5  ;;  %2929 = vmatpush.xpose.msk.msra.mxu2 %vm371_vm0, %v3333_v5 }
  0x29   : > { %2930 = vmatpush.xpose.msk.msra.mxu3 %vm371_vm0, %v3333_v5  ;;  %2971 = vmatpush.msra.mxu1 %v3379_v10 }
  0x2b   : > { %2973 = vmatpush.msra.mxu1 %v3387_v11 }
  0x2c   : > { %2809 = vmatpush.xpose.msk.msra.mxu0 %vm371_vm0, %v3343_v6  ;;  %2931 = vmatpush.xpose.msk.msra.mxu2 %vm371_vm0, %v3343_v6 }
  0x2d   : > { %2932 = vmatpush.xpose.msk.msra.mxu3 %vm371_vm0, %v3343_v6  ;;  %2975 = vmatpush.msra.mxu1 %v3397_v12 }
  0x2f   : > { %2977 = vmatpush.msra.mxu1 %v3405_v13 }
  0x30   : > { %2810 = vmatpush.xpose.msk.msra.mxu0 %vm371_vm0, %v3351_v7  ;;  %2933 = vmatpush.xpose.msk.msra.mxu2 %vm371_vm0, %v3351_v7 }
  0x31   : > { %2934 = vmatpush.xpose.msk.msra.mxu3 %vm371_vm0, %v3351_v7  ;;  %2979 = vmatpush.msra.mxu1 %v3415_v14 }
  0x33   : > { %2981 = vmatpush.msra.mxu1 %v3423_v15 }
  0x34   : > { %2811 = vmatpush.xpose.msk.msra.mxu0 %vm371_vm0, %v3361_v8  ;;  %2935 = vmatpush.xpose.msk.msra.mxu2 %vm371_vm0, %v3361_v8 }
  0x35   : > { %2936 = vmatpush.xpose.msk.msra.mxu3 %vm371_vm0, %v3361_v8 }
  0x38   : > { %2812 = vmatpush.xpose.msk.msra.mxu0 %vm371_vm0, %v3369_v9  ;;  %2937 = vmatpush.xpose.msk.msra.mxu2 %vm371_vm0, %v3369_v9 }
  0x39   : > { %2938 = vmatpush.xpose.msk.msra.mxu3 %vm371_vm0, %v3369_v9 }
  0x3c   : > { %2813 = vmatpush.xpose.msk.msra.mxu0 %vm371_vm0, %v3379_v10  ;;  %2939 = vmatpush.xpose.msk.msra.mxu2 %vm371_vm0, %v3379_v10 }
  0x3d   : > { %2940 = vmatpush.xpose.msk.msra.mxu3 %vm371_vm0, %v3379_v10 }
  0x40   : > { %2814 = vmatpush.xpose.msk.msra.mxu0 %vm371_vm0, %v3387_v11  ;;  %2941 = vmatpush.xpose.msk.msra.mxu2 %vm371_vm0, %v3387_v11 }
  0x41   : > { %2942 = vmatpush.xpose.msk.msra.mxu3 %vm371_vm0, %v3387_v11 }
  0x44   : > { %2815 = vmatpush.xpose.msk.msra.mxu0 %vm371_vm0, %v3397_v12  ;;  %2943 = vmatpush.xpose.msk.msra.mxu2 %vm371_vm0, %v3397_v12 }
  0x45   : > { %2944 = vmatpush.xpose.msk.msra.mxu3 %vm371_vm0, %v3397_v12 }
  0x48   : > { %2816 = vmatpush.xpose.msk.msra.mxu0 %vm371_vm0, %v3405_v13  ;;  %2945 = vmatpush.xpose.msk.msra.mxu2 %vm371_vm0, %v3405_v13 }
  0x49   : > { %2946 = vmatpush.xpose.msk.msra.mxu3 %vm371_vm0, %v3405_v13 }
  0x4c   : > { %2817 = vmatpush.xpose.msk.msra.mxu0 %vm371_vm0, %v3415_v14  ;;  %2947 = vmatpush.xpose.msk.msra.mxu2 %vm371_vm0, %v3415_v14 }
  0x4d   : > { %2948 = vmatpush.xpose.msk.msra.mxu3 %vm371_vm0, %v3415_v14 }
  0x50   : > { %2818 = vmatpush.xpose.msk.msra.mxu0 %vm371_vm0, %v3423_v15  ;;  %2949 = vmatpush.xpose.msk.msra.mxu2 %vm371_vm0, %v3423_v15 }
  0x51   : > { %2950 = vmatpush.xpose.msk.msra.mxu3 %vm371_vm0, %v3423_v15 }
  0x53   : > { %2819 = vmatmul.msk.f32.vlgmr.msra.gmra.mxu0 %vm371_vm0, %v322_v16  ;;  %2832 = vmatmul.msk.f32.vlgmr.msra.gmra.mxu2 %vm371_vm0, %v335_v17 }
  0x54   : > { %1338 = vmatpush.msrb.mxu0 %v3285_v0 }
  0x55   : > { %2952 = vmatpush.msrb.mxu3 %v3285_v0 }
  0x56   : > { %1339 = vmatpush.msrb.mxu0 %v3294_v1 }
  0x57   : > { %2954 = vmatpush.msrb.mxu3 %v3294_v1 }
  0x58   : > { %1340 = vmatpush.msrb.mxu0 %v3307_v2 }
  0x59   : > { %2956 = vmatpush.msrb.mxu3 %v3307_v2 }
  0x5a   : > { %1341 = vmatpush.msrb.mxu0 %v3315_v3 }
  0x5b   : > { %2958 = vmatpush.msrb.mxu3 %v3315_v3  ;;  %2820 = vmatmul.msk.f32.gmra.mxu0 %vm371_vm0, %v323_v18 }
  0x5c   : > { %1342 = vmatpush.msrb.mxu0 %v3325_v4  ;;  %2833 = vmatmul.msk.f32.gmra.mxu2 %vm371_vm0, %v336_v19 }
  0x5d   : > { %2960 = vmatpush.msrb.mxu3 %v3325_v4 }
  0x5e   : > { %1343 = vmatpush.msrb.mxu0 %v3333_v5 }
  0x5f   : > { %2962 = vmatpush.msrb.mxu3 %v3333_v5 }
  0x60   : > { %1344 = vmatpush.msrb.mxu0 %v3343_v6 }
  0x61   : > { %2964 = vmatpush.msrb.mxu3 %v3343_v6 }
  0x62   : > { %1345 = vmatpush.msrb.mxu0 %v3351_v7 }
  0x63   : > { %2966 = vmatpush.msrb.mxu3 %v3351_v7  ;;  %2821 = vmatmul.msk.f32.gmra.mxu0 %vm371_vm0, %v324_v20 }
  0x64   : > { %1346 = vmatpush.msrb.mxu0 %v3361_v8  ;;  %2834 = vmatmul.msk.f32.gmra.mxu2 %vm371_vm0, %v337_v21 }
  0x65   : > { %2968 = vmatpush.msrb.mxu3 %v3361_v8  ;;  %v350_v8 = vld [vmem:[%s3475_s21 + $0xe0] sm:$0xff] }
  0x66   : > { %1347 = vmatpush.msrb.mxu0 %v3369_v9  ;;  %2847 = vmatmul.msk.f32.vlgmr.msra.gmra.mxu3 %vm371_vm0, %v350_v8 }
  0x67   : > { %2970 = vmatpush.msrb.mxu3 %v3369_v9 }
  0x68   : > { %1348 = vmatpush.msrb.mxu0 %v3379_v10 }
  0x69   : > { %2972 = vmatpush.msrb.mxu3 %v3379_v10 }
  0x6a   : > { %1349 = vmatpush.msrb.mxu0 %v3387_v11 }
  0x6b   : > { %2974 = vmatpush.msrb.mxu3 %v3387_v11  ;;  %2822 = vmatmul.msk.f32.gmra.mxu0 %vm371_vm0, %v325_v22 }
  0x6c   : > { %1350 = vmatpush.msrb.mxu0 %v3397_v12  ;;  %2835 = vmatmul.msk.f32.gmra.mxu2 %vm371_vm0, %v338_v23 }
  0x6d   : > { %2976 = vmatpush.msrb.mxu3 %v3397_v12 }
  0x6e   : > { %1351 = vmatpush.msrb.mxu0 %v3405_v13 }
  0x6f   : > { %2978 = vmatpush.msrb.mxu3 %v3405_v13 }
  0x70   : > { %1352 = vmatpush.msrb.mxu0 %v3415_v14 }
  0x71   : > { %2980 = vmatpush.msrb.mxu3 %v3415_v14 }
  0x72   : > { %1353 = vmatpush.msrb.mxu0 %v3423_v15 }
  0x73   : > { %2982 = vmatpush.msrb.mxu3 %v3423_v15  ;;  %2823 = vmatmul.msk.f32.gmra.mxu0 %vm371_vm0, %v326_v24 }
  0x74   : > { %2836 = vmatmul.msk.f32.gmra.mxu2 %vm371_vm0, %v339_v25 }
  0x7b   : > { %2824 = vmatmul.msk.f32.gmra.mxu0 %vm371_vm0, %v327_v26 }
  0x7c   : > { %2837 = vmatmul.msk.f32.gmra.mxu2 %vm371_vm0, %v340_v27 }
  0x83   : > { %2825 = vmatmul.msk.f32.gmra.mxu0 %vm371_vm0, %v328_v28 }
  0x84   : > { %2838 = vmatmul.msk.f32.gmra.mxu2 %vm371_vm0, %v341_v29 }
  0x8b   : > { %2826 = vmatmul.msk.f32.gmra.mxu0 %vm371_vm0, %v329_v30  ;;  %v351_v30 = vld [vmem:[%s3475_s21 + $0xe8] sm:$0xff] }
  0x8c   : > { %2839 = vmatmul.msk.f32.gmra.mxu2 %vm371_vm0, %v342_v31  ;;  %2848 = vmatmul.msk.f32.gmra.mxu3 %vm371_vm0, %v351_v30 }
  0x93   : > { %2827 = vmatmul.msk.f32.gmra.mxu0 %vm371_vm0, %v330_v32 }
  0x94   : > { %2840 = vmatmul.msk.f32.gmra.mxu2 %vm371_vm0, %v343_v33  ;;  %v352_v33 = vld [vmem:[%s3475_s21 + $0xf0] sm:$0xff] }
  0x95   : > { %2849 = vmatmul.msk.f32.gmra.mxu3 %vm371_vm0, %v352_v33 }
  0x9b   : > { %2828 = vmatmul.msk.f32.gmra.mxu0 %vm371_vm0, %v331_v34 }
  0x9c   : > { %2841 = vmatmul.msk.f32.gmra.mxu2 %vm371_vm0, %v344_v35 }
  0xa3   : > { %2829 = vmatmul.msk.f32.gmra.mxu0 %vm371_vm0, %v332_v37 }
  0xa4   : > { %2842 = vmatmul.msk.f32.gmra.mxu2 %vm371_vm0, %v345_v36  ;;  %v5235_v36 = vlaneseq }
  0xa6   : > { %v3689_v37 = vand.u32 127, %v5235_v36 }
  0xab   : > { %2830 = vmatmul.msk.f32.gmra.mxu0 %vm371_vm0, %v333_v39 }
  0xac   : > { %2843 = vmatmul.msk.f32.gmra.mxu2 %vm371_vm0, %v346_v38 }
  0xb3   : > { %2831 = vmatmul.msk.f32.gmra.mxu0 %vm371_vm0, %v334_v41  ;;  %v353_v41 = vld [vmem:[%s3475_s21 + $0xf8] sm:$0xff] }
  0xb4   : > { %2844 = vmatmul.msk.f32.gmra.mxu2 %vm371_vm0, %v347_v40  ;;  %2850 = vmatmul.msk.f32.gmra.mxu3 %vm371_vm0, %v353_v41 }
  0xbc   : > { %2845 = vmatmul.msk.f32.gmra.mxu2 %vm371_vm0, %v348_v42 }
  0xc4   : > { %2846 = vmatmul.msk.f32.gmra.mxu2 %vm371_vm0, %v349_v43 }
  0xd0   : > { %v533_v45 = vpop.f32.mrf.mxu0 }
  0xd1   : > { %v3579_v46 = vsub.f32 %v3576_v44, %v533_v45 }
  0xd3   : > { %666 = vmin.xlane.f32.xlu0 %v3579_v46 }
  0xd6   : > { %v572_v47 = vpop.f32.mrf.mxu2 }
  0xd7   : > { %v3583_v48 = vsub.f32 %v3576_v44, %v572_v47 }
  0xd8   : > { %v536_v49 = vpop.f32.mrf.mxu0 }
  0xd9   : > { %v3586_v50 = vsub.f32 %v3576_v44, %v536_v49  ;;  %692 = vmin.xlane.f32.xlu1 %v3583_v48 }
  0xdb   : > { %668 = vmin.xlane.f32.xlu0 %v3586_v50 }
  0xdf   : > { %v575_v51 = vpop.f32.mrf.mxu2 }
  0xe0   : > { %v3591_v52 = vsub.f32 %v3576_v44, %v575_v51  ;;  %v539_v53 = vpop.f32.mrf.mxu0 }
  0xe1   : > { %v3594_v54 = vsub.f32 %v3576_v44, %v539_v53 }
  0xe2   : > { %694 = vmin.xlane.f32.xlu2 %v3591_v52 }
  0xe3   : > { %670 = vmin.xlane.f32.xlu0 %v3594_v54 }
  0xe7   : > { %v578_v55 = vpop.f32.mrf.mxu2 }
  0xe8   : > { %v3599_v56 = vsub.f32 %v3576_v44, %v578_v55  ;;  %v542_v57 = vpop.f32.mrf.mxu0 }
  0xe9   : > { %v3606_v61 = vsub.f32 %v3576_v44, %v542_v57 }
  0xeb   : > { %696 = vmin.xlane.f32.xlu0 %v3599_v56 }
  0xef   : > { %v581_v58 = vpop.f32.mrf.mxu2 }
  0xf0   : > { %v3603_v59 = vsub.f32 %v3576_v44, %v581_v58  ;;  %v545_v60 = vpop.f32.mrf.mxu0 }
  0xf1   : > { %v3609_v62 = vsub.f32 %v3576_v44, %v545_v60 }
  0xf2   : > { %698 = vmin.xlane.f32.xlu2 %v3603_v59 }
  0xf3   : > { %672 = vmin.xlane.f32.xlu0 %v3606_v61  ;;  %674 = vmin.xlane.f32.xlu1 %v3609_v62 }
  0xf7   : > { %v3614_v63 = vpop.f32.mrf.mxu2 }
  0xf8   : > { %v548_v0 = vpop.f32.mrf.mxu0  ;;  %v3705_v47 = vsub.f32 %v3576_v44, %v3614_v63 }
  0xf9   : > { %v3617_v1 = vsub.f32 %v3576_v44, %v548_v0 }
  0xfb   : > { %676 = vmin.xlane.f32.xlu1 %v3617_v1 }
  0xff   : > { %v3620_v2 = vpop.f32.mrf.mxu2 }
 0x100   : > { %v551_v3 = vpop.f32.mrf.mxu0 }
 0x101   : > { %v3623_v4 = vsub.f32 %v3576_v44, %v551_v3 }
 0x103   : > { %678 = vmin.xlane.f32.xlu2 %v3623_v4 }
 0x107   : > { %v3626_v5 = vpop.f32.mrf.mxu2 }
 0x108   : > { %v554_v6 = vpop.f32.mrf.mxu0 }
 0x109   : > { %v3629_v7 = vsub.f32 %v3576_v44, %v554_v6 }
 0x10b   : > { %680 = vmin.xlane.f32.xlu2 %v3629_v7 }
 0x10f   : > { %v3634_v9 = vpop.f32.mrf.mxu2 }
 0x110   : > { %v557_v10 = vpop.f32.mrf.mxu0 }
 0x111   : > { %v3637_v11 = vsub.f32 %v3576_v44, %v557_v10  ;;  %v3740_v10 = vsub.f32 %v3576_v44, %v3620_v2 }
 0x113   : > { %682 = vmin.xlane.f32.xlu1 %v3637_v11 }
 0x117   : > { %v596_v12 = vpop.f32.mrf.mxu2 }
 0x118   : > { %v3641_v13 = vsub.f32 %v3576_v44, %v596_v12  ;;  %v560_v14 = vpop.f32.mrf.mxu0 }
 0x119   : > { %v3644_v15 = vsub.f32 %v3576_v44, %v560_v14 }
 0x11a   : > { %708 = vmin.xlane.f32.xlu2 %v3641_v13 }
 0x11b   : > { %684 = vmin.xlane.f32.xlu0 %v3644_v15 }
 0x11f   : > { %v599_v16 = vpop.f32.mrf.mxu2 }
 0x120   : > { %v3649_v17 = vsub.f32 %v3576_v44, %v599_v16  ;;  %v563_v18 = vpop.f32.mrf.mxu0 }
 0x121   : > { %v3653_v19 = vsub.f32 %v3576_v44, %v563_v18 }
 0x122   : > { %710 = vmin.xlane.f32.xlu2 %v3649_v17 }
 0x127   : > { %v602_v20 = vpop.f32.mrf.mxu2 }
 0x128   : > { %v3656_v21 = vsub.f32 %v3576_v44, %v602_v20  ;;  %v566_v22 = vpop.f32.mrf.mxu0 }
 0x129   : > { %v3661_v23 = vsub.f32 %v3576_v44, %v566_v22 }
 0x12a   : > { %712 = vmin.xlane.f32.xlu0 %v3656_v21  ;;  %686 = vmin.xlane.f32.xlu2 %v3653_v19 }
 0x12f   : > { %v605_v24 = vpop.f32.mrf.mxu2 }
 0x130   : > { %v3664_v25 = vsub.f32 %v3576_v44, %v605_v24  ;;  %v569_v26 = vpop.f32.mrf.mxu0 }
 0x131   : > { %v3669_v27 = vsub.f32 %v3576_v44, %v569_v26 }
 0x132   : > { %714 = vmin.xlane.f32.xlu1 %v3664_v25  ;;  %688 = vmin.xlane.f32.xlu2 %v3661_v23 }
 0x137   : > { %v608_v28 = vpop.f32.mrf.mxu2 }
 0x138   : > { %v3672_v29 = vsub.f32 %v3576_v44, %v608_v28 }
 0x13a   : > { %716 = vmin.xlane.f32.xlu0 %v3672_v29  ;;  %690 = vmin.xlane.f32.xlu1 %v3669_v27 }
 0x13f   : > { %v611_v31 = vpop.f32.mrf.mxu2 }
 0x140   : > { %v3679_v32 = vsub.f32 %v3576_v44, %v611_v31 }
 0x142   : > { %718 = vmin.xlane.f32.xlu1 %v3679_v32 }
 0x146   : > { %v3684_v34 = vpop.xlane.xlu0 %666 }
 0x147   : > { %v614_v51 = vpop.f32.mrf.mxu2 }
 0x148   : > { %v3719_v58 = vsub.f32 %v3576_v44, %v614_v51 }
 0x14c   : > { %v693_v43 = vpop.xlane.xlu1 %692 }
 0x14d   : > { %vm743_vm5 = vcmp.le.f32.partialorder %v3583_v48, %v693_v43 }
 0x14e   : > { %v3686_v35 = vpop.xlane.xlu0 %668  ;;  %v3745_v14 = vsel %vm743_vm5, %v3689_v37, 128 }
 0x14f   : > { %v977_v48 = vshra.s32 %v3745_v14, 16 }
 0x151   : > { %v3757_v20 = vcvt.s32.f32 %v977_v48  ;;  %v3812_v48 = vsub.f32 %v3576_v44, %v3626_v5 }
 0x155   : > { %v3707_v49 = vpop.xlane.xlu2 %694 }
 0x156   : > { %v671_v38 = vpop.xlane.xlu0 %670  ;;  %vm744_vm13 = vcmp.le.f32.partialorder %v3591_v52, %v3707_v49 }
 0x157   : > { %vm732_vm1 = vcmp.le.f32.partialorder %v3594_v54, %v671_v38 }
 0x158   : > { %v3693_v39 = vsel %vm732_vm1, %v3689_v37, 128 }
 0x159   : > { %v823_v40 = vshra.s32 %v3693_v39, 16 }
 0x15b   : > { %v3698_v42 = vcvt.s32.f32 %v823_v40 }
 0x15d   : > { %826 = vmin.xlane.f32.xlu0 %v3698_v42 }
 0x15e   : > { %v3701_v45 = vpop.xlane.xlu0 %696 }
 0x165   : > { %700 = vmin.xlane.f32.xlu0 %v3705_v47 }
 0x166   : > { %v673_v53 = vpop.xlane.xlu0 %672  ;;  %v675_v54 = vpop.xlane.xlu1 %674 }
 0x167   : > { %vm733_vm2 = vcmp.le.f32.partialorder %v3606_v61, %v673_v53  ;;  %vm734_vm3 = vcmp.le.f32.partialorder %v3609_v62, %v675_v54  ;;  %v3729_v61 = vpop.xlane.xlu2 %698 }
 0x168   : > { %v3713_v55 = vsel %vm733_vm2, %v3689_v37, 128  ;;  %v3716_v57 = vsel %vm734_vm3, %v3689_v37, 128  ;;  %vm730_vm3 = vcmp.le.f32.partialorder %v3579_v46, %v3684_v34 }
 0x169   : > { %v837_v60 = vshra.s32 %v3713_v55, 16  ;;  %v851_v63 = vshra.s32 %v3716_v57, 16 }
 0x16b   : > { %v3723_v0 = vcvt.s32.f32 %v837_v60  ;;  %v3725_v3 = vcvt.s32.f32 %v851_v63 }
 0x16d   : > { %720 = vmin.xlane.f32.xlu0 %v3719_v58  ;;  %840 = vmin.xlane.f32.xlu2 %v3723_v0 }
 0x16e   : > { %854 = vmin.xlane.f32.xlu1 %v3725_v3  ;;  %v677_v62 = vpop.xlane.xlu1 %676 }
 0x16f   : > { %vm735_vm4 = vcmp.le.f32.partialorder %v3617_v1, %v677_v62 }
 0x170   : > { %v3734_v6 = vsel %vm735_vm4, %v3689_v37, 128 }
 0x171   : > { %v865_v8 = vshra.s32 %v3734_v6, 16 }
 0x173   : > { %v3742_v12 = vcvt.s32.f32 %v865_v8 }
 0x175   : > { %702 = vmin.xlane.f32.xlu2 %v3740_v10 }
 0x176   : > { %868 = vmin.xlane.f32.xlu1 %v3742_v12  ;;  %v679_v1 = vpop.xlane.xlu2 %678 }
 0x177   : > { %vm736_vm6 = vcmp.le.f32.partialorder %v3623_v4, %v679_v1 }
 0x178   : > { %v3752_v16 = vsel %vm736_vm6, %v3689_v37, 128  ;;  %vm746_vm6 = vcmp.le.f32.partialorder %v3603_v59, %v3729_v61 }
 0x179   : > { %v879_v2 = vshra.s32 %v3752_v16, 16  ;;  %v878_v59 = vand.u32 65535, %v3752_v16 }
 0x17b   : > { %v3755_v18 = vcvt.s32.f32 %v879_v2 }
 0x17d   : > { %882 = vmin.xlane.f32.xlu0 %v3755_v18  ;;  %980 = vmin.xlane.f32.xlu2 %v3757_v20 }
 0x17e   : > { %v681_v22 = vpop.xlane.xlu2 %680 }
 0x17f   : > { %vm737_vm7 = vcmp.le.f32.partialorder %v3629_v7, %v681_v22  ;;  %v3817_v22 = vsel %vm744_vm13, %v3689_v37, 128 }
 0x180   : > { %v3763_v4 = vsel %vm737_vm7, %v3689_v37, 128  ;;  %v991_v52 = vshra.s32 %v3817_v22, 16  ;;  %vm745_vm7 = vcmp.le.f32.partialorder %v3599_v56, %v3701_v45 }
 0x181   : > { %v893_v24 = vshra.s32 %v3763_v4, 16 }
 0x183   : > { %v3766_v26 = vcvt.s32.f32 %v893_v24 }
 0x185   : > { %896 = vmin.xlane.f32.xlu0 %v3766_v26 }
 0x186   : > { %v683_v28 = vpop.xlane.xlu1 %682 }
 0x187   : > { %vm738_vm8 = vcmp.le.f32.partialorder %v3637_v11, %v683_v28 }
 0x188   : > { %v3771_v30 = vsel %vm738_vm8, %v3689_v37, 128 }
 0x189   : > { %v907_v31 = vshra.s32 %v3771_v30, 16 }
 0x18b   : > { %v3774_v33 = vcvt.s32.f32 %v907_v31 }
 0x18d   : > { %v709_v7 = vpop.xlane.xlu2 %708  ;;  %910 = vmin.xlane.f32.xlu1 %v3774_v33 }
 0x18e   : > { %vm751_vm9 = vcmp.le.f32.partialorder %v3641_v13, %v709_v7  ;;  %v685_v40 = vpop.xlane.xlu0 %684  ;;  %v3831_v7 = vcvt.s32.f32 %v991_v52 }
 0x18f   : > { %v3779_v38 = vsel %vm751_vm9, %v3689_v37, 128  ;;  %vm739_vm10 = vcmp.le.f32.partialorder %v3644_v15, %v685_v40 }
 0x190   : > { %v1089_v11 = vshra.s32 %v3779_v38, 16  ;;  %v3784_v41 = vsel %vm739_vm10, %v3689_v37, 128 }
 0x191   : > { %v921_v43 = vshra.s32 %v3784_v41, 16 }
 0x192   : > { %v3789_v53 = vcvt.s32.f32 %v1089_v11 }
 0x193   : > { %v3787_v51 = vcvt.s32.f32 %v921_v43 }
 0x195   : > { %v711_v13 = vpop.xlane.xlu2 %710  ;;  %924 = vmin.xlane.f32.xlu2 %v3787_v51  ;;  %1092 = vmin.xlane.f32.xlu1 %v3789_v53 }
 0x196   : > { %vm752_vm1 = vcmp.le.f32.partialorder %v3649_v17, %v711_v13  ;;  %v836_v17 = vand.u32 65535, %v3713_v55  ;;  %v850_v13 = vand.u32 65535, %v3716_v57  ;;  %v3881_v57 = vsel %vm730_vm3, %v3689_v37, 128 }
 0x197   : > { %v795_v34 = vshra.s32 %v3881_v57, 16 }
 0x198   : > { %v852_v55 = vcvt.s32.f32 %v850_v13 }
 0x199   : > { %v3898_v13 = vcvt.s32.f32 %v795_v34 }
 0x19d   : > { %v687_v54 = vpop.xlane.xlu2 %686  ;;  %v713_v24 = vpop.xlane.xlu0 %712 }
 0x19e   : > { %vm740_vm11 = vcmp.le.f32.partialorder %v3653_v19, %v687_v54  ;;  %vm753_vm15 = vcmp.le.f32.partialorder %v3656_v21, %v713_v24  ;;  %v822_v54 = vand.u32 65535, %v3693_v39 }
 0x19f   : > { %v3795_v15 = vsel %vm740_vm11, %v3689_v37, 128  ;;  %v3836_v11 = vsel %vm753_vm15, %v3689_v37, 128  ;;  %vm731_vm11 = vcmp.le.f32.partialorder %v3586_v50, %v3686_v35 }
 0x1a0   : > { %v935_v60 = vshra.s32 %v3795_v15, 16  ;;  %v1117_v21 = vshra.s32 %v3836_v11, 16  ;;  %v3955_v50 = vsel %vm731_vm11, %v3689_v37, 128 }
 0x1a2   : > { %v3798_v63 = vcvt.s32.f32 %v935_v60 }
 0x1a4   : > { %938 = vmin.xlane.f32.xlu1 %v3798_v63 }
 0x1a5   : > { %v3801_v62 = vpop.xlane.xlu1 %714  ;;  %v689_v8 = vpop.xlane.xlu2 %688 }
 0x1a6   : > { %vm741_vm12 = vcmp.le.f32.partialorder %v3661_v23, %v689_v8  ;;  %v617_v23 = vpop.f32.mrf.mxu3  ;;  %v824_v8 = vcvt.s32.f32 %v822_v54  ;;  %v3872_v54 = vsub.f32 %v3576_v44, %v3634_v9  ;;  %vm754_vm9 = vcmp.le.f32.partialorder %v3664_v25, %v3801_v62 }
 0x1a7   : > { %v3805_v1 = vsel %vm741_vm12, %v3689_v37, 128  ;;  %v3828_v5 = vsub.f32 %v3576_v44, %v617_v23  ;;  %v3924_v45 = vsel %vm754_vm9, %v3689_v37, 128 }
 0x1a8   : > { %v949_v19 = vshra.s32 %v3805_v1, 16  ;;  %v1131_v62 = vshra.s32 %v3924_v45, 16 }
 0x1aa   : > { %v3814_v2 = vcvt.s32.f32 %v949_v19  ;;  %v3854_v19 = vsel %vm752_vm1, %v3689_v37, 128 }
 0x1ab   : > { %v1103_v24 = vshra.s32 %v3854_v19, 16 }
 0x1ac   : > { %952 = vmin.xlane.f32.xlu2 %v3814_v2  ;;  %704 = vmin.xlane.f32.xlu1 %v3812_v48 }
 0x1ad   : > { %v691_v28 = vpop.xlane.xlu1 %690  ;;  %v3845_v43 = vpop.xlane.xlu0 %716  ;;  %v3859_v52 = vcvt.s32.f32 %v1103_v24 }
 0x1ae   : > { %vm742_vm14 = vcmp.le.f32.partialorder %v3669_v27, %v691_v28  ;;  %v3842_v27 = vcvt.s32.f32 %v1117_v21  ;;  %v620_v39 = vpop.f32.mrf.mxu3  ;;  %v838_v21 = vcvt.s32.f32 %v836_v17  ;;  %v3896_v17 = vsel %vm746_vm6, %v3689_v37, 128 }
 0x1af   : > { %v3824_v49 = vsel %vm742_vm14, %v3689_v37, 128  ;;  %vm755_vm15 = vcmp.le.f32.partialorder %v3672_v29, %v3845_v43 }
 0x1b0   : > { %v963_v31 = vshra.s32 %v3824_v49, 16 }
 0x1b2   : > { %v3833_v40 = vcvt.s32.f32 %v963_v31 }
 0x1b4   : > { %722 = vmin.xlane.f32.xlu2 %v3828_v5  ;;  %994 = vmin.xlane.f32.xlu1 %v3831_v7 }
 0x1b5   : > { %966 = vmin.xlane.f32.xlu0 %v3833_v40  ;;  %v3857_v28 = vpop.xlane.xlu1 %718 }
 0x1b6   : > { %v623_v9 = vpop.f32.mrf.mxu3  ;;  %vm756_vm13 = vcmp.le.f32.partialorder %v3679_v32, %v3857_v28  ;;  %v809_v32 = vshra.s32 %v3955_v50, 16 }
 0x1b7   : > { %v3891_v24 = vsub.f32 %v3576_v44, %v623_v9 }
 0x1bc   : > { %1120 = vmin.xlane.f32.xlu2 %v3842_v27 }
 0x1d0   : > { %v3849_v60 = vpop.xlane.xlu0 %826 }
 0x1d1   : > { %vm828_vm2 = vcmp.eq.f32.partialorder %v3698_v42, %v3849_v60 }
 0x1d2   : > { %v829_v23 = vsel %vm828_vm2, %v824_v8, inf }
 0x1d3   : > { %830 = vmin.xlane.f32.xlu0 %v829_v23 }
 0x1d8   : > { %v3864_v31 = vpop.xlane.xlu0 %700 }
 0x1d9   : > { %vm747_vm3 = vcmp.le.f32.partialorder %v3705_v47, %v3864_v31 }
 0x1db   : > { %1106 = vmin.xlane.f32.xlu0 %v3859_v52 }
 0x1e0   : > { %v3868_v42 = vpop.xlane.xlu2 %840 }
 0x1e1   : > { %v3874_v8 = vpop.xlane.xlu1 %854  ;;  %vm842_vm4 = vcmp.eq.f32.partialorder %v3723_v0, %v3868_v42  ;;  %v3888_v0 = vsub.f32 %v3576_v44, %v620_v39  ;;  %v1019_v39 = vshra.s32 %v3896_v17, 16 }
 0x1e2   : > { %v843_v23 = vsel %vm842_vm4, %v838_v21, inf  ;;  %vm856_vm5 = vcmp.eq.f32.partialorder %v3725_v3, %v3874_v8  ;;  %v3893_v3 = vpop.xlane.xlu0 %720  ;;  %v864_v21 = vand.u32 65535, %v3734_v6  ;;  %v880_v6 = vcvt.s32.f32 %v878_v59 }
 0x1e3   : > { %844 = vmin.xlane.f32.xlu1 %v843_v23  ;;  %706 = vmin.xlane.f32.xlu0 %v3872_v54  ;;  %v857_v46 = vsel %vm856_vm5, %v852_v55, inf  ;;  %v3916_v16 = vcvt.s32.f32 %v1019_v39  ;;  %v906_v59 = vand.u32 65535, %v3771_v30  ;;  %vm757_vm1 = vcmp.le.f32.partialorder %v3719_v58, %v3893_v3 }
 0x1e4   : > { %858 = vmin.xlane.f32.xlu2 %v857_v46  ;;  %v866_v23 = vcvt.s32.f32 %v864_v21  ;;  %v3921_v46 = vsel %vm745_vm7, %v3689_v37, 128  ;;  %v892_v21 = vand.u32 65535, %v3763_v4 }
 0x1e5   : > { %v1005_v25 = vshra.s32 %v3921_v46, 16 }
 0x1e7   : > { %v3929_v34 = vcvt.s32.f32 %v1005_v25  ;;  %v3958_v25 = vsel %vm756_vm13, %v3689_v37, 128 }
 0x1e8   : > { %v1159_v28 = vshra.s32 %v3958_v25, 16 }
 0x1e9   : > { %v3904_v61 = vpop.xlane.xlu1 %868 }
 0x1ea   : > { %vm870_vm8 = vcmp.eq.f32.partialorder %v3742_v12, %v3904_v61  ;;  %v703_v12 = vpop.xlane.xlu2 %702 }
 0x1eb   : > { %724 = vmin.xlane.f32.xlu1 %v3888_v0  ;;  %726 = vmin.xlane.f32.xlu0 %v3891_v24  ;;  %v871_v56 = vsel %vm870_vm8, %v866_v23, inf  ;;  %vm748_vm4 = vcmp.le.f32.partialorder %v3740_v10, %v703_v12  ;;  %v1088_v10 = vand.u32 65535, %v3779_v38 }
 0x1ec   : > { %798 = vmin.xlane.f32.xlu2 %v3898_v13  ;;  %v4007_v31 = vsel %vm748_vm4, %v3689_v37, 128 }
 0x1f0   : > { %v3914_v55 = vpop.xlane.xlu0 %882 }
 0x1f1   : > { %vm884_vm10 = vcmp.eq.f32.partialorder %v3755_v18, %v3914_v55  ;;  %v3931_v18 = vcvt.s32.f32 %v1131_v62 }
 0x1f2   : > { %v885_v9 = vsel %vm884_vm10, %v880_v6, inf  ;;  %v626_v6 = vpop.f32.mrf.mxu3  ;;  %v3945_v23 = vpop.xlane.xlu2 %980 }
 0x1f3   : > { %1022 = vmin.xlane.f32.xlu0 %v3916_v16  ;;  %872 = vmin.xlane.f32.xlu1 %v871_v56  ;;  %v3948_v4 = vsub.f32 %v3576_v44, %v626_v6  ;;  %v908_v56 = vcvt.s32.f32 %v906_v59  ;;  %v920_v44 = vand.u32 65535, %v3784_v41  ;;  %v3975_v41 = vsel %vm755_vm15, %v3689_v37, 128 }
 0x1f4   : > { %886 = vmin.xlane.f32.xlu2 %v885_v9  ;;  %v894_v9 = vcvt.s32.f32 %v892_v21  ;;  %v3970_v21 = vcvt.s32.f32 %v809_v32  ;;  %v3978_v59 = vsel %vm757_vm1, %v3689_v37, 128  ;;  %v3980_v6 = vcvt.s32.f32 %v1159_v28 }
 0x1f5   : > { %v922_v62 = vcvt.s32.f32 %v920_v44  ;;  %v1145_v58 = vshra.s32 %v3975_v41, 16  ;;  %v1173_v43 = vshra.s32 %v3978_v59, 16  ;;  %v1047_v28 = vshra.s32 %v4007_v31, 16 }
 0x1f6   : > { %vm982_vm9 = vcmp.eq.f32.partialorder %v3757_v20, %v3945_v23 }
 0x1f8   : > { %v3936_v39 = vpop.xlane.xlu0 %896 }
 0x1f9   : > { %vm898_vm12 = vcmp.eq.f32.partialorder %v3766_v26, %v3936_v39 }
 0x1fa   : > { %v899_v35 = vsel %vm898_vm12, %v894_v9, inf  ;;  %v3992_v9 = vcvt.s32.f32 %v1173_v43 }
 0x1fb   : > { %1008 = vmin.xlane.f32.xlu1 %v3929_v34 }
 0x1fc   : > { %1134 = vmin.xlane.f32.xlu2 %v3931_v18 }
 0x200   : > { %v3950_v30 = vpop.xlane.xlu1 %910 }
 0x201   : > { %vm912_vm14 = vcmp.eq.f32.partialorder %v3774_v33, %v3950_v30 }
 0x202   : > { %v913_v26 = vsel %vm912_vm14, %v908_v56, inf  ;;  %v934_v56 = vand.u32 65535, %v3795_v15 }
 0x203   : > { %900 = vmin.xlane.f32.xlu1 %v899_v35  ;;  %914 = vmin.xlane.f32.xlu0 %v913_v26  ;;  %v3996_v35 = vsel %vm747_vm3, %v3689_v37, 128 }
 0x204   : > { %728 = vmin.xlane.f32.xlu2 %v3948_v4  ;;  %v1033_v26 = vshra.s32 %v3996_v35, 16  ;;  %v936_v47 = vcvt.s32.f32 %v934_v56 }
 0x206   : > { %v4009_v32 = vcvt.s32.f32 %v1033_v26  ;;  %v976_v26 = vand.u32 65535, %v3745_v14 }
 0x208   : > { %v3968_v33 = vpop.xlane.xlu2 %924  ;;  %v3986_v3 = vpop.xlane.xlu1 %1092 }
 0x209   : > { %vm926_vm2 = vcmp.eq.f32.partialorder %v3787_v51, %v3968_v33  ;;  %v3990_v51 = vcvt.s32.f32 %v1145_v58  ;;  %vm1094_vm7 = vcmp.eq.f32.partialorder %v3789_v53, %v3986_v3  ;;  %v1090_v58 = vcvt.s32.f32 %v1088_v10 }
 0x20a   : > { %v927_v29 = vsel %vm926_vm2, %v922_v62, inf  ;;  %v978_v53 = vcvt.s32.f32 %v976_v26 }
 0x20b   : > { %812 = vmin.xlane.f32.xlu1 %v3970_v21  ;;  %928 = vmin.xlane.f32.xlu0 %v927_v29  ;;  %v4017_v29 = vcvt.s32.f32 %v1047_v28  ;;  %v1095_v56 = vsel %vm1094_vm7, %v1090_v58, inf }
 0x20c   : > { %1162 = vmin.xlane.f32.xlu2 %v3980_v6  ;;  %v983_v28 = vsel %vm982_vm9, %v978_v53, inf }
 0x213   : > { %1148 = vmin.xlane.f32.xlu1 %v3990_v51  ;;  %1176 = vmin.xlane.f32.xlu0 %v3992_v9 }
 0x217   : > { %v4002_v44 = vpop.xlane.xlu1 %938 }
 0x218   : > { %vm940_vm5 = vcmp.eq.f32.partialorder %v3798_v63, %v4002_v44 }
 0x219   : > { %v941_v15 = vsel %vm940_vm5, %v936_v47, inf }
 0x21a   : > { %942 = vmin.xlane.f32.xlu2 %v941_v15 }
 0x21b   : > { %1036 = vmin.xlane.f32.xlu1 %v4009_v32 }
 0x21f   : > { %v4014_v12 = vpop.xlane.xlu2 %952  ;;  %v705_v62 = vpop.xlane.xlu1 %704 }
 0x220   : > { %vm749_vm6 = vcmp.le.f32.partialorder %v3812_v48, %v705_v62  ;;  %v948_v48 = vand.u32 65535, %v3805_v1  ;;  %vm954_vm10 = vcmp.eq.f32.partialorder %v3814_v2, %v4014_v12  ;;  %v962_v62 = vand.u32 65535, %v3824_v49 }
 0x221   : > { %v4022_v63 = vsel %vm749_vm6, %v3689_v37, 128 }
 0x222   : > { %1050 = vmin.xlane.f32.xlu2 %v4017_v29  ;;  %v1061_v43 = vshra.s32 %v4022_v63, 16  ;;  %v950_v10 = vcvt.s32.f32 %v948_v48  ;;  %v964_v20 = vcvt.s32.f32 %v962_v62  ;;  %v833_v48 = vcvt.f32.s32 %v3849_v60 }
 0x223   : > { %1096 = vmin.xlane.f32.xlu1 %v1095_v56 }
 0x224   : > { %v4026_v38 = vcvt.s32.f32 %v1061_v43  ;;  %v955_v14 = vsel %vm954_vm10, %v950_v10, inf  ;;  %v1116_v43 = vand.u32 65535, %v3836_v11  ;;  %v834_v53 = vshll.u32 %v833_v48, 16 }
 0x225   : > { %v1102_v10 = vand.u32 65535, %v3854_v19 }
 0x226   : > { %1064 = vmin.xlane.f32.xlu0 %v4026_v38  ;;  %v1118_v49 = vcvt.s32.f32 %v1116_v43  ;;  %v990_v43 = vand.u32 65535, %v3817_v22 }
 0x227   : > { %v723_v47 = vpop.xlane.xlu2 %722  ;;  %v4059_v11 = vpop.xlane.xlu1 %994  ;;  %v1104_v62 = vcvt.s32.f32 %v1102_v10 }
 0x228   : > { %vm758_vm8 = vcmp.le.f32.partialorder %v3828_v5, %v723_v47  ;;  %v4041_v5 = vpop.xlane.xlu0 %966  ;;  %vm996_vm15 = vcmp.eq.f32.partialorder %v3831_v7, %v4059_v11 }
 0x229   : > { %v4037_v15 = vsel %vm758_vm8, %v3689_v37, 128  ;;  %vm968_vm11 = vcmp.eq.f32.partialorder %v3833_v40, %v4041_v5 }
 0x22a   : > { %v1187_v1 = vshra.s32 %v4037_v15, 16  ;;  %v969_v2 = vsel %vm968_vm11, %v964_v20, inf }
 0x22b   : > { %984 = vmin.xlane.f32.xlu1 %v983_v28 }
 0x22c   : > { %v4043_v58 = vcvt.s32.f32 %v1187_v1  ;;  %v5240_v1 = vmov 1.0  }
 0x22e   : > { %956 = vmin.xlane.f32.xlu0 %v955_v14  ;;  %v5236_v14 = vmov 0.0  }
 0x22f   : > { %v4049_v56 = vpop.xlane.xlu2 %1120 }
 0x230   : > { %vm1122_vm12 = vcmp.eq.f32.partialorder %v3842_v27, %v4049_v56 }
 0x231   : > { %v1123_v26 = vsel %vm1122_vm12, %v1118_v49, inf }
 0x233   : > { %1190 = vmin.xlane.f32.xlu1 %v4043_v58 }
 0x236   : > { %970 = vmin.xlane.f32.xlu0 %v969_v2 }
 0x23e   : > { %1124 = vmin.xlane.f32.xlu0 %v1123_v26  ;;  %v847_v26 = vcvt.f32.s32 %v3868_v42  ;;  %v861_v42 = vcvt.f32.s32 %v3874_v8 }
 0x246   : > { %v831_v47 = vpop.xlane.xlu0 %830 }
 0x247   : > { %v832_v40 = vcvt.f32.s32 %v831_v47 }
 0x249   : > { %v4054_v28 = vadd.s32 %v834_v53, %v832_v40  ;;  %v992_v53 = vcvt.s32.f32 %v990_v43  ;;  %v794_v43 = vand.u32 65535, %v3881_v57 }
 0x24b   : > { %vm1244_vm13 = vcmp.eq.s32.totalorder %v3689_v37, %v4054_v28  ;;  %v997_v7 = vsel %vm996_vm15, %v992_v53, inf  ;;  %v796_v53 = vcvt.s32.f32 %v794_v43 }
 0x24c   : > { %v4062_v27 = vsel %vm1244_vm13, 1.0, %v5236_v14  ;;  %2885 = vmatmul.msk.f32.vlgmr.msra.gmra.mxu1 %vm1244_vm13, %v5240_v1 }
 0x24d   : > { %v2200_v20 = vmax.f32 %v4062_v27, -128.0 }
 0x24e   : > { %v4065_v60 = vpop.xlane.xlu0 %1106 }
 0x24f   : > { %vm1108_vm14 = vcmp.eq.f32.partialorder %v3859_v52, %v4065_v60  ;;  %v2232_v2 = vmin.f32 %v2200_v20, 127.0  ;;  %v848_v20 = vshll.u32 %v847_v26, 16 }
 0x250   : > { %v1109_v19 = vsel %vm1108_vm14, %v1104_v62, inf }
 0x251   : > { %1110 = vmin.xlane.f32.xlu2 %v1109_v19  ;;  %v2988_v49 = vcvt.f32.s32 %v2232_v2 }
 0x253   : > { %v2298_v48 = vpack.c.b16 %v2988_v49, %v2988_v49 }
 0x255   : > { %v2299_v40 = vpack.c.b8 %v2298_v48, %v2298_v48  ;;  %v862_v48 = vshll.u32 %v861_v42, 16 }
 0x256   : > { %v707_v52 = vpop.xlane.xlu0 %706  ;;  %v845_v47 = vpop.xlane.xlu1 %844 }
 0x257   : > { %vm750_vm1 = vcmp.le.f32.partialorder %v3872_v54, %v707_v52  ;;  %v859_v22 = vpop.xlane.xlu2 %858  ;;  %v846_v10 = vcvt.f32.s32 %v845_v47  ;;  %2360 = vst [vmem:[%s4078_s13 + $0x4] sm:$0x3] %v2299_v40 }
 0x258   : > { %v4083_v62 = vsel %vm750_vm1, %v3689_v37, 128  ;;  %v860_v19 = vcvt.f32.s32 %v859_v22 }
 0x259   : > { %998 = vmin.xlane.f32.xlu2 %v997_v7  ;;  %v4086_v2 = vadd.s32 %v848_v20, %v846_v10  ;;  %v1075_v49 = vshra.s32 %v4083_v62, 16 }
 0x25a   : > { %v4090_v54 = vadd.s32 %v862_v48, %v860_v19  ;;  %v875_v19 = vcvt.f32.s32 %v3904_v61 }
 0x25b   : > { %vm1245_vm2 = vcmp.eq.s32.totalorder %v3689_v37, %v4086_v2  ;;  %v4097_v26 = vcvt.s32.f32 %v1075_v49 }
 0x25c   : > { %v4100_v47 = vsel %vm1245_vm2, 1.0, %v5236_v14  ;;  %2886 = vmatmul.msk.f32.gmra.mxu1 %vm1245_vm2, %v5240_v1  ;;  %vm1246_vm5 = vcmp.eq.s32.totalorder %v3689_v37, %v4090_v54  ;;  %v876_v36 = vshll.u32 %v875_v19, 16 }
 0x25d   : > { %5257 = vst [vmem:[#allocation5_spill] sm:$0xff] %v4100_v47  ;;  %v2201_v40 = vmax.f32 %v4100_v47, -128.0  ;;  %v4117_v42 = vsel %vm1246_vm5, 1.0, %v5236_v14 }
 0x25e   : > { %v725_v52 = vpop.xlane.xlu1 %724  ;;  %5258 = vst [vmem:[#allocation6_spill] sm:$0xff] %v4117_v42  ;;  %v727_v7 = vpop.xlane.xlu0 %726  ;;  %v2202_v20 = vmax.f32 %v4117_v42, -128.0  ;;  %v1130_v42 = vand.u32 65535, %v3924_v45 }
 0x25f   : > { %v4094_v8 = vpop.xlane.xlu2 %798  ;;  %vm759_vm3 = vcmp.le.f32.partialorder %v3888_v0, %v725_v52  ;;  %v2233_v10 = vmin.f32 %v2201_v40, 127.0  ;;  %v889_v52 = vcvt.f32.s32 %v3914_v55  ;;  %vm760_vm6 = vcmp.le.f32.partialorder %v3891_v24, %v727_v7 }
 0x260   : > { %v4104_v57 = vsel %vm759_vm3, %v3689_v37, 128  ;;  %vm800_vm4 = vcmp.eq.f32.partialorder %v3898_v13, %v4094_v8  ;;  %v2234_v43 = vmin.f32 %v2202_v20, 127.0  ;;  %v1004_v20 = vand.u32 65535, %v3921_v46 }
 0x261   : > { %1078 = vmin.xlane.f32.xlu2 %v4097_v26  ;;  %v801_v22 = vsel %vm800_vm4, %v796_v53, inf  ;;  %v1201_v0 = vshra.s32 %v4104_v57, 16  ;;  %v2990_v49 = vcvt.f32.s32 %v2233_v10  ;;  %v890_v47 = vshll.u32 %v889_v52, 16 }
 0x262   : > { %802 = vmin.xlane.f32.xlu1 %v801_v22  ;;  %v1132_v45 = vcvt.s32.f32 %v1130_v42  ;;  %v5259_v24 = vmov 0.0  }
 0x263   : > { %v4120_v13 = vcvt.s32.f32 %v1201_v0  ;;  %v2300_v53 = vpack.c.b16 %v2990_v49, %v2990_v49  ;;  %v2992_v0 = vcvt.f32.s32 %v2234_v43  ;;  %v1006_v43 = vcvt.s32.f32 %v1004_v20 }
 0x264   : > { %2887 = vmatmul.msk.f32.gmra.mxu1 %vm1246_vm5, %v5240_v1 }
 0x265   : > { %1204 = vmin.xlane.f32.xlu0 %v4120_v13  ;;  %v2301_v61 = vpack.c.b8 %v2300_v53, %v2300_v53  ;;  %v2302_v14 = vpack.c.b16 %v2992_v0, %v2992_v0  ;;  %v903_v0 = vcvt.f32.s32 %v3936_v39 }
 0x266   : > { %v873_v48 = vpop.xlane.xlu1 %872  ;;  %v4138_v1 = vpop.xlane.xlu0 %1022 }
 0x267   : > { %v887_v40 = vpop.xlane.xlu2 %886  ;;  %v874_v22 = vcvt.f32.s32 %v873_v48  ;;  %2361 = vst [vmem:[%s4078_s13 + $0x6] sm:$0x3] %v2301_v61  ;;  %v2303_v49 = vpack.c.b8 %v2302_v14, %v2302_v14  ;;  %vm1024_vm11 = vcmp.eq.f32.partialorder %v3916_v16, %v4138_v1 }
 0x268   : > { %v888_v10 = vcvt.f32.s32 %v887_v40 }
 0x269   : > { %v4132_v55 = vadd.s32 %v876_v36, %v874_v22  ;;  %2362 = vst [vmem:[%s4078_s13 + $0x8] sm:$0x3] %v2303_v49  ;;  %v4149_v36 = vsel %vm760_vm6, %v3689_v37, 128 }
 0x26a   : > { %v4135_v48 = vadd.s32 %v890_v47, %v888_v10  ;;  %v5261_v47 = vmov 1.0   ;;  %v1215_v22 = vshra.s32 %v4149_v36, 16 }
 0x26b   : > { %vm1247_vm7 = vcmp.eq.s32.totalorder %v3689_v37, %v4132_v55 }
 0x26c   : > { %v4152_v14 = vsel %vm1247_vm7, 1.0, %v5259_v24  ;;  %2888 = vmatmul.msk.f32.gmra.mxu1 %vm1247_vm7, %v5261_v47  ;;  %vm1248_vm10 = vcmp.eq.s32.totalorder %v3689_v37, %v4135_v48 }
 0x26d   : > { %5260 = vst [vmem:[#allocation7_spill] sm:$0xff] %v4152_v14  ;;  %v2203_v52 = vmax.f32 %v4152_v14, -128.0  ;;  %v4165_v42 = vsel %vm1248_vm10, 1.0, %v5259_v24  ;;  %v917_v14 = vcvt.f32.s32 %v3950_v30  ;;  %v808_v30 = vand.u32 65535, %v3955_v50 }
 0x26e   : > { %v4140_v19 = vpop.xlane.xlu1 %1008  ;;  %5262 = vst [vmem:[#allocation8_spill] sm:$0xff] %v4165_v42 }
 0x26f   : > { %v4144_v46 = vpop.xlane.xlu2 %1134  ;;  %vm1010_vm8 = vcmp.eq.f32.partialorder %v3929_v34, %v4140_v19  ;;  %v1018_v34 = vand.u32 65535, %v3896_v17  ;;  %v2235_v40 = vmin.f32 %v2203_v52, 127.0  ;;  %v4172_v52 = vcvt.s32.f32 %v1215_v22 }
 0x270   : > { %vm1136_vm9 = vcmp.eq.f32.partialorder %v3931_v18, %v4144_v46  ;;  %v1011_v7 = vsel %vm1010_vm8, %v1006_v43, inf  ;;  %v2204_v18 = vmax.f32 %v4165_v42, -128.0  ;;  %v904_v42 = vshll.u32 %v903_v0, 16 }
 0x271   : > { %v1137_v53 = vsel %vm1136_vm9, %v1132_v45, inf  ;;  %1012 = vmin.xlane.f32.xlu1 %v1011_v7  ;;  %v2994_v61 = vcvt.f32.s32 %v2235_v40  ;;  %v1020_v43 = vcvt.s32.f32 %v1018_v34  ;;  %v931_v22 = vcvt.f32.s32 %v3968_v33 }
 0x272   : > { %1138 = vmin.xlane.f32.xlu2 %v1137_v53  ;;  %v2236_v10 = vmin.f32 %v2204_v18, 127.0 }
 0x273   : > { %v2304_v17 = vpack.c.b16 %v2994_v61, %v2994_v61  ;;  %v1025_v40 = vsel %vm1024_vm11, %v1020_v43, inf }
 0x274   : > { %v2996_v45 = vcvt.f32.s32 %v2236_v10  ;;  %2889 = vmatmul.msk.f32.gmra.mxu1 %vm1248_vm10, %v5261_v47  ;;  %v918_v10 = vshll.u32 %v917_v14, 16 }
 0x275   : > { %v2305_v39 = vpack.c.b8 %v2304_v17, %v2304_v17 }
 0x276   : > { %v915_v20 = vpop.xlane.xlu0 %914  ;;  %v901_v49 = vpop.xlane.xlu1 %900  ;;  %v2306_v16 = vpack.c.b16 %v2996_v45, %v2996_v45  ;;  %v932_v45 = vshll.u32 %v931_v22, 16 }
 0x277   : > { %v729_v7 = vpop.xlane.xlu2 %728  ;;  %v902_v53 = vcvt.f32.s32 %v901_v49  ;;  %v916_v18 = vcvt.f32.s32 %v915_v20  ;;  %2363 = vst [vmem:[%s4078_s13 + $0xa] sm:$0x3] %v2305_v39  ;;  %v810_v20 = vcvt.s32.f32 %v808_v30  ;;  %v1144_v39 = vand.u32 65535, %v3975_v41 }
 0x278   : > { %vm761_vm12 = vcmp.le.f32.partialorder %v3948_v4, %v729_v7  ;;  %v2307_v0 = vpack.c.b8 %v2306_v16, %v2306_v16 }
 0x279   : > { %v4181_v34 = vsel %vm761_vm12, %v3689_v37, 128  ;;  %1218 = vmin.xlane.f32.xlu1 %v4172_v52  ;;  %v4187_v61 = vadd.s32 %v904_v42, %v902_v53  ;;  %v4191_v49 = vadd.s32 %v918_v10, %v916_v18  ;;  %v1146_v41 = vcvt.s32.f32 %v1144_v39 }
 0x27a   : > { %1026 = vmin.xlane.f32.xlu2 %v1025_v40  ;;  %v1229_v4 = vshra.s32 %v4181_v34, 16  ;;  %2364 = vst [vmem:[%s4078_s13 + $0xc] sm:$0x3] %v2307_v0 }
 0x27b   : > { %5263 = vst [vmem:[#allocation9_spill] sm:$0xff] %v4191_v49  ;;  %vm1249_vm13 = vcmp.eq.s32.totalorder %v3689_v37, %v4187_v61  ;;  %vm1250_vm15 = vcmp.eq.s32.totalorder %v3689_v37, %v4191_v49 }
 0x27c   : > { %v4198_v33 = vsel %vm1249_vm13, 1.0, %v5259_v24  ;;  %2890 = vmatmul.msk.f32.gmra.mxu1 %vm1249_vm13, %v5261_v47  ;;  %v4201_v14 = vcvt.s32.f32 %v1229_v4  ;;  %v4215_v30 = vsel %vm1250_vm15, 1.0, %v5259_v24 }
 0x27d   : > { %5264 = vst [vmem:[#allocation10_spill] sm:$0xff] %v4198_v33  ;;  %v2205_v42 = vmax.f32 %v4198_v33, -128.0 }
 0x27e   : > { %v929_v17 = vpop.xlane.xlu0 %928  ;;  %v4193_v43 = vpop.xlane.xlu1 %812  ;;  %5265 = vst [vmem:[#allocation11_spill] sm:$0xff] %v4215_v30 }
 0x27f   : > { %v930_v50 = vcvt.f32.s32 %v929_v17  ;;  %vm814_vm14 = vcmp.eq.f32.partialorder %v3970_v21, %v4193_v43  ;;  %v2237_v16 = vmin.f32 %v2205_v42, 127.0  ;;  %v4212_v40 = vpop.xlane.xlu2 %1162  ;;  %v2206_v21 = vmax.f32 %v4215_v30, -128.0 }
 0x280   : > { %v815_v53 = vsel %vm814_vm14, %v810_v20, inf  ;;  %v1032_v42 = vand.u32 65535, %v3996_v35  ;;  %vm1164_vm3 = vcmp.eq.f32.partialorder %v3980_v6, %v4212_v40 }
 0x281   : > { %v4206_v7 = vadd.s32 %v932_v45, %v930_v50  ;;  %1232 = vmin.xlane.f32.xlu1 %v4201_v14  ;;  %816 = vmin.xlane.f32.xlu0 %v815_v53  ;;  %v2998_v18 = vcvt.f32.s32 %v2237_v16  ;;  %v2238_v4 = vmin.f32 %v2206_v21, 127.0  ;;  %v945_v50 = vcvt.f32.s32 %v4002_v44 }
 0x282   : > { %v1158_v16 = vand.u32 65535, %v3958_v25  ;;  %v1034_v35 = vcvt.s32.f32 %v1032_v42  ;;  %v1046_v25 = vand.u32 65535, %v4007_v31  ;;  %v1060_v31 = vand.u32 65535, %v4022_v63 }
 0x283   : > { %vm1251_vm1 = vcmp.eq.s32.totalorder %v3689_v37, %v4206_v7  ;;  %v2308_v10 = vpack.c.b16 %v2998_v18, %v2998_v18  ;;  %v3000_v53 = vcvt.f32.s32 %v2238_v4  ;;  %v946_v30 = vshll.u32 %v945_v50, 16 }
 0x284   : > { %v4226_v0 = vsel %vm1251_vm1, 1.0, %v5259_v24  ;;  %2891 = vmatmul.msk.f32.gmra.mxu1 %vm1250_vm15, %v5261_v47 }
 0x285   : > { %5266 = vst [vmem:[#allocation12_spill] sm:$0xff] %v4226_v0  ;;  %v2207_v45 = vmax.f32 %v4226_v0, -128.0  ;;  %v2309_v20 = vpack.c.b8 %v2308_v10, %v2308_v10  ;;  %v2310_v18 = vpack.c.b16 %v3000_v53, %v3000_v53  ;;  %v1160_v10 = vcvt.s32.f32 %v1158_v16 }
 0x286   : > { %v4220_v22 = vpop.xlane.xlu1 %1148  ;;  %v4246_v4 = vpop.xlane.xlu0 %1176 }
 0x287   : > { %vm1150_vm2 = vcmp.eq.f32.partialorder %v3990_v51, %v4220_v22  ;;  %v2239_v39 = vmin.f32 %v2207_v45, 127.0  ;;  %2365 = vst [vmem:[%s4078_s13 + $0xe] sm:$0x3] %v2309_v20  ;;  %v1165_v6 = vsel %vm1164_vm3, %v1160_v10, inf  ;;  %vm1178_vm7 = vcmp.eq.f32.partialorder %v3992_v9, %v4246_v4 }
 0x288   : > { %v1151_v17 = vsel %vm1150_vm2, %v1146_v41, inf  ;;  %v2311_v41 = vpack.c.b8 %v2310_v18, %v2310_v18 }
 0x289   : > { %1152 = vmin.xlane.f32.xlu0 %v1151_v17  ;;  %v3002_v49 = vcvt.f32.s32 %v2239_v39 }
 0x28a   : > { %2366 = vst [vmem:[%s4078_s13 + $0x10] sm:$0x3] %v2311_v41 }
 0x28b   : > { %v2312_v33 = vpack.c.b16 %v3002_v49, %v3002_v49 }
 0x28c   : > { %2892 = vmatmul.msk.f32.gmra.mxu1 %vm1251_vm1, %v5261_v47 }
 0x28d   : > { %v943_v51 = vpop.xlane.xlu2 %942  ;;  %v2313_v49 = vpack.c.b8 %v2312_v33, %v2312_v33  ;;  %v1048_v33 = vcvt.s32.f32 %v1046_v25 }
 0x28e   : > { %v944_v21 = vcvt.f32.s32 %v943_v51  ;;  %v4236_v0 = vpop.xlane.xlu1 %1036  ;;  %v1062_v51 = vcvt.s32.f32 %v1060_v31 }
 0x28f   : > { %vm1038_vm4 = vcmp.eq.f32.partialorder %v4009_v32, %v4236_v0  ;;  %2367 = vst [vmem:[%s4078_s13 + $0x12] sm:$0x3] %v2313_v49  ;;  %v1099_v32 = vcvt.f32.s32 %v3986_v3 }
 0x290   : > { %v4240_v44 = vadd.s32 %v946_v30, %v944_v21  ;;  %v1039_v17 = vsel %vm1038_vm4, %v1034_v35, inf  ;;  %v1172_v30 = vand.u32 65535, %v3978_v59 }
 0x291   : > { %1040 = vmin.xlane.f32.xlu2 %v1039_v17  ;;  %1166 = vmin.xlane.f32.xlu0 %v1165_v6  ;;  %v1100_v53 = vshll.u32 %v1099_v32, 16  ;;  %v959_v6 = vcvt.f32.s32 %v4014_v12 }
 0x292   : > { %vm1252_vm5 = vcmp.eq.s32.totalorder %v3689_v37, %v4240_v44  ;;  %v1174_v42 = vcvt.s32.f32 %v1172_v30 }
 0x293   : > { %v4261_v50 = vsel %vm1252_vm5, 1.0, %v5259_v24 }
 0x294   : > { %v2208_v20 = vmax.f32 %v4261_v50, -128.0  ;;  %2893 = vmatmul.msk.f32.gmra.mxu1 %vm1252_vm5, %v5261_v47  ;;  %v1179_v18 = vsel %vm1178_vm7, %v1174_v42, inf  ;;  %v1186_v42 = vand.u32 65535, %v4037_v15 }
 0x295   : > { %v4258_v45 = vpop.xlane.xlu2 %1050 }
 0x296   : > { %vm1052_vm6 = vcmp.eq.f32.partialorder %v4017_v29, %v4258_v45  ;;  %v1097_v59 = vpop.xlane.xlu1 %1096  ;;  %v2240_v39 = vmin.f32 %v2208_v20, 127.0  ;;  %v987_v29 = vcvt.f32.s32 %v3945_v23  ;;  %v960_v20 = vshll.u32 %v959_v6, 16 }
 0x297   : > { %v1053_v3 = vsel %vm1052_vm6, %v1048_v33, inf  ;;  %v1098_v63 = vcvt.f32.s32 %v1097_v59 }
 0x298   : > { %1054 = vmin.xlane.f32.xlu1 %v1053_v3  ;;  %v3004_v21 = vcvt.f32.s32 %v2240_v39  ;;  %v988_v17 = vshll.u32 %v987_v29, 16  ;;  %v973_v3 = vcvt.f32.s32 %v4041_v5  ;;  %v1188_v5 = vcvt.s32.f32 %v1186_v42 }
 0x299   : > { %v4269_v16 = vpop.xlane.xlu0 %1064  ;;  %v4271_v41 = vadd.s32 %v1100_v53, %v1098_v63  ;;  %1180 = vmin.xlane.f32.xlu2 %v1179_v18 }
 0x29a   : > { %vm1066_vm8 = vcmp.eq.f32.partialorder %v4026_v38, %v4269_v16  ;;  %v2314_v35 = vpack.c.b16 %v3004_v21, %v3004_v21  ;;  %v974_v21 = vshll.u32 %v973_v3, 16 }
 0x29b   : > { %v1067_v9 = vsel %vm1066_vm8, %v1062_v51, inf  ;;  %vm1263_vm9 = vcmp.eq.s32.totalorder %v3689_v37, %v4271_v41 }
 0x29c   : > { %1068 = vmin.xlane.f32.xlu0 %v1067_v9  ;;  %v2315_v10 = vpack.c.b8 %v2314_v35, %v2314_v35  ;;  %v4279_v25 = vsel %vm1263_vm9, 1.0, %v5259_v24  ;;  %2904 = vmatmul.msk.f32.vlgmr.msrb.gmra.mxu3 %vm1263_vm9, %v5261_v47 }
 0x29d   : > { %v2219_v38 = vmax.f32 %v4279_v25, -128.0 }
 0x29e   : > { %v985_v49 = vpop.xlane.xlu1 %984  ;;  %2368 = vst [vmem:[%s4078_s13 + $0x14] sm:$0x3] %v2315_v10 }
 0x29f   : > { %v986_v30 = vcvt.f32.s32 %v985_v49  ;;  %v2251_v32 = vmin.f32 %v2219_v38, 127.0 }
 0x2a1   : > { %v957_v23 = vpop.xlane.xlu0 %956  ;;  %v4285_v31 = vadd.s32 %v988_v17, %v986_v30  ;;  %v3026_v59 = vcvt.f32.s32 %v2251_v32  ;;  %v1127_v17 = vcvt.f32.s32 %v4049_v56 }
 0x2a2   : > { %v958_v33 = vcvt.f32.s32 %v957_v23 }
 0x2a3   : > { %v2336_v53 = vpack.c.b16 %v3026_v59, %v3026_v59  ;;  %vm1255_vm10 = vcmp.eq.s32.totalorder %v3689_v37, %v4285_v31 }
 0x2a4   : > { %v4289_v39 = vadd.s32 %v960_v20, %v958_v33  ;;  %v4299_v18 = vsel %vm1255_vm10, 1.0, %v5259_v24 }
 0x2a5   : > { %v2337_v12 = vpack.c.b8 %v2336_v53, %v2336_v53  ;;  %v2211_v29 = vmax.f32 %v4299_v18, -128.0 }
 0x2a6   : > { %v4293_v63 = vpop.xlane.xlu1 %1190  ;;  %vm1253_vm11 = vcmp.eq.s32.totalorder %v3689_v37, %v4289_v39 }
 0x2a7   : > { %2379 = vst [vmem:[%s4078_s13 + $0x2a] sm:$0x3] %v2337_v12  ;;  %v4305_v9 = vsel %vm1253_vm11, 1.0, %v5259_v24  ;;  %2894 = vmatmul.msk.f32.gmra.mxu1 %vm1253_vm11, %v5261_v47  ;;  %vm1192_vm12 = vcmp.eq.f32.partialorder %v4043_v58, %v4293_v63  ;;  %v2243_v6 = vmin.f32 %v2211_v29, 127.0  ;;  %v1128_v58 = vshll.u32 %v1127_v17, 16 }
 0x2a8   : > { %v2209_v35 = vmax.f32 %v4305_v9, -128.0  ;;  %v1193_v49 = vsel %vm1192_vm12, %v1188_v5, inf }
 0x2a9   : > { %v971_v51 = vpop.xlane.xlu0 %970  ;;  %1194 = vmin.xlane.f32.xlu1 %v1193_v49  ;;  %v3010_v23 = vcvt.f32.s32 %v2243_v6 }
 0x2aa   : > { %v972_v15 = vcvt.f32.s32 %v971_v51  ;;  %v2241_v38 = vmin.f32 %v2209_v35, 127.0 }
 0x2ab   : > { %v2320_v56 = vpack.c.b16 %v3010_v23, %v3010_v23 }
 0x2ac   : > { %v4312_v10 = vadd.s32 %v974_v21, %v972_v15  ;;  %v3006_v30 = vcvt.f32.s32 %v2241_v38  ;;  %v1113_v38 = vcvt.f32.s32 %v4065_v60 }
 0x2ad   : > { %v2321_v51 = vpack.c.b8 %v2320_v56, %v2320_v56 }
 0x2ae   : > { %vm1254_vm13 = vcmp.eq.s32.totalorder %v3689_v37, %v4312_v10  ;;  %v2316_v20 = vpack.c.b16 %v3006_v30, %v3006_v30 }
 0x2af   : > { %v4318_v32 = vsel %vm1254_vm13, 1.0, %v5259_v24  ;;  %2895 = vmatmul.msk.f32.gmra.mxu1 %vm1254_vm13, %v5261_v47  ;;  %2371 = vst [vmem:[%s4078_s13 + $0x1a] sm:$0x3] %v2321_v51 }
 0x2b0   : > { %v2210_v59 = vmax.f32 %v4318_v32, -128.0  ;;  %v2317_v42 = vpack.c.b8 %v2316_v20, %v2316_v20 }
 0x2b1   : > { %v1125_v33 = vpop.xlane.xlu0 %1124 }
 0x2b2   : > { %v1126_v3 = vcvt.f32.s32 %v1125_v33  ;;  %v2242_v53 = vmin.f32 %v2210_v59, 127.0  ;;  %2369 = vst [vmem:[%s4078_s13 + $0x16] sm:$0x3] %v2317_v42  ;;  %v1001_v59 = vcvt.f32.s32 %v4059_v11 }
 0x2b4   : > { %v4322_v12 = vadd.s32 %v1128_v58, %v1126_v3  ;;  %v3008_v21 = vcvt.f32.s32 %v2242_v53  ;;  %v1114_v58 = vshll.u32 %v1113_v38, 16  ;;  %v1002_v56 = vshll.u32 %v1001_v59, 16 }
 0x2b6   : > { %5267 = vst [vmem:[#allocation13_spill] sm:$0xff] %v4322_v12  ;;  %v2318_v15 = vpack.c.b16 %v3008_v21, %v3008_v21  ;;  %vm1265_vm14 = vcmp.eq.s32.totalorder %v3689_v37, %v4322_v12 }
 0x2b7   : > { %v4332_v5 = vsel %vm1265_vm14, 1.0, %v5259_v24  ;;  %2896 = vmatmul.msk.f32.gmra.mxu1 %vm1255_vm10, %v5261_v47 }
 0x2b8   : > { %v2319_v29 = vpack.c.b8 %v2318_v15, %v2318_v15  ;;  %v2221_v35 = vmax.f32 %v4332_v5, -128.0  ;;  %v1074_v15 = vand.u32 65535, %v4083_v62 }
 0x2ba   : > { %2370 = vst [vmem:[%s4078_s13 + $0x18] sm:$0x3] %v2319_v29  ;;  %v2253_v49 = vmin.f32 %v2221_v35, 127.0  ;;  %v805_v35 = vcvt.f32.s32 %v4094_v8  ;;  %v1076_v62 = vcvt.s32.f32 %v1074_v15 }
 0x2bc   : > { %v3030_v17 = vcvt.f32.s32 %v2253_v49 }
 0x2be   : > { %v2340_v6 = vpack.c.b16 %v3030_v17, %v3030_v17 }
 0x2c0   : > { %v2341_v30 = vpack.c.b8 %v2340_v6, %v2340_v6 }
 0x2c2   : > { %2381 = vst [vmem:[%s4078_s13 + $0x2e] sm:$0x3] %v2341_v30 }
 0x2c4   : > { %v1111_v23 = vpop.xlane.xlu2 %1110 }
 0x2c5   : > { %v1112_v33 = vcvt.f32.s32 %v1111_v23 }
 0x2c7   : > { %v4342_v20 = vadd.s32 %v1114_v58, %v1112_v33  ;;  %v806_v58 = vshll.u32 %v805_v35, 16 }
 0x2c9   : > { %5268 = vst [vmem:[#allocation14_spill] sm:$0xff] %v4342_v20  ;;  %v4352_v3 = vpop.f32.mrf.mxu1  ;;  %vm1264_vm15 = vcmp.eq.s32.totalorder %v3689_v37, %v4342_v20 }
 0x2ca   : > { %2392 = vst.msk [vmem:[%s4350_s16 + $0x10] sm:$0xff] %vm371_vm0, %v4352_v3  ;;  %v4360_v60 = vsel %vm1264_vm15, 1.0, %v5259_v24  ;;  %2905 = vmatmul.msk.f32.gmra.mxu3 %vm1264_vm15, %v5261_v47 }
 0x2cb   : > { %v2220_v42 = vmax.f32 %v4360_v60, -128.0 }
 0x2cc   : > { %v999_v11 = vpop.xlane.xlu2 %998 }
 0x2cd   : > { %v1000_v53 = vcvt.f32.s32 %v999_v11  ;;  %v2252_v51 = vmin.f32 %v2220_v42, 127.0  ;;  %v1200_v11 = vand.u32 65535, %v4104_v57 }
 0x2cf   : > { %v4364_v21 = vadd.s32 %v1002_v56, %v1000_v53  ;;  %v3028_v29 = vcvt.f32.s32 %v2252_v51  ;;  %v3193_v51 = vmov 0  }
 0x2d0   : > { %3091 = vset.pattern.permute.xlu0 %v3193_v51  ;;  %3092 = vset.pattern.permute.xlu1 %v3193_v51 }
 0x2d1   : > { %v2338_v49 = vpack.c.b16 %v3028_v29, %v3028_v29  ;;  %vm1256_vm1 = vcmp.eq.s32.totalorder %v3689_v37, %v4364_v21  ;;  %3093 = vset.pattern.permute.xlu2 %v3193_v51  ;;  %v1015_v51 = vcvt.f32.s32 %v4140_v19  ;;  %v1214_v19 = vand.u32 65535, %v4149_v36 }
 0x2d2   : > { %v4371_v17 = vsel %vm1256_vm1, 1.0, %v5259_v24  ;;  %2897 = vmatmul.msk.f32.gmra.mxu1 %vm1256_vm1, %v5261_v47  ;;  %2906 = vmatmul.msk.f32.gmra.mxu3 %vm1265_vm14, %v5261_v47 }
 0x2d3   : > { %v2339_v38 = vpack.c.b8 %v2338_v49, %v2338_v49  ;;  %v2212_v8 = vmax.f32 %v4371_v17, -128.0  ;;  %v1202_v49 = vcvt.s32.f32 %v1200_v11 }
 0x2d4   : > { %v4378_v6 = vpop.xlane.xlu2 %1078 }
 0x2d5   : > { %vm1080_vm2 = vcmp.eq.f32.partialorder %v4097_v26, %v4378_v6  ;;  %v803_v30 = vpop.xlane.xlu1 %802  ;;  %2380 = vst [vmem:[%s4078_s13 + $0x2c] sm:$0x3] %v2339_v38  ;;  %v2244_v33 = vmin.f32 %v2212_v8, 127.0 }
 0x2d6   : > { %v1081_v23 = vsel %vm1080_vm2, %v1076_v62, inf  ;;  %v804_v59 = vcvt.f32.s32 %v803_v30 }
 0x2d7   : > { %1082 = vmin.xlane.f32.xlu2 %v1081_v23  ;;  %v3012_v56 = vcvt.f32.s32 %v2244_v33 }
 0x2d8   : > { %v807_v42 = vadd.s32 %v806_v58, %v804_v59  ;;  %v4385_v53 = vpop.xlane.xlu0 %1204 }
 0x2d9   : > { %v2322_v15 = vpack.c.b16 %v3012_v56, %v3012_v56  ;;  %vm1206_vm3 = vcmp.eq.f32.partialorder %v4120_v13, %v4385_v53  ;;  %v4389_v57 = vpop.f32.mrf.mxu1  ;;  %v1141_v56 = vcvt.f32.s32 %v4144_v46  ;;  %v1016_v46 = vshll.u32 %v1015_v51, 16 }
 0x2da   : > { %v1451_v29 = vperm.slane %v807_v42, 0  ;;  %v1452_v26 = vperm.slane %v807_v42, 1  ;;  %v1453_v35 = vperm.slane %v807_v42, 2  ;;  %v1454_v38 = vperm.slane %v807_v42, 3  ;;  %2393 = vst.msk [vmem:[%s4350_s16 + $0x18] sm:$0xff] %vm371_vm0, %v4389_v57 }
 0x2db   : > { %v2323_v62 = vpack.c.b8 %v2322_v15, %v2322_v15  ;;  %vm1242_vm4 = vcmp.eq.s32.totalorder %v3689_v37, %v807_v42  ;;  %v1455_v8 = vperm.slane %v807_v42, 4  ;;  %v1207_v23 = vsel %vm1206_vm3, %v1202_v49, inf }
 0x2dc   : > { %1707 = vst [vmem:[#allocation1] ss:$9 sm:$0xff] %v1451_v29  ;;  %v4393_v30 = vsel %vm1242_vm4, 1.0, %v5259_v24  ;;  %2883 = vmatmul.msk.f32.vlgmr.msrb.gmra.mxu0 %vm1242_vm4, %v5261_v47  ;;  %v1456_v13 = vperm.slane %v807_v42, 5  ;;  %1208 = vmin.xlane.f32.xlu0 %v1207_v23  ;;  %v1457_v33 = vperm.slane %v807_v42, 6  ;;  %v1458_v59 = vperm.slane %v807_v42, 7 }
 0x2dd   : > { %1709 = vst [vmem:[#allocation1 + $0x1] ss:$9 sm:$0xff] %v1452_v26  ;;  %v2198_v58 = vmax.f32 %v4393_v30, -128.0 }
 0x2de   : > { %2372 = vst [vmem:[%s4078_s13 + $0x1c] sm:$0x3] %v2323_v62 }
 0x2df   : > { %1711 = vst [vmem:[#allocation1 + $0x2] ss:$9 sm:$0xff] %v1453_v35  ;;  %v2230_v11 = vmin.f32 %v2198_v58, 127.0  ;;  %v1029_v58 = vcvt.f32.s32 %v4138_v1 }
 0x2e0   : > { %1713 = vst [vmem:[#allocation1 + $0x3] ss:$9 sm:$0xff] %v1454_v38  ;;  %v1142_v38 = vshll.u32 %v1141_v56, 16  ;;  %v1216_v56 = vcvt.s32.f32 %v1214_v19 }
 0x2e1   : > { %1715 = vst [vmem:[#allocation1 + $0x4] ss:$9 sm:$0xff] %v1455_v8  ;;  %v2984_v15 = vcvt.f32.s32 %v2230_v11  ;;  %v4400_v49 = vpop.f32.mrf.mxu1  ;;  %v1030_v36 = vshll.u32 %v1029_v58, 16 }
 0x2e2   : > { %1717 = vst [vmem:[#allocation1 + $0x5] ss:$9 sm:$0xff] %v1456_v13 }
 0x2e3   : > { %1719 = vst [vmem:[#allocation1 + $0x6] ss:$9 sm:$0xff] %v1457_v33  ;;  %v2294_v26 = vpack.c.b16 %v2984_v15, %v2984_v15 }
 0x2e4   : > { %v1013_v29 = vpop.xlane.xlu1 %1012  ;;  %1721 = vst [vmem:[#allocation1 + $0x7] ss:$9 sm:$0xff] %v1458_v59 }
 0x2e5   : > { %v1139_v35 = vpop.xlane.xlu2 %1138  ;;  %v1014_v62 = vcvt.f32.s32 %v1013_v29  ;;  %v2295_v8 = vpack.c.b8 %v2294_v26, %v2294_v26  ;;  %2394 = vst.msk [vmem:[%s4350_s16 + $0x20] sm:$0xff] %vm371_vm0, %v4400_v49 }
 0x2e6   : > { %v1140_v42 = vcvt.f32.s32 %v1139_v35 }
 0x2e7   : > { %2358 = vst [vmem:[%s4078_s13] sm:$0x3] %v2295_v8  ;;  %v4412_v13 = vadd.s32 %v1016_v46, %v1014_v62  ;;  %v819_v46 = vcvt.f32.s32 %v4193_v43 }
 0x2e8   : > { %v4410_v23 = vadd.s32 %v1142_v38, %v1140_v42 }
 0x2e9   : > { %v4417_v59 = vpop.f32.mrf.mxu1  ;;  %vm1257_vm5 = vcmp.eq.s32.totalorder %v3689_v37, %v4412_v13 }
 0x2ea   : > { %5269 = vst [vmem:[#allocation15_spill] sm:$0xff] %v4410_v23  ;;  %vm1266_vm6 = vcmp.eq.s32.totalorder %v3689_v37, %v4410_v23  ;;  %v4427_v51 = vsel %vm1257_vm5, 1.0, %v5259_v24  ;;  %2898 = vmatmul.msk.f32.gmra.mxu1 %vm1257_vm5, %v5261_v47 }
 0x2eb   : > { %2395 = vst.msk [vmem:[%s4350_s16 + $0x28] sm:$0xff] %vm371_vm0, %v4417_v59  ;;  %v4431_v1 = vsel %vm1266_vm6, 1.0, %v5259_v24  ;;  %2907 = vmatmul.msk.f32.gmra.mxu3 %vm1266_vm6, %v5261_v47  ;;  %v2213_v29 = vmax.f32 %v4427_v51, -128.0  ;;  %v1722_v8 = vld [vmem:[#allocation1] sm:$0xff] }
 0x2ec   : > { %v4415_v33 = vpop.xlane.xlu1 %1218  ;;  %v2222_v26 = vmax.f32 %v4431_v1, -128.0 }
 0x2ed   : > { %v1027_v11 = vpop.xlane.xlu2 %1026  ;;  %vm1220_vm7 = vcmp.eq.f32.partialorder %v4172_v52, %v4415_v33  ;;  %v2245_v42 = vmin.f32 %v2213_v29, 127.0  ;;  %v820_v29 = vshll.u32 %v819_v46, 16 }
 0x2ee   : > { %v1028_v15 = vcvt.f32.s32 %v1027_v11  ;;  %v1221_v62 = vsel %vm1220_vm7, %v1216_v56, inf  ;;  %v2254_v38 = vmin.f32 %v2222_v26, 127.0  ;;  %vm2101_vm7 = vcmask 130112  }
 0x2ef   : > { %1222 = vmin.xlane.f32.xlu1 %v1221_v62  ;;  %v3014_v19 = vcvt.f32.s32 %v2245_v42 }
 0x2f0   : > { %v4438_v35 = vadd.s32 %v1030_v36, %v1028_v15  ;;  %v3032_v58 = vcvt.f32.s32 %v2254_v38  ;;  %2003 = vperm.xlu0 %3091, %v1722_v8  }
 0x2f1   : > { %v2324_v11 = vpack.c.b16 %v3014_v19, %v3014_v19  ;;  %v4443_v36 = vpop.f32.mrf.mxu1 }
 0x2f2   : > { %vm1258_vm8 = vcmp.eq.s32.totalorder %v3689_v37, %v4438_v35  ;;  %v2342_v52 = vpack.c.b16 %v3032_v58, %v3032_v58  ;;  %2396 = vst.msk [vmem:[%s4350_s16 + $0x30] sm:$0xff] %vm371_vm0, %v4443_v36 }
 0x2f3   : > { %v4446_v56 = vsel %vm1258_vm8, 1.0, %v5259_v24  ;;  %2899 = vmatmul.msk.f32.gmra.mxu1 %vm1258_vm8, %v5261_v47  ;;  %v2325_v62 = vpack.c.b8 %v2324_v11, %v2324_v11  ;;  %vm2105_vm8 = vcmask 195712  }
 0x2f4   : > { %v817_v15 = vpop.xlane.xlu0 %816  ;;  %v2214_v43 = vmax.f32 %v4446_v56, -128.0  ;;  %v2343_v42 = vpack.c.b8 %v2342_v52, %v2342_v52 }
 0x2f5   : > { %v818_v26 = vcvt.f32.s32 %v817_v15  ;;  %2373 = vst [vmem:[%s4078_s13 + $0x1e] sm:$0x3] %v2325_v62  ;;  %v1468_v62 = vperm.slane %v4054_v28, 1 }
 0x2f6   : > { %v2246_v38 = vmin.f32 %v2214_v43, 127.0  ;;  %2382 = vst [vmem:[%s4078_s13 + $0x30] sm:$0x3] %v2343_v42 }
 0x2f7   : > { %v4453_v8 = vadd.s32 %v820_v29, %v818_v26  ;;  %v1467_v26 = vperm.slane %v4054_v28, 0 }
 0x2f8   : > { %v3016_v19 = vcvt.f32.s32 %v2246_v38  ;;  %v1472_v38 = vperm.slane %v4054_v28, 5 }
 0x2f9   : > { %v1459_v58 = vperm.slane %v4453_v8, 0  ;;  %v1460_v46 = vperm.slane %v4453_v8, 1  ;;  %v1461_v23 = vperm.slane %v4453_v8, 2  ;;  %v1462_v12 = vperm.slane %v4453_v8, 3 }
 0x2fa   : > { %v2326_v20 = vpack.c.b16 %v3016_v19, %v3016_v19  ;;  %v1463_v11 = vperm.slane %v4453_v8, 4  ;;  %v1464_v15 = vperm.slane %v4453_v8, 5  ;;  %v1465_v29 = vperm.slane %v4453_v8, 6 }
 0x2fb   : > { %1723 = vst [vmem:[#allocation1] ss:$9 sm:$0xff] %v1459_v58  ;;  %v1466_v43 = vperm.slane %v4453_v8, 7  ;;  %v1473_v19 = vperm.slane %v4054_v28, 6  ;;  %v1474_v58 = vperm.slane %v4054_v28, 7  ;;  %vm1243_vm10 = vcmp.eq.s32.totalorder %v3689_v37, %v4453_v8 }
 0x2fc   : > { %1724 = vst [vmem:[#allocation1 + $0x1] ss:$9 sm:$0xff] %v1460_v46  ;;  %v2327_v52 = vpack.c.b8 %v2326_v20, %v2326_v20  ;;  %v1469_v20 = vperm.slane %v4054_v28, 2  ;;  %v1475_v46 = vperm.slane %v4086_v2, 0  ;;  %2884 = vmatmul.msk.f32.gmra.mxu0 %vm1243_vm10, %v5261_v47  ;;  %v1501_v8 = vperm.slane %v4135_v48, 2 }
 0x2fd   : > { %1725 = vst [vmem:[#allocation1 + $0x2] ss:$9 sm:$0xff] %v1461_v23  ;;  %v1470_v23 = vperm.slane %v4054_v28, 3 }
 0x2fe   : > { %1726 = vst [vmem:[#allocation1 + $0x3] ss:$9 sm:$0xff] %v1462_v12  ;;  %v1471_v12 = vperm.slane %v4054_v28, 4  ;;  %v1480_v28 = vperm.slane %v4086_v2, 5 }
 0x2ff   : > { %2374 = vst [vmem:[%s4078_s13 + $0x20] sm:$0x3] %v2327_v52 }
 0x300   : > { %1727 = vst [vmem:[#allocation1 + $0x4] ss:$9 sm:$0xff] %v1463_v11  ;;  %v1476_v11 = vperm.slane %v4086_v2, 1 }
 0x301   : > { %1728 = vst [vmem:[#allocation1 + $0x5] ss:$9 sm:$0xff] %v1464_v15  ;;  %v1477_v15 = vperm.slane %v4086_v2, 2 }
 0x302   : > { %1729 = vst [vmem:[#allocation1 + $0x6] ss:$9 sm:$0xff] %v1465_v29  ;;  %v1478_v29 = vperm.slane %v4086_v2, 3 }
 0x303   : > { %1730 = vst [vmem:[#allocation1 + $0x7] ss:$9 sm:$0xff] %v1466_v43  ;;  %v1479_v43 = vperm.slane %v4086_v2, 4 }
 0x30a   : > { %v1731_v42 = vld [vmem:[#allocation1] sm:$0xff] }
 0x30b   : > { %1732 = vst [vmem:[#allocation1] ss:$9 sm:$0xff] %v1467_v26  ;;  %2006 = vperm.xlu1 %3092, %v1731_v42   ;;  %v1481_v26 = vperm.slane %v4086_v2, 6  ;;  %v1483_v42 = vperm.slane %v4090_v54, 0 }
 0x30c   : > { %1733 = vst [vmem:[#allocation1 + $0x1] ss:$9 sm:$0xff] %v1468_v62  ;;  %v1482_v62 = vperm.slane %v4086_v2, 7  ;;  %v1488_v2 = vperm.slane %v4090_v54, 5 }
 0x30d   : > { %1734 = vst [vmem:[#allocation1 + $0x2] ss:$9 sm:$0xff] %v1469_v20  ;;  %v1484_v20 = vperm.slane %v4090_v54, 1 }
 0x30e   : > { %1735 = vst [vmem:[#allocation1 + $0x3] ss:$9 sm:$0xff] %v1470_v23 }
 0x30f   : > { %1736 = vst [vmem:[#allocation1 + $0x4] ss:$9 sm:$0xff] %v1471_v12  ;;  %v1485_v12 = vperm.slane %v4090_v54, 2 }
 0x310   : > { %1737 = vst [vmem:[#allocation1 + $0x5] ss:$9 sm:$0xff] %v1472_v38  ;;  %v1486_v38 = vperm.slane %v4090_v54, 3 }
 0x311   : > { %1738 = vst [vmem:[#allocation1 + $0x6] ss:$9 sm:$0xff] %v1473_v19  ;;  %v1487_v19 = vperm.slane %v4090_v54, 4 }
 0x312   : > { %1739 = vst [vmem:[#allocation1 + $0x7] ss:$9 sm:$0xff] %v1474_v58  ;;  %v1489_v58 = vperm.slane %v4090_v54, 6 }
 0x319   : > { %v4476_v52 = vld [vmem:[#allocation1] sm:$0xff] }
 0x31a   : > { %1741 = vst [vmem:[#allocation1] ss:$9 sm:$0xff] %v1475_v46  ;;  %v1490_v46 = vperm.slane %v4090_v54, 7  ;;  %v1496_v54 = vperm.slane %v4132_v55, 5 }
 0x31b   : > { %1742 = vst [vmem:[#allocation1 + $0x1] ss:$9 sm:$0xff] %v1476_v11  ;;  %v1491_v11 = vperm.slane %v4132_v55, 0 }
 0x31c   : > { %1743 = vst [vmem:[#allocation1 + $0x2] ss:$9 sm:$0xff] %v1477_v15  ;;  %v1492_v15 = vperm.slane %v4132_v55, 1 }
 0x31d   : > { %1744 = vst [vmem:[#allocation1 + $0x3] ss:$9 sm:$0xff] %v1478_v29 }
 0x31e   : > { %1745 = vst [vmem:[#allocation1 + $0x4] ss:$9 sm:$0xff] %v1479_v43  ;;  %v1493_v43 = vperm.slane %v4132_v55, 2 }
 0x31f   : > { %1746 = vst [vmem:[#allocation1 + $0x5] ss:$9 sm:$0xff] %v1480_v28  ;;  %v1494_v28 = vperm.slane %v4132_v55, 3 }
 0x320   : > { %1747 = vst [vmem:[#allocation1 + $0x6] ss:$9 sm:$0xff] %v1481_v26  ;;  %v1495_v26 = vperm.slane %v4132_v55, 4 }
 0x321   : > { %1748 = vst [vmem:[#allocation1 + $0x7] ss:$9 sm:$0xff] %v1482_v62  ;;  %v1228_v62 = vand.u32 65535, %v4181_v34 }
 0x328   : > { %v4486_v23 = vld [vmem:[#allocation1] sm:$0xff] }
 0x329   : > { %1750 = vst [vmem:[#allocation1] ss:$9 sm:$0xff] %v1483_v42  ;;  %v1497_v42 = vperm.slane %v4132_v55, 6 }
 0x32a   : > { %1751 = vst [vmem:[#allocation1 + $0x1] ss:$9 sm:$0xff] %v1484_v20  ;;  %v1498_v20 = vperm.slane %v4132_v55, 7  ;;  %v2852_v55 = vsel %vm1243_vm10, 1.0, %v5259_v24  ;;  %vm2113_vm10 = vcmask 326912  }
 0x32b   : > { %1752 = vst [vmem:[#allocation1 + $0x2] ss:$9 sm:$0xff] %v1485_v12  ;;  %v4503_v12 = vpop.xlane.xlu1 %1232 }
 0x32c   : > { %1753 = vst [vmem:[#allocation1 + $0x3] ss:$9 sm:$0xff] %v1486_v38  ;;  %v1230_v38 = vcvt.s32.f32 %v1228_v62  ;;  %vm1234_vm9 = vcmp.eq.f32.partialorder %v4201_v14, %v4503_v12  ;;  %v2561_v14 = vadd.f32 %v2852_v55, %v4393_v30 }
 0x32d   : > { %1754 = vst [vmem:[#allocation1 + $0x4] ss:$9 sm:$0xff] %v1487_v19  ;;  %v4507_v19 = vpop.f32.mrf.mxu1 }
 0x32e   : > { %1755 = vst [vmem:[#allocation1 + $0x5] ss:$9 sm:$0xff] %v1488_v2  ;;  %v1235_v34 = vsel %vm1234_vm9, %v1230_v38, inf  ;;  %v1155_v2 = vcvt.f32.s32 %v4220_v22  ;;  %v1505_v38 = vperm.slane %v4135_v48, 6  ;;  %vm2109_vm9 = vcmask 261312  }
 0x32f   : > { %1756 = vst [vmem:[#allocation1 + $0x6] ss:$9 sm:$0xff] %v1489_v58  ;;  %1236 = vmin.xlane.f32.xlu2 %v1235_v34  ;;  %v1499_v58 = vperm.slane %v4135_v48, 0  ;;  %v5270_v34 = vld [vmem:[#allocation5_spill] sm:$0xff] }
 0x330   : > { %1757 = vst [vmem:[#allocation1 + $0x7] ss:$9 sm:$0xff] %v1490_v46  ;;  %v2199_v46 = vmax.f32 %v2852_v55, -128.0  ;;  %v1156_v62 = vshll.u32 %v1155_v2, 16  ;;  %v1506_v2 = vperm.slane %v4135_v48, 7 }
 0x331   : > { %2397 = vst.msk [vmem:[%s4350_s16 + $0x38] sm:$0xff] %vm371_vm0, %v4507_v19 }
 0x332   : > { %v2231_v22 = vmin.f32 %v2199_v46, 127.0 }
 0x334   : > { %v2986_v30 = vcvt.f32.s32 %v2231_v22  ;;  %v5272_v22 = vld [vmem:[#allocation7_spill] sm:$0xff] }
 0x335   : > { %v4532_v46 = vpop.f32.mrf.mxu1 }
 0x336   : > { %2398 = vst.msk [vmem:[%s4350_s16 + $0x40] sm:$0xff] %vm371_vm0, %v4532_v46 }
 0x337   : > { %v1758_v29 = vld [vmem:[#allocation1] sm:$0xff] }
 0x338   : > { %1759 = vst [vmem:[#allocation1] ss:$9 sm:$0xff] %v1491_v11  ;;  %2015 = vperm.xlu1 %3092, %v1758_v29   ;;  %v1500_v11 = vperm.slane %v4135_v48, 1  ;;  %v1153_v29 = vpop.xlane.xlu0 %1152 }
 0x339   : > { %1760 = vst [vmem:[#allocation1 + $0x1] ss:$9 sm:$0xff] %v1492_v15 }
 0x33a   : > { %1761 = vst [vmem:[#allocation1 + $0x2] ss:$9 sm:$0xff] %v1493_v43  ;;  %v2562_v43 = vadd.f32 %v4062_v27, %v2561_v14  ;;  %v2296_v27 = vpack.c.b16 %v2986_v30, %v2986_v30  ;;  %v5271_v14 = vld [vmem:[#allocation6_spill] sm:$0xff]  ;;  %v1509_v30 = vperm.slane %v4187_v61, 2 }
 0x33b   : > { %1762 = vst [vmem:[#allocation1 + $0x3] ss:$9 sm:$0xff] %v1494_v28  ;;  %v1154_v28 = vcvt.f32.s32 %v1153_v29 }
 0x33c   : > { %1763 = vst [vmem:[#allocation1 + $0x4] ss:$9 sm:$0xff] %v1495_v26  ;;  %v1502_v26 = vperm.slane %v4135_v48, 3  ;;  %v2563_v55 = vadd.f32 %v5270_v34, %v2562_v43  ;;  %v1510_v34 = vperm.slane %v4187_v61, 3 }
 0x33d   : > { %1764 = vst [vmem:[#allocation1 + $0x5] ss:$9 sm:$0xff] %v1496_v54  ;;  %v1503_v54 = vperm.slane %v4135_v48, 4 }
 0x33e   : > { %1765 = vst [vmem:[#allocation1 + $0x6] ss:$9 sm:$0xff] %v1497_v42  ;;  %v1504_v42 = vperm.slane %v4135_v48, 5 }
 0x33f   : > { %1766 = vst [vmem:[#allocation1 + $0x7] ss:$9 sm:$0xff] %v1498_v20  ;;  %v4527_v20 = vadd.s32 %v1156_v62, %v1154_v28  ;;  %v1507_v28 = vperm.slane %v4187_v61, 0  ;;  %v1508_v62 = vperm.slane %v4187_v61, 1 }
 0x341   : > { %vm1267_vm11 = vcmp.eq.s32.totalorder %v3689_v37, %v4527_v20 }
 0x342   : > { %v4539_v29 = vsel %vm1267_vm11, 1.0, %v5259_v24  ;;  %2908 = vmatmul.msk.f32.gmra.mxu3 %vm1267_vm11, %v5261_v47  ;;  %vm2117_vm11 = vcmask 392512  }
 0x343   : > { %v2223_v48 = vmax.f32 %v4539_v29, -128.0 }
 0x346   : > { %v4520_v15 = vld [vmem:[#allocation1] sm:$0xff] }
 0x347   : > { %1768 = vst [vmem:[#allocation1] ss:$9 sm:$0xff] %v1499_v58  ;;  %v2297_v58 = vpack.c.b8 %v2296_v27, %v2296_v27  ;;  %v1041_v27 = vpop.xlane.xlu2 %1040  ;;  %2009 = vperm.xlu2 %3093, %v4476_v52   ;;  %v5275_v52 = vld [vmem:[#allocation11_spill] sm:$0xff] }
 0x348   : > { %1769 = vst [vmem:[#allocation1 + $0x1] ss:$9 sm:$0xff] %v1500_v11  ;;  %v2564_v11 = vadd.f32 %v5271_v14, %v2563_v55  ;;  %v1169_v55 = vcvt.f32.s32 %v4212_v40 }
 0x349   : > { %1770 = vst [vmem:[#allocation1 + $0x2] ss:$9 sm:$0xff] %v1501_v8  ;;  %v2255_v8 = vmin.f32 %v2223_v48, 127.0  ;;  %v1512_v48 = vperm.slane %v4187_v61, 5 }
 0x34a   : > { %1771 = vst [vmem:[#allocation1 + $0x3] ss:$9 sm:$0xff] %v1502_v26  ;;  %v2565_v43 = vadd.f32 %v5272_v22, %v2564_v11  ;;  %v1511_v11 = vperm.slane %v4187_v61, 4  ;;  %v1042_v22 = vcvt.f32.s32 %v1041_v27 }
 0x34b   : > { %1772 = vst [vmem:[#allocation1 + $0x4] ss:$9 sm:$0xff] %v1503_v54  ;;  %v3034_v26 = vcvt.f32.s32 %v2255_v8 }
 0x34c   : > { %1773 = vst [vmem:[#allocation1 + $0x5] ss:$9 sm:$0xff] %v1504_v42 }
 0x34d   : > { %1774 = vst [vmem:[#allocation1 + $0x6] ss:$9 sm:$0xff] %v1505_v38  ;;  %v2344_v42 = vpack.c.b16 %v3034_v26, %v3034_v26  ;;  %v1167_v38 = vpop.xlane.xlu0 %1166  ;;  %v1170_v26 = vshll.u32 %v1169_v55, 16  ;;  %v5276_v55 = vld [vmem:[#allocation9_spill] sm:$0xff] }
 0x34e   : > { %1775 = vst [vmem:[#allocation1 + $0x7] ss:$9 sm:$0xff] %v1506_v2  ;;  %v1043_v2 = vcvt.f32.s32 %v4236_v0  ;;  %v1168_v8 = vcvt.f32.s32 %v1167_v38  ;;  %v1514_v0 = vperm.slane %v4187_v61, 7 }
 0x34f   : > { %2359 = vst [vmem:[%s4078_s13 + $0x2] sm:$0x3] %v2297_v58  ;;  %v5273_v58 = vld [vmem:[#allocation8_spill] sm:$0xff]  ;;  %v2345_v40 = vpack.c.b8 %v2344_v42, %v2344_v42  ;;  %2012 = vperm.xlu2 %3093, %v4486_v23   ;;  %v1516_v23 = vperm.slane %v5276_v55, 1 }
 0x350   : > { %v2566_v14 = vadd.f32 %v5273_v58, %v2565_v43  ;;  %v1044_v43 = vshll.u32 %v1043_v2, 16  ;;  %v1515_v2 = vperm.slane %v5276_v55, 0 }
 0x351   : > { %2383 = vst [vmem:[%s4078_s13 + $0x32] sm:$0x3] %v2345_v40 }
 0x352   : > { %v4562_v38 = vadd.s32 %v1044_v43, %v1042_v22  ;;  %v1517_v22 = vperm.slane %v5276_v55, 2  ;;  %v1519_v43 = vperm.slane %v5276_v55, 4 }
 0x354   : > { %vm1259_vm12 = vcmp.eq.s32.totalorder %v3689_v37, %v4562_v38 }
 0x355   : > { %v1776_v54 = vld [vmem:[#allocation1] sm:$0xff]  ;;  %2900 = vmatmul.msk.f32.gmra.mxu1 %vm1259_vm12, %v5261_v47 }
 0x356   : > { %1777 = vst [vmem:[#allocation1] ss:$9 sm:$0xff] %v1507_v28  ;;  %2021 = vperm.xlu1 %3092, %v1776_v54   ;;  %v1513_v28 = vperm.slane %v4187_v61, 6  ;;  %v2868_v61 = vsel %vm1259_vm12, 1.0, %v5259_v24  ;;  %vm2121_vm12 = vcmask 458112  }
 0x357   : > { %1778 = vst [vmem:[#allocation1 + $0x1] ss:$9 sm:$0xff] %v1508_v62  ;;  %v5274_v62 = vld [vmem:[#allocation10_spill] sm:$0xff]  ;;  %v2215_v58 = vmax.f32 %v2868_v61, -128.0  ;;  %2018 = vperm.xlu2 %3093, %v4520_v15  }
 0x358   : > { %1779 = vst [vmem:[#allocation1 + $0x2] ss:$9 sm:$0xff] %v1509_v30  ;;  %v2567_v54 = vadd.f32 %v5274_v62, %v2566_v14  ;;  %v4560_v30 = vadd.s32 %v1170_v26, %v1168_v8  ;;  %v5277_v14 = vld [vmem:[#allocation12_spill] sm:$0xff]  ;;  %v1518_v26 = vperm.slane %v5276_v55, 3 }
 0x359   : > { %1780 = vst [vmem:[#allocation1 + $0x3] ss:$9 sm:$0xff] %v1510_v34  ;;  %v4566_v34 = vpop.f32.mrf.mxu1 }
 0x35a   : > { %1781 = vst [vmem:[#allocation1 + $0x4] ss:$9 sm:$0xff] %v1511_v11  ;;  %v2568_v27 = vadd.f32 %v5275_v52, %v2567_v54  ;;  %vm1268_vm13 = vcmp.eq.s32.totalorder %v3689_v37, %v4560_v30 }
 0x35b   : > { %1782 = vst [vmem:[#allocation1 + $0x5] ss:$9 sm:$0xff] %v1512_v48  ;;  %v4579_v42 = vsel %vm1268_vm13, 1.0, %v5259_v24  ;;  %2909 = vmatmul.msk.f32.gmra.mxu3 %vm1268_vm13, %v5261_v47  ;;  %vm2125_vm13 = vcmask 523712  }
 0x35c   : > { %1783 = vst [vmem:[#allocation1 + $0x6] ss:$9 sm:$0xff] %v1513_v28  ;;  %v2569_v11 = vadd.f32 %v5277_v14, %v2568_v27  ;;  %v2224_v48 = vmax.f32 %v4579_v42, -128.0  ;;  %v2247_v28 = vmin.f32 %v2215_v58, 127.0  ;;  %v1520_v27 = vperm.slane %v5276_v55, 5 }
 0x35d   : > { %1784 = vst [vmem:[#allocation1 + $0x7] ss:$9 sm:$0xff] %v1514_v0 }
 0x35e   : > { %2399 = vst.msk [vmem:[%s4350_s16 + $0x48] sm:$0xff] %vm371_vm0, %v4566_v34  ;;  %v2570_v40 = vadd.f32 %v4261_v50, %v2569_v11  ;;  %v2256_v0 = vmin.f32 %v2224_v48, 127.0  ;;  %v3018_v62 = vcvt.f32.s32 %v2247_v28  ;;  %v1522_v11 = vperm.slane %v5276_v55, 7  ;;  %v1181_v28 = vpop.xlane.xlu2 %1180 }
 0x360   : > { %v2571_v54 = vadd.f32 %v4305_v9, %v2570_v40  ;;  %v3036_v52 = vcvt.f32.s32 %v2256_v0  ;;  %v2328_v50 = vpack.c.b16 %v3018_v62, %v3018_v62  ;;  %v1183_v40 = vcvt.f32.s32 %v4246_v4  ;;  %v1069_v0 = vpop.xlane.xlu0 %1068 }
 0x361   : > { %v1524_v4 = vperm.slane %v4206_v7, 1 }
 0x362   : > { %v2572_v58 = vadd.f32 %v4318_v32, %v2571_v54  ;;  %v2346_v14 = vpack.c.b16 %v3036_v52, %v3036_v52  ;;  %v2329_v9 = vpack.c.b8 %v2328_v50, %v2328_v50  ;;  %v1184_v62 = vshll.u32 %v1183_v40, 16 }
 0x363   : > { %v1523_v52 = vperm.slane %v4206_v7, 0 }
 0x364   : > { %v1785_v8 = vld [vmem:[#allocation1] sm:$0xff]  ;;  %v2573_v48 = vadd.f32 %v4299_v18, %v2572_v58  ;;  %2375 = vst [vmem:[%s4078_s13 + $0x22] sm:$0x3] %v2329_v9  ;;  %v1529_v9 = vperm.slane %v4206_v7, 6 }
 0x365   : > { %1786 = vst [vmem:[#allocation1] ss:$9 sm:$0xff] %v1515_v2  ;;  %2024 = vperm.xlu0 %3091, %v1785_v8   ;;  %v1521_v2 = vperm.slane %v5276_v55, 6  ;;  %v1055_v8 = vpop.xlane.xlu1 %1054  ;;  %v1071_v55 = vcvt.f32.s32 %v4269_v16  ;;  %v1525_v16 = vperm.slane %v4206_v7, 2 }
 0x366   : > { %1787 = vst [vmem:[#allocation1 + $0x1] ss:$9 sm:$0xff] %v1516_v23  ;;  %v2347_v23 = vpack.c.b8 %v2346_v14, %v2346_v14  ;;  %v2574_v32 = vadd.f32 %v4371_v17, %v2573_v48  ;;  %v1056_v15 = vcvt.f32.s32 %v1055_v8  ;;  %v1527_v14 = vperm.slane %v4206_v7, 4 }
 0x367   : > { %1788 = vst [vmem:[#allocation1 + $0x2] ss:$9 sm:$0xff] %v1517_v22  ;;  %v1057_v22 = vcvt.f32.s32 %v4258_v45  ;;  %v1070_v45 = vcvt.f32.s32 %v1069_v0  ;;  %v1072_v17 = vshll.u32 %v1071_v55, 16  ;;  %v1530_v8 = vperm.slane %v4206_v7, 7 }
 0x368   : > { %1789 = vst [vmem:[#allocation1 + $0x3] ss:$9 sm:$0xff] %v1518_v26  ;;  %v2575_v26 = vadd.f32 %v4427_v51, %v2574_v32  ;;  %v1526_v51 = vperm.slane %v4206_v7, 3 }
 0x369   : > { %1790 = vst [vmem:[#allocation1 + $0x4] ss:$9 sm:$0xff] %v1519_v43  ;;  %v1182_v43 = vcvt.f32.s32 %v1181_v28  ;;  %v1058_v18 = vshll.u32 %v1057_v22, 16  ;;  %v4629_v22 = vpop.f32.mrf.mxu1 }
 0x36a   : > { %1791 = vst [vmem:[#allocation1 + $0x5] ss:$9 sm:$0xff] %v1520_v27  ;;  %v2576_v54 = vadd.f32 %v4446_v56, %v2575_v26  ;;  %v4613_v56 = vadd.s32 %v1072_v17, %v1070_v45  ;;  %v1531_v45 = vperm.slane %v4240_v44, 0 }
 0x36b   : > { %1792 = vst [vmem:[#allocation1 + $0x6] ss:$9 sm:$0xff] %v1521_v2  ;;  %v4606_v27 = vadd.s32 %v1058_v18, %v1056_v15  ;;  %v4609_v58 = vadd.s32 %v1184_v62, %v1182_v43  ;;  %v1197_v43 = vcvt.f32.s32 %v4293_v63  ;;  %v1534_v63 = vperm.slane %v4240_v44, 3 }
 0x36c   : > { %1793 = vst [vmem:[#allocation1 + $0x7] ss:$9 sm:$0xff] %v1522_v11  ;;  %v2577_v50 = vadd.f32 %v2868_v61, %v2576_v54  ;;  %v1528_v11 = vperm.slane %v4206_v7, 5  ;;  %vm1261_vm1 = vcmp.eq.s32.totalorder %v3689_v37, %v4613_v56 }
 0x36d   : > { %2384 = vst [vmem:[%s4078_s13 + $0x34] sm:$0x3] %v2347_v23  ;;  %vm1260_vm14 = vcmp.eq.s32.totalorder %v3689_v37, %v4606_v27  ;;  %vm1269_vm15 = vcmp.eq.s32.totalorder %v3689_v37, %v4609_v58  ;;  %v2870_v32 = vsel %vm1261_vm1, 1.0, %v5259_v24 }
 0x36e   : > { %v2869_v61 = vsel %vm1260_vm14, 1.0, %v5259_v24  ;;  %2901 = vmatmul.msk.f32.gmra.mxu1 %vm1260_vm14, %v5261_v47  ;;  %v4625_v23 = vsel %vm1269_vm15, 1.0, %v5259_v24  ;;  %2910 = vmatmul.msk.f32.gmra.mxu3 %vm1269_vm15, %v5261_v47  ;;  %v2217_v0 = vmax.f32 %v2870_v32, -128.0  ;;  %2400 = vst.msk [vmem:[%s4350_s16 + $0x50] sm:$0xff] %vm371_vm0, %v4629_v22  ;;  %vm2129_vm14 = vcmask 589312  }
 0x36f   : > { %v2216_v48 = vmax.f32 %v2869_v61, -128.0  ;;  %v2225_v28 = vmax.f32 %v4625_v23, -128.0  ;;  %vm2133_vm15 = vcmask 654912  }
 0x370   : > { %v2249_v55 = vmin.f32 %v2217_v0, 127.0 }
 0x371   : > { %v2248_v40 = vmin.f32 %v2216_v48, 127.0  ;;  %v2257_v15 = vmin.f32 %v2225_v28, 127.0  ;;  %v1535_v48 = vperm.slane %v4240_v44, 4 }
 0x372   : > { %v3022_v54 = vcvt.f32.s32 %v2249_v55 }
 0x373   : > { %v1794_v2 = vld [vmem:[#allocation1] sm:$0xff]  ;;  %v3020_v7 = vcvt.f32.s32 %v2248_v40  ;;  %v3038_v18 = vcvt.f32.s32 %v2257_v15  ;;  %v1536_v40 = vperm.slane %v4240_v44, 5  ;;  %v1538_v15 = vperm.slane %v4240_v44, 7 }
 0x374   : > { %1795 = vst [vmem:[#allocation1] ss:$9 sm:$0xff] %v1523_v52  ;;  %2027 = vperm.xlu2 %3093, %v1794_v2   ;;  %v1532_v52 = vperm.slane %v4240_v44, 1  ;;  %v1195_v2 = vpop.xlane.xlu1 %1194 }
 0x375   : > { %1796 = vst [vmem:[#allocation1 + $0x1] ss:$9 sm:$0xff] %v1524_v4  ;;  %v2330_v26 = vpack.c.b16 %v3020_v7, %v3020_v7  ;;  %v1533_v4 = vperm.slane %v4240_v44, 2  ;;  %v4657_v7 = vpop.f32.mrf.mxu3 }
 0x376   : > { %1797 = vst [vmem:[#allocation1 + $0x2] ss:$9 sm:$0xff] %v1525_v16  ;;  %2902 = vmatmul.msk.f32.gmra.mxu1 %vm1261_vm1, %v5261_v47  ;;  %v1198_v16 = vshll.u32 %v1197_v43, 16  ;;  %vm2137_vm1 = vcmask 720512  }
 0x377   : > { %1798 = vst [vmem:[#allocation1 + $0x3] ss:$9 sm:$0xff] %v1526_v51  ;;  %v2331_v62 = vpack.c.b8 %v2330_v26, %v2330_v26  ;;  %v2578_v51 = vadd.f32 %v2869_v61, %v2577_v50  ;;  %v1537_v50 = vperm.slane %v4240_v44, 6 }
 0x378   : > { %1799 = vst [vmem:[#allocation1 + $0x4] ss:$9 sm:$0xff] %v1527_v14  ;;  %v2348_v14 = vpack.c.b16 %v3038_v18, %v3038_v18  ;;  %v1539_v18 = vperm.slane %v4289_v39, 0 }
 0x379   : > { %1800 = vst [vmem:[#allocation1 + $0x5] ss:$9 sm:$0xff] %v1528_v11  ;;  %v1196_v11 = vcvt.f32.s32 %v1195_v2  ;;  %v1543_v2 = vperm.slane %v4289_v39, 4 }
 0x37a   : > { %1801 = vst [vmem:[#allocation1 + $0x6] ss:$9 sm:$0xff] %v1529_v9  ;;  %v2332_v9 = vpack.c.b16 %v3022_v54, %v3022_v54  ;;  %v2349_v61 = vpack.c.b8 %v2348_v14, %v2348_v14 }
 0x37b   : > { %1802 = vst [vmem:[#allocation1 + $0x7] ss:$9 sm:$0xff] %v1530_v8  ;;  %v4646_v8 = vadd.f32 %v2870_v32, %v2578_v51  ;;  %v4648_v28 = vadd.s32 %v1198_v16, %v1196_v11  ;;  %v4655_v32 = vpop.f32.mrf.mxu1  ;;  %v1544_v16 = vperm.slane %v4289_v39, 5  ;;  %v1545_v51 = vperm.slane %v4289_v39, 6 }
 0x37c   : > { %2376 = vst [vmem:[%s4078_s13 + $0x24] sm:$0x3] %v2331_v62  ;;  %v2333_v0 = vpack.c.b8 %v2332_v9, %v2332_v9  ;;  %v1540_v62 = vperm.slane %v4289_v39, 1  ;;  %v1546_v11 = vperm.slane %v4289_v39, 7  ;;  %v1547_v9 = vperm.slane %v4312_v10, 0 }
 0x37d   : > { %vm1270_vm2 = vcmp.eq.s32.totalorder %v3689_v37, %v4648_v28  ;;  %2385 = vst [vmem:[%s4078_s13 + $0x36] sm:$0x3] %v2349_v61  ;;  %v1551_v61 = vperm.slane %v4312_v10, 4 }
 0x37e   : > { %v4660_v55 = vsel %vm1270_vm2, 1.0, %v5259_v24  ;;  %2911 = vmatmul.msk.f32.gmra.mxu3 %vm1270_vm2, %v5261_v47  ;;  %2377 = vst [vmem:[%s4078_s13 + $0x26] sm:$0x3] %v2333_v0  ;;  %v1553_v0 = vperm.slane %v4312_v10, 6  ;;  %vm2145_vm2 = vcmask 851712  }
 0x37f   : > { %v2226_v26 = vmax.f32 %v4660_v55, -128.0  ;;  %2411 = vst.msk [vmem:[%s4350_s16 + $0xa8] sm:$0xff] %vm371_vm0, %v4657_v7 }
 0x380   : > { %2401 = vst.msk [vmem:[%s4350_s16 + $0x58] sm:$0xff] %vm371_vm0, %v4655_v32 }
 0x381   : > { %v2258_v44 = vmin.f32 %v2226_v26, 127.0  ;;  %v1554_v26 = vperm.slane %v4312_v10, 7 }
 0x382   : > { %v1803_v17 = vld [vmem:[#allocation1] sm:$0xff] }
 0x383   : > { %1804 = vst [vmem:[#allocation1] ss:$9 sm:$0xff] %v1531_v45  ;;  %2030 = vperm.xlu1 %3092, %v1803_v17   ;;  %v3040_v43 = vcvt.f32.s32 %v2258_v44  ;;  %v4674_v45 = vpop.f32.mrf.mxu1  ;;  %v1542_v17 = vperm.slane %v4289_v39, 3  ;;  %v1555_v44 = vperm.slane %v4285_v31, 0 }
 0x384   : > { %1805 = vst [vmem:[#allocation1 + $0x1] ss:$9 sm:$0xff] %v1532_v52  ;;  %v1541_v52 = vperm.slane %v4289_v39, 2  ;;  %v1550_v39 = vperm.slane %v4312_v10, 3 }
 0x385   : > { %1806 = vst [vmem:[#allocation1 + $0x2] ss:$9 sm:$0xff] %v1533_v4  ;;  %v2350_v4 = vpack.c.b16 %v3040_v43, %v3040_v43  ;;  %v1556_v43 = vperm.slane %v4285_v31, 1 }
 0x386   : > { %1807 = vst [vmem:[#allocation1 + $0x3] ss:$9 sm:$0xff] %v1534_v63 }
 0x387   : > { %1808 = vst [vmem:[#allocation1 + $0x4] ss:$9 sm:$0xff] %v1535_v48  ;;  %v2351_v14 = vpack.c.b8 %v2350_v4, %v2350_v4  ;;  %v1548_v48 = vperm.slane %v4312_v10, 1  ;;  %v1561_v4 = vperm.slane %v4285_v31, 6 }
 0x388   : > { %1809 = vst [vmem:[#allocation1 + $0x5] ss:$9 sm:$0xff] %v1536_v40 }
 0x389   : > { %1810 = vst [vmem:[#allocation1 + $0x6] ss:$9 sm:$0xff] %v1537_v50  ;;  %v1549_v50 = vperm.slane %v4312_v10, 2 }
 0x38a   : > { %1811 = vst [vmem:[#allocation1 + $0x7] ss:$9 sm:$0xff] %v1538_v15  ;;  %v1552_v15 = vperm.slane %v4312_v10, 5  ;;  %v1560_v10 = vperm.slane %v4285_v31, 5 }
 0x38b   : > { %v4682_v63 = vpop.f32.mrf.mxu1  ;;  %2386 = vst [vmem:[%s4078_s13 + $0x38] sm:$0x3] %v2351_v14  ;;  %v1565_v14 = vperm.slane %v4364_v21, 2 }
 0x38c   : > { %2402 = vst.msk [vmem:[%s4350_s16 + $0x60] sm:$0xff] %vm371_vm0, %v4674_v45 }
 0x38d   : > { %2403 = vst.msk [vmem:[%s4350_s16 + $0x68] sm:$0xff] %vm371_vm0, %v4682_v63 }
 0x391   : > { %v1812_v54 = vld [vmem:[#allocation1] sm:$0xff] }
 0x392   : > { %1813 = vst [vmem:[#allocation1] ss:$9 sm:$0xff] %v1539_v18  ;;  %2033 = vperm.xlu0 %3091, %v1812_v54   ;;  %v1558_v54 = vperm.slane %v4285_v31, 3 }
 0x393   : > { %1814 = vst [vmem:[#allocation1 + $0x1] ss:$9 sm:$0xff] %v1540_v62  ;;  %v1557_v62 = vperm.slane %v4285_v31, 2 }
 0x394   : > { %1815 = vst [vmem:[#allocation1 + $0x2] ss:$9 sm:$0xff] %v1541_v52  ;;  %v1559_v52 = vperm.slane %v4285_v31, 4 }
 0x395   : > { %1816 = vst [vmem:[#allocation1 + $0x3] ss:$9 sm:$0xff] %v1542_v17  ;;  %v1562_v17 = vperm.slane %v4285_v31, 7  ;;  %v1568_v31 = vperm.slane %v4364_v21, 5 }
 0x396   : > { %1817 = vst [vmem:[#allocation1 + $0x4] ss:$9 sm:$0xff] %v1543_v2  ;;  %v1563_v2 = vperm.slane %v4364_v21, 0 }
 0x397   : > { %1818 = vst [vmem:[#allocation1 + $0x5] ss:$9 sm:$0xff] %v1544_v16  ;;  %v1564_v16 = vperm.slane %v4364_v21, 1 }
 0x398   : > { %1819 = vst [vmem:[#allocation1 + $0x6] ss:$9 sm:$0xff] %v1545_v51 }
 0x399   : > { %1820 = vst [vmem:[#allocation1 + $0x7] ss:$9 sm:$0xff] %v1546_v11  ;;  %v1566_v11 = vperm.slane %v4364_v21, 3 }
 0x3a0   : > { %v1821_v40 = vld [vmem:[#allocation1] sm:$0xff] }
 0x3a1   : > { %1822 = vst [vmem:[#allocation1] ss:$9 sm:$0xff] %v1547_v9  ;;  %2036 = vperm.xlu2 %3093, %v1821_v40   ;;  %v1567_v9 = vperm.slane %v4364_v21, 4  ;;  %v1570_v40 = vperm.slane %v4364_v21, 7 }
 0x3a2   : > { %1823 = vst [vmem:[#allocation1 + $0x1] ss:$9 sm:$0xff] %v1548_v48  ;;  %v1569_v48 = vperm.slane %v4364_v21, 6  ;;  %v1575_v21 = vperm.slane %v4412_v13, 4 }
 0x3a3   : > { %1824 = vst [vmem:[#allocation1 + $0x2] ss:$9 sm:$0xff] %v1549_v50  ;;  %v1571_v50 = vperm.slane %v4412_v13, 0 }
 0x3a4   : > { %1825 = vst [vmem:[#allocation1 + $0x3] ss:$9 sm:$0xff] %v1550_v39  ;;  %v1572_v39 = vperm.slane %v4412_v13, 1 }
 0x3a5   : > { %1826 = vst [vmem:[#allocation1 + $0x4] ss:$9 sm:$0xff] %v1551_v61 }
 0x3a6   : > { %1827 = vst [vmem:[#allocation1 + $0x5] ss:$9 sm:$0xff] %v1552_v15  ;;  %v1083_v15 = vpop.xlane.xlu2 %1082 }
 0x3a7   : > { %1828 = vst [vmem:[#allocation1 + $0x6] ss:$9 sm:$0xff] %v1553_v0  ;;  %v1085_v0 = vcvt.f32.s32 %v4378_v6  ;;  %v1578_v6 = vperm.slane %v4412_v13, 7 }
 0x3a8   : > { %1829 = vst [vmem:[#allocation1 + $0x7] ss:$9 sm:$0xff] %v1554_v26  ;;  %v1573_v26 = vperm.slane %v4412_v13, 2 }
 0x3af   : > { %v4701_v18 = vld [vmem:[#allocation1] sm:$0xff] }
 0x3b0   : > { %1831 = vst [vmem:[#allocation1] ss:$9 sm:$0xff] %v1555_v44  ;;  %v1574_v44 = vperm.slane %v4412_v13, 3 }
 0x3b1   : > { %1832 = vst [vmem:[#allocation1 + $0x1] ss:$9 sm:$0xff] %v1556_v43  ;;  %v1084_v43 = vcvt.f32.s32 %v1083_v15 }
 0x3b2   : > { %1833 = vst [vmem:[#allocation1 + $0x2] ss:$9 sm:$0xff] %v1557_v62  ;;  %v1576_v62 = vperm.slane %v4412_v13, 5 }
 0x3b3   : > { %1834 = vst [vmem:[#allocation1 + $0x3] ss:$9 sm:$0xff] %v1558_v54  ;;  %v1086_v54 = vshll.u32 %v1085_v0, 16 }
 0x3b4   : > { %1835 = vst [vmem:[#allocation1 + $0x4] ss:$9 sm:$0xff] %v1559_v52  ;;  %v1577_v52 = vperm.slane %v4412_v13, 6 }
 0x3b5   : > { %1836 = vst [vmem:[#allocation1 + $0x5] ss:$9 sm:$0xff] %v1560_v10  ;;  %v1211_v10 = vcvt.f32.s32 %v4385_v53 }
 0x3b6   : > { %1837 = vst [vmem:[#allocation1 + $0x6] ss:$9 sm:$0xff] %v1561_v4  ;;  %v4727_v4 = vadd.s32 %v1086_v54, %v1084_v43 }
 0x3b7   : > { %1838 = vst [vmem:[#allocation1 + $0x7] ss:$9 sm:$0xff] %v1562_v17  ;;  %v4729_v17 = vpop.f32.mrf.mxu3 }
 0x3b8   : > { %2412 = vst.msk [vmem:[%s4350_s16 + $0xb0] sm:$0xff] %vm371_vm0, %v4729_v17  ;;  %vm1262_vm3 = vcmp.eq.s32.totalorder %v3689_v37, %v4727_v4 }
 0x3b9   : > { %v2871_v53 = vsel %vm1262_vm3, 1.0, %v5259_v24  ;;  %2903 = vmatmul.msk.f32.gmra.mxu1 %vm1262_vm3, %v5261_v47  ;;  %vm2149_vm3 = vcmask 917312  }
 0x3be   : > { %v1839_v51 = vld [vmem:[#allocation1] sm:$0xff] }
 0x3bf   : > { %1840 = vst [vmem:[#allocation1] ss:$9 sm:$0xff] %v1563_v2  ;;  %2042 = vperm.xlu0 %3091, %v1839_v51   ;;  %v1209_v2 = vpop.xlane.xlu0 %1208 }
 0x3c0   : > { %1841 = vst [vmem:[#allocation1 + $0x1] ss:$9 sm:$0xff] %v1564_v16  ;;  %v1212_v16 = vshll.u32 %v1211_v10, 16  ;;  %v1210_v51 = vcvt.f32.s32 %v1209_v2  ;;  %v4763_v10 = vpop.f32.mrf.mxu3 }
 0x3c1   : > { %1842 = vst [vmem:[#allocation1 + $0x2] ss:$9 sm:$0xff] %v1565_v14  ;;  %v4734_v14 = vpop.f32.mrf.mxu1 }
 0x3c2   : > { %1843 = vst [vmem:[#allocation1 + $0x3] ss:$9 sm:$0xff] %v1566_v11  ;;  %v4743_v13 = vadd.s32 %v1212_v16, %v1210_v51  ;;  %v2218_v11 = vmax.f32 %v2871_v53, -128.0  ;;  %v4766_v51 = vpop.f32.mrf.mxu0 }
 0x3c3   : > { %1844 = vst [vmem:[#allocation1 + $0x4] ss:$9 sm:$0xff] %v1567_v9  ;;  %v2580_v9 = vadd.f32 %v2871_v53, %v4646_v8  ;;  %v1583_v8 = vperm.slane %v4438_v35, 4 }
 0x3c4   : > { %1845 = vst [vmem:[#allocation1 + $0x5] ss:$9 sm:$0xff] %v1568_v31  ;;  %v1579_v31 = vperm.slane %v4438_v35, 0  ;;  %vm1271_vm4 = vcmp.eq.s32.totalorder %v3689_v37, %v4743_v13 }
 0x3c5   : > { %1846 = vst [vmem:[#allocation1 + $0x6] ss:$9 sm:$0xff] %v1569_v48  ;;  %v1580_v48 = vperm.slane %v4438_v35, 1  ;;  %v2581_v15 = vadd.f32 %v4279_v25, %v2580_v9  ;;  %v2880_v0 = vsel %vm1271_vm4, 1.0, %v5259_v24  ;;  %2912 = vmatmul.msk.f32.gmra.mxu3 %vm1271_vm4, %v5261_v47  ;;  %v1585_v25 = vperm.slane %v4438_v35, 6 }
 0x3c6   : > { %1847 = vst [vmem:[#allocation1 + $0x7] ss:$9 sm:$0xff] %v1570_v40  ;;  %v2227_v43 = vmax.f32 %v2880_v0, -128.0  ;;  %vm2153_vm4 = vcmask 982912  }
 0x3c7   : > { %2404 = vst.msk [vmem:[%s4350_s16 + $0x70] sm:$0xff] %vm371_vm0, %v4734_v14 }
 0x3c8   : > { %2413 = vst.msk [vmem:[%s4350_s16 + $0xb8] sm:$0xff] %vm371_vm0, %v4763_v10 }
 0x3c9   : > { %2390 = vst.msk [vmem:[%s4350_s16] sm:$0xff] %vm371_vm0, %v4766_v51 }
 0x3cd   : > { %v1848_v61 = vld [vmem:[#allocation1] sm:$0xff] }
 0x3ce   : > { %1849 = vst [vmem:[#allocation1] ss:$9 sm:$0xff] %v1571_v50  ;;  %2045 = vperm.xlu2 %3093, %v1848_v61   ;;  %v1581_v50 = vperm.slane %v4438_v35, 2  ;;  %v2250_v61 = vmin.f32 %v2218_v11, 127.0 }
 0x3cf   : > { %1850 = vst [vmem:[#allocation1 + $0x1] ss:$9 sm:$0xff] %v1572_v39  ;;  %v1582_v39 = vperm.slane %v4438_v35, 3 }
 0x3d0   : > { %1851 = vst [vmem:[#allocation1 + $0x2] ss:$9 sm:$0xff] %v1573_v26  ;;  %v1584_v26 = vperm.slane %v4438_v35, 5 }
 0x3d1   : > { %1852 = vst [vmem:[#allocation1 + $0x3] ss:$9 sm:$0xff] %v1574_v44  ;;  %v3024_v44 = vcvt.f32.s32 %v2250_v61 }
 0x3d2   : > { %1853 = vst [vmem:[#allocation1 + $0x4] ss:$9 sm:$0xff] %v1575_v21  ;;  %v2582_v21 = vadd.f32 %v4360_v60, %v2581_v15 }
 0x3d3   : > { %1854 = vst [vmem:[#allocation1 + $0x5] ss:$9 sm:$0xff] %v1576_v62  ;;  %v1586_v62 = vperm.slane %v4438_v35, 7  ;;  %v2334_v54 = vpack.c.b16 %v3024_v44, %v3024_v44  ;;  %v1592_v44 = vperm.slane %v4562_v38, 5 }
 0x3d4   : > { %1855 = vst [vmem:[#allocation1 + $0x6] ss:$9 sm:$0xff] %v1577_v52  ;;  %v2583_v52 = vadd.f32 %v4332_v5, %v2582_v21  ;;  %v1225_v5 = vcvt.f32.s32 %v4415_v33  ;;  %v1590_v33 = vperm.slane %v4562_v38, 3  ;;  %v1593_v21 = vperm.slane %v4562_v38, 6 }
 0x3d5   : > { %1856 = vst [vmem:[#allocation1 + $0x7] ss:$9 sm:$0xff] %v1578_v6  ;;  %v2259_v6 = vmin.f32 %v2227_v43, 127.0  ;;  %v2335_v60 = vpack.c.b8 %v2334_v54, %v2334_v54  ;;  %v4790_v43 = vpop.f32.mrf.mxu1 }
 0x3d6   : > { %v2584_v2 = vadd.f32 %v4431_v1, %v2583_v52  ;;  %v1587_v1 = vperm.slane %v4562_v38, 0  ;;  %v1226_v61 = vshll.u32 %v1225_v5, 16  ;;  %2405 = vst.msk [vmem:[%s4350_s16 + $0x78] sm:$0xff] %vm371_vm0, %v4790_v43 }
 0x3d7   : > { %v3042_v16 = vcvt.f32.s32 %v2259_v6  ;;  %2378 = vst [vmem:[%s4078_s13 + $0x28] sm:$0x3] %v2335_v60  ;;  %v4801_v6 = vpop.f32.mrf.mxu3 }
 0x3d8   : > { %v2585_v53 = vadd.f32 %v4539_v29, %v2584_v2  ;;  %v1589_v29 = vperm.slane %v4562_v38, 2  ;;  %2414 = vst.msk [vmem:[%s4350_s16 + $0xc0] sm:$0xff] %vm371_vm0, %v4801_v6 }
 0x3d9   : > { %v2352_v35 = vpack.c.b16 %v3042_v16, %v3042_v16 }
 0x3da   : > { %v2586_v9 = vadd.f32 %v4579_v42, %v2585_v53  ;;  %v1591_v42 = vperm.slane %v4562_v38, 4  ;;  %v3095_v53 = vld [vmem:[%s3475_s21 + $0x10] sm:$0xff] }
 0x3db   : > { %v2353_v11 = vpack.c.b8 %v2352_v35, %v2352_v35  ;;  %v1595_v35 = vperm.slane %v4606_v27, 0  ;;  %v2424_v5 = vsub.f32 %v4352_v3, %v3095_v53 }
 0x3dc   : > { %v4748_v40 = vld [vmem:[#allocation1] sm:$0xff] }
 0x3dd   : > { %1858 = vst [vmem:[#allocation1] ss:$9 sm:$0xff] %v1579_v31  ;;  %v2587_v31 = vadd.f32 %v4625_v23, %v2586_v9  ;;  %v4808_v16 = vpop.f32.mrf.mxu1  ;;  %v1596_v9 = vperm.slane %v4606_v27, 1 }
 0x3de   : > { %1859 = vst [vmem:[#allocation1 + $0x1] ss:$9 sm:$0xff] %v1580_v48  ;;  %v1588_v48 = vperm.slane %v4562_v38, 1 }
 0x3df   : > { %1860 = vst [vmem:[#allocation1 + $0x2] ss:$9 sm:$0xff] %v1581_v50  ;;  %v2588_v15 = vadd.f32 %v4660_v55, %v2587_v31  ;;  %v1239_v55 = vcvt.f32.s32 %v4503_v12 }
 0x3e0   : > { %1861 = vst [vmem:[#allocation1 + $0x3] ss:$9 sm:$0xff] %v1582_v39  ;;  %v1223_v39 = vpop.xlane.xlu1 %1222 }
 0x3e1   : > { %1862 = vst [vmem:[#allocation1 + $0x4] ss:$9 sm:$0xff] %v1583_v8  ;;  %v1224_v8 = vcvt.f32.s32 %v1223_v39  ;;  %v1240_v52 = vshll.u32 %v1239_v55, 16  ;;  %v1598_v39 = vperm.slane %v4606_v27, 3  ;;  %v1601_v55 = vperm.slane %v4606_v27, 6 }
 0x3e2   : > { %1863 = vst [vmem:[#allocation1 + $0x5] ss:$9 sm:$0xff] %v1584_v26  ;;  %v2589_v26 = vadd.f32 %v2880_v0, %v2588_v15  ;;  %v1599_v15 = vperm.slane %v4606_v27, 4 }
 0x3e3   : > { %1864 = vst [vmem:[#allocation1 + $0x6] ss:$9 sm:$0xff] %v1585_v25  ;;  %v4786_v23 = vadd.s32 %v1226_v61, %v1224_v8  ;;  %v1594_v25 = vperm.slane %v4562_v38, 7  ;;  %v3096_v61 = vld [vmem:[%s3475_s21] sm:$0xff] }
 0x3e4   : > { %1865 = vst [vmem:[#allocation1 + $0x7] ss:$9 sm:$0xff] %v1586_v62  ;;  %v1237_v62 = vpop.xlane.xlu2 %1236  ;;  %v2422_v3 = vsub.f32 %v4766_v51, %v3096_v61 }
 0x3e5   : > { %2387 = vst [vmem:[%s4078_s13 + $0x3a] sm:$0x3] %v2353_v11  ;;  %vm1272_vm5 = vcmp.eq.s32.totalorder %v3689_v37, %v4786_v23  ;;  %v1238_v54 = vcvt.f32.s32 %v1237_v62  ;;  %v1358_v62 = vpop.f32.mrf.mxu0 }
 0x3e6   : > { %v2881_v0 = vsel %vm1272_vm5, 1.0, %v5259_v24  ;;  %2913 = vmatmul.msk.f32.gmra.mxu3 %vm1272_vm5, %v5261_v47  ;;  %2406 = vst.msk [vmem:[%s4350_s16 + $0x80] sm:$0xff] %vm371_vm0, %v4808_v16  ;;  %vm2157_vm5 = vcmask 1048512  }
 0x3e7   : > { %v2228_v12 = vmax.f32 %v2881_v0, -128.0  ;;  %v4803_v60 = vadd.s32 %v1240_v52, %v1238_v54  ;;  %v4834_v52 = vadd.s32 4294967280, %v3689_v37  ;;  %2391 = vst.msk [vmem:[%s4350_s16 + $0x8] sm:$0xff] %vm371_vm0, %v1358_v62 }
 0x3e9   : > { %v2260_v38 = vmin.f32 %v2228_v12, 127.0  ;;  %vm1273_vm6 = vcmp.eq.s32.totalorder %v3689_v37, %v4803_v60 }
 0x3eb   : > { %v1866_v50 = vld [vmem:[#allocation1] sm:$0xff]  ;;  %v3044_v2 = vcvt.f32.s32 %v2260_v38  ;;  %v3098_v38 = vld [vmem:[%s3475_s21 + $0x8] sm:$0xff] }
 0x3ec   : > { %1867 = vst [vmem:[#allocation1] ss:$9 sm:$0xff] %v1587_v1  ;;  %2051 = vperm.xlu0 %3091, %v1866_v50   ;;  %v1597_v1 = vperm.slane %v4606_v27, 2  ;;  %v4820_v50 = vpop.permute.xlu2 %2009 }
 0x3ed   : > { %1868 = vst [vmem:[#allocation1 + $0x1] ss:$9 sm:$0xff] %v1588_v48  ;;  %v2354_v31 = vpack.c.b16 %v3044_v2, %v3044_v2  ;;  %v2590_v48 = vadd.f32 %v2881_v0, %v2589_v26  ;;  %v3097_v26 = vld [vmem:[%s3475_s21 + $0x18] sm:$0xff]  ;;  %v2454_v0 = vmul.f32 %v2422_v3, %v2422_v3  ;;  %v2423_v2 = vsub.f32 %v1358_v62, %v3098_v38  ;;  %v2007_v3 = vpop.permute.xlu1 %2006 }
 0x3ee   : > { %1869 = vst [vmem:[#allocation1 + $0x2] ss:$9 sm:$0xff] %v1589_v29  ;;  %v2882_v29 = vsel %vm1273_vm6, 1.0, %v5259_v24  ;;  %2914 = vmatmul.msk.f32.gmra.mxu3 %vm1273_vm6, %v5261_v47  ;;  %v1602_v47 = vperm.slane %v4606_v27, 7  ;;  %v3102_v38 = vld [vmem:[%s3475_s21 + $0x38] sm:$0xff]  ;;  %vm2191_vm6 = vcmask 1040384  }
 0x3ef   : > { %1870 = vst [vmem:[#allocation1 + $0x3] ss:$9 sm:$0xff] %v1590_v33  ;;  %v2229_v8 = vmax.f32 %v2882_v29, -128.0  ;;  %v2591_v33 = vadd.f32 %v2882_v29, %v2590_v48  ;;  %v2355_v51 = vpack.c.b8 %v2354_v31, %v2354_v31  ;;  %v2486_v29 = vsel %vm371_vm0, %v2454_v0, 0.0 }
 0x3f0   : > { %1871 = vst [vmem:[#allocation1 + $0x4] ss:$9 sm:$0xff] %v1591_v42  ;;  %v2456_v42 = vmul.f32 %v2424_v5, %v2424_v5  ;;  %v4842_v5 = vadd.s32 4294967288, %v3689_v37 }
 0x3f1   : > { %1872 = vst [vmem:[#allocation1 + $0x5] ss:$9 sm:$0xff] %v1592_v44  ;;  %v2425_v44 = vsub.f32 %v4389_v57, %v3097_v26  ;;  %v2261_v24 = vmin.f32 %v2229_v8, 127.0  ;;  %v2004_v57 = vpop.permute.xlu0 %2003 }
 0x3f2   : > { %1873 = vst [vmem:[#allocation1 + $0x6] ss:$9 sm:$0xff] %v1593_v21  ;;  %v1600_v21 = vperm.slane %v4606_v27, 5  ;;  %v4839_v27 = vadd.s32 4294967272, %v3689_v37 }
 0x3f3   : > { %1874 = vst [vmem:[#allocation1 + $0x7] ss:$9 sm:$0xff] %v1594_v25  ;;  %v2592_v25 = vrot.slane %v2591_v33, 4  ;;  %v3046_v12 = vcvt.f32.s32 %v2261_v24  ;;  %v2457_v53 = vmul.f32 %v2425_v44, %v2425_v44 }
 0x3f4   : > { %2388 = vst [vmem:[%s4078_s13 + $0x3c] sm:$0x3] %v2355_v51  ;;  %v2013_v61 = vpop.permute.xlu2 %2012  ;;  %v3101_v51 = vld [vmem:[%s3475_s21 + $0x30] sm:$0xff] }
 0x3f5   : > { %v2593_v54 = vadd.f32 %v2592_v25, %v2591_v33  ;;  %v2356_v48 = vpack.c.b16 %v3046_v12, %v3046_v12  ;;  %v2100_v33 = vperm.slane %v2007_v3, %v4842_v5  ;;  %v2108_v44 = vperm.slane %v2013_v61, %v4839_v27 }
 0x3f6   : > { %v2428_v24 = vsub.f32 %v4443_v36, %v3101_v51  ;;  %v1604_v36 = vperm.slane %v4613_v56, 1  ;;  %v1610_v51 = vperm.slane %v4613_v56, 7 }
 0x3f7   : > { %v2594_v8 = vrot.slane %v2593_v54, 2 }
 0x3fa   : > { %v1875_v11 = vld [vmem:[#allocation1] sm:$0xff] }
 0x3fb   : > { %1876 = vst [vmem:[#allocation1] ss:$9 sm:$0xff] %v1595_v35  ;;  %2054 = vperm.xlu2 %3093, %v1875_v11   ;;  %v2489_v35 = vsel %vm371_vm0, %v2456_v42, 0.0  ;;  %v3099_v11 = vld [vmem:[%s3475_s21 + $0x20] sm:$0xff] }
 0x3fc   : > { %1877 = vst [vmem:[#allocation1 + $0x1] ss:$9 sm:$0xff] %v1596_v9  ;;  %v2426_v9 = vsub.f32 %v4400_v49, %v3099_v11  ;;  %v2357_v49 = vpack.c.b8 %v2356_v48, %v2356_v48  ;;  %v1607_v48 = vperm.slane %v4613_v56, 4 }
 0x3fd   : > { %1878 = vst [vmem:[#allocation1 + $0x2] ss:$9 sm:$0xff] %v1597_v1  ;;  %v3100_v1 = vld [vmem:[%s3475_s21 + $0x28] sm:$0xff] }
 0x3fe   : > { %1879 = vst [vmem:[#allocation1 + $0x3] ss:$9 sm:$0xff] %v1598_v39  ;;  %v2427_v31 = vsub.f32 %v4417_v59, %v3100_v1  ;;  %v2455_v39 = vmul.f32 %v2423_v2, %v2423_v2  ;;  %v2104_v59 = vperm.slane %v4820_v50, %v4834_v52  ;;  %v1603_v50 = vperm.slane %v4613_v56, 0 }
 0x3ff   : > { %1880 = vst [vmem:[#allocation1 + $0x4] ss:$9 sm:$0xff] %v1599_v15  ;;  %v2098_v15 = vperm.slane %v2004_v57, %v3689_v37  ;;  %v2491_v57 = vsel %vm371_vm0, %v2457_v53, 0.0  ;;  %v2429_v2 = vsub.f32 %v4507_v19, %v3102_v38  ;;  %v2460_v1 = vmul.f32 %v2428_v24, %v2428_v24  ;;  %v3103_v53 = vld [vmem:[%s3475_s21 + $0x40] sm:$0xff] }
 0x400   : > { %1881 = vst [vmem:[#allocation1 + $0x5] ss:$9 sm:$0xff] %v1600_v21  ;;  %v2487_v42 = vsel %vm371_vm0, %v2455_v39, 0.0  ;;  %v2459_v12 = vmul.f32 %v2427_v31, %v2427_v31  ;;  %v2430_v31 = vsub.f32 %v4532_v46, %v3103_v53  ;;  %v1606_v19 = vperm.slane %v4613_v56, 3 }
 0x401   : > { %1882 = vst [vmem:[#allocation1 + $0x6] ss:$9 sm:$0xff] %v1601_v55  ;;  %v2488_v26 = vadd.f32 %v2487_v42, %v2486_v29  ;;  %v2102_v21 = vsel %vm2101_vm7, %v2100_v33, %v2098_v15  ;;  %v2458_v55 = vmul.f32 %v2426_v9, %v2426_v9  ;;  %v1605_v9 = vperm.slane %v4613_v56, 2  ;;  %v3104_v15 = vld [vmem:[%s3475_s21 + $0x48] sm:$0xff]  ;;  %v3106_v42 = vld [vmem:[%s3475_s21 + $0x58] sm:$0xff] }
 0x402   : > { %1883 = vst [vmem:[#allocation1 + $0x7] ss:$9 sm:$0xff] %v1602_v47  ;;  %v2106_v25 = vsel %vm2105_vm8, %v2104_v59, %v2102_v21  ;;  %v2595_v47 = vadd.f32 %v2594_v8, %v2593_v54  ;;  %v2495_v3 = vsel %vm371_vm0, %v2459_v12, 0.0  ;;  %v2461_v29 = vmul.f32 %v2429_v2, %v2429_v2  ;;  %v4892_v21 = vpop.f32.mrf.mxu3  ;;  %v3107_v12 = vld [vmem:[%s3475_s21 + $0x60] sm:$0xff]  ;;  %v3108_v2 = vld [vmem:[%s3475_s21 + $0x68] sm:$0xff] }
 0x403   : > { %2389 = vst [vmem:[%s4078_s13 + $0x3e] sm:$0x3] %v2357_v49  ;;  %v2490_v0 = vadd.f32 %v2489_v35, %v2488_v26  ;;  %v4865_v62 = vsel %vm2109_vm9, %v2108_v44, %v2106_v25  ;;  %v2493_v35 = vsel %vm371_vm0, %v2458_v55, 0.0  ;;  %v2431_v8 = vsub.f32 %v4566_v34, %v3104_v15  ;;  %v3105_v49 = vld [vmem:[%s3475_s21 + $0x50] sm:$0xff]  ;;  %v4896_v25 = vpop.f32.mrf.mxu1 }
 0x404   : > { %v2596_v39 = vrot.slane %v2595_v47, 1  ;;  %v1608_v33 = vperm.slane %v4613_v56, 5  ;;  %v1609_v46 = vperm.slane %v4613_v56, 6  ;;  %v2432_v59 = vsub.f32 %v4629_v22, %v3105_v49  ;;  %2415 = vst.msk [vmem:[%s4350_s16 + $0xc8] sm:$0xff] %vm371_vm0, %v4892_v21 }
 0x405   : > { %v2492_v54 = vadd.f32 %v2491_v57, %v2490_v0  ;;  %v2433_v26 = vsub.f32 %v4655_v32, %v3106_v42  ;;  %v2497_v34 = vsel %vm371_vm0, %v2460_v1, 0.0  ;;  %v2462_v55 = vmul.f32 %v2430_v31, %v2430_v31  ;;  %2407 = vst.msk [vmem:[%s4350_s16 + $0x88] sm:$0xff] %vm371_vm0, %v4896_v25 }
 0x406   : > { %v2597_v24 = vadd.f32 %v2596_v39, %v2595_v47  ;;  %v2499_v32 = vsel %vm371_vm0, %v2461_v29, 0.0  ;;  %v2464_v0 = vmul.f32 %v2432_v59, %v2432_v59  ;;  %v2434_v56 = vsub.f32 %v4674_v45, %v3107_v12 }
 0x407   : > { %v2494_v61 = vadd.f32 %v2493_v35, %v2492_v54  ;;  %v2465_v57 = vmul.f32 %v2433_v26, %v2433_v26  ;;  %v2501_v47 = vsel %vm371_vm0, %v2462_v55, 0.0  ;;  %v2019_v54 = vpop.permute.xlu2 %2018  ;;  %v4919_v35 = vadd.s32 4294967264, %v3689_v37  ;;  %v3110_v26 = vld [vmem:[%s3475_s21 + $0x78] sm:$0xff] }
 0x408   : > { %2598 = vst [vmem:[%s321_s20] sm:$0x1] %v2597_v24  ;;  %v2505_v1 = vsel %vm371_vm0, %v2464_v0, 0.0  ;;  %v2466_v53 = vmul.f32 %v2434_v56, %v2434_v56  ;;  %v1613_v42 = vperm.slane %v4727_v4, 2  ;;  %v1617_v12 = vperm.slane %v4727_v4, 6 }
 0x409   : > { %v1884_v11 = vld [vmem:[#allocation1] sm:$0xff]  ;;  %v2496_v44 = vadd.f32 %v2495_v3, %v2494_v61  ;;  %v1611_v61 = vperm.slane %v4727_v4, 0  ;;  %v3109_v3 = vld [vmem:[%s3475_s21 + $0x70] sm:$0xff] }
 0x40a   : > { %1885 = vst [vmem:[#allocation1] ss:$9 sm:$0xff] %v1603_v50  ;;  %2057 = vperm.xlu0 %3091, %v1884_v11   ;;  %v2463_v50 = vmul.f32 %v2431_v8, %v2431_v8  ;;  %v2435_v11 = vsub.f32 %v4682_v63, %v3108_v2  ;;  %v2507_v63 = vsel %vm371_vm0, %v2465_v57, 0.0  ;;  %v2436_v29 = vsub.f32 %v4734_v14, %v3109_v3 }
 0x40b   : > { %1886 = vst [vmem:[#allocation1 + $0x1] ss:$9 sm:$0xff] %v1604_v36  ;;  %v2498_v22 = vadd.f32 %v2497_v34, %v2496_v44  ;;  %v1409_v59 = vpop.f32.mrf.mxu1  ;;  %v2437_v14 = vsub.f32 %v4790_v43, %v3110_v26  ;;  %v1614_v34 = vperm.slane %v4727_v4, 3  ;;  %v2509_v24 = vsel %vm371_vm0, %v2466_v53, 0.0  ;;  %v3111_v43 = vld [vmem:[%s3475_s21 + $0x80] sm:$0xff] }
 0x40c   : > { %1887 = vst [vmem:[#allocation1 + $0x2] ss:$9 sm:$0xff] %v1605_v9  ;;  %v4915_v9 = vadd.s32 4294967256, %v3689_v37  ;;  %v2503_v45 = vsel %vm371_vm0, %v2463_v50, 0.0  ;;  %v2467_v39 = vmul.f32 %v2435_v11, %v2435_v11  ;;  %v2438_v50 = vsub.f32 %v4808_v16, %v3111_v43 }
 0x40d   : > { %1888 = vst [vmem:[#allocation1 + $0x3] ss:$9 sm:$0xff] %v1606_v19  ;;  %v2500_v38 = vadd.f32 %v2499_v32, %v2498_v22  ;;  %v4923_v19 = vpop.f32.mrf.mxu3  ;;  %v1615_v22 = vperm.slane %v4727_v4, 4  ;;  %v2468_v32 = vmul.f32 %v2436_v29, %v2436_v29  ;;  %v2469_v56 = vmul.f32 %v2437_v14, %v2437_v14 }
 0x40e   : > { %1889 = vst [vmem:[#allocation1 + $0x4] ss:$9 sm:$0xff] %v1607_v48  ;;  %v2016_v48 = vpop.permute.xlu1 %2015  ;;  %v2511_v57 = vsel %vm371_vm0, %v2467_v39, 0.0  ;;  %v1618_v2 = vperm.slane %v4727_v4, 7  ;;  %v1619_v29 = vperm.slane %v4271_v41, 0  ;;  %v1622_v26 = vperm.slane %v4271_v41, 3 }
 0x40f   : > { %1890 = vst [vmem:[#allocation1 + $0x5] ss:$9 sm:$0xff] %v1608_v33  ;;  %v2502_v36 = vadd.f32 %v2501_v47, %v2500_v38  ;;  %v2112_v15 = vperm.slane %v2016_v48, %v4919_v35  ;;  %v1612_v33 = vperm.slane %v4727_v4, 1  ;;  %v3112_v38 = vld [vmem:[%s3475_s21 + $0x88] sm:$0xff]  ;;  %v2513_v11 = vsel %vm371_vm0, %v2468_v32, 0.0  ;;  %v2028_v43 = vpop.permute.xlu2 %2027 }
 0x410   : > { %1891 = vst [vmem:[#allocation1 + $0x6] ss:$9 sm:$0xff] %v1609_v46  ;;  %v2116_v46 = vperm.slane %v2019_v54, %v4915_v9  ;;  %v2439_v47 = vsub.f32 %v4896_v25, %v3112_v38  ;;  %v2515_v25 = vsel %vm371_vm0, %v2469_v56, 0.0  ;;  %v1626_v32 = vperm.slane %v4271_v41, 7 }
 0x411   : > { %1892 = vst [vmem:[#allocation1 + $0x7] ss:$9 sm:$0xff] %v1610_v51  ;;  %v2504_v31 = vadd.f32 %v2503_v45, %v2502_v36  ;;  %v2114_v44 = vsel %vm2113_vm10, %v2112_v15, %v4865_v62  ;;  %v1616_v62 = vperm.slane %v4727_v4, 5  ;;  %v2470_v36 = vmul.f32 %v2438_v50, %v2438_v50  ;;  %v3113_v45 = vld [vmem:[%s3475_s21 + $0x90] sm:$0xff] }
 0x412   : > { %2416 = vst.msk [vmem:[%s4350_s16 + $0xd0] sm:$0xff] %vm371_vm0, %v4923_v19  ;;  %v4941_v51 = vsel %vm2117_vm11, %v2116_v46, %v2114_v44  ;;  %v2440_v54 = vsub.f32 %v1409_v59, %v3113_v45  ;;  %v1623_v44 = vperm.slane %v4271_v41, 4  ;;  %v4989_v50 = vadd.s32 4294967240, %v3689_v37 }
 0x413   : > { %v2506_v49 = vadd.f32 %v2505_v1, %v2504_v31  ;;  %v4957_v53 = vpop.f32.mrf.mxu1  ;;  %v2471_v31 = vmul.f32 %v2439_v47, %v2439_v47  ;;  %2408 = vst.msk [vmem:[%s4350_s16 + $0x90] sm:$0xff] %vm371_vm0, %v1409_v59  ;;  %v2517_v48 = vsel %vm371_vm0, %v2470_v36, 0.0  ;;  %v5278_v47 = vld [vmem:[#allocation14_spill] sm:$0xff] }
 0x414   : > { %v2472_v39 = vmul.f32 %v2440_v54, %v2440_v54  ;;  %2409 = vst.msk [vmem:[%s4350_s16 + $0x98] sm:$0xff] %vm371_vm0, %v4957_v53  ;;  %v1629_v36 = vperm.slane %v5278_v47, 2  ;;  %v1631_v45 = vperm.slane %v5278_v47, 4  ;;  %v1632_v54 = vperm.slane %v5278_v47, 5 }
 0x415   : > { %v2508_v55 = vadd.f32 %v2507_v63, %v2506_v49  ;;  %v4955_v1 = vpop.f32.mrf.mxu3  ;;  %v2519_v3 = vsel %vm371_vm0, %v2471_v31, 0.0  ;;  %v1621_v49 = vperm.slane %v4271_v41, 2  ;;  %v5279_v31 = vld [vmem:[#allocation13_spill] sm:$0xff] }
 0x416   : > { %2417 = vst.msk [vmem:[%s4350_s16 + $0xd8] sm:$0xff] %vm371_vm0, %v4955_v1  ;;  %v2521_v46 = vsel %vm371_vm0, %v2472_v39, 0.0  ;;  %v2022_v14 = vpop.permute.xlu1 %2021 }
 0x417   : > { %v2510_v0 = vadd.f32 %v2509_v24, %v2508_v55  ;;  %v1625_v55 = vperm.slane %v4271_v41, 6  ;;  %v4984_v24 = vadd.s32 4294967232, %v3689_v37 }
 0x418   : > { %v1893_v8 = vld [vmem:[#allocation1] sm:$0xff] }
 0x419   : > { %1894 = vst [vmem:[#allocation1] ss:$9 sm:$0xff] %v1611_v61  ;;  %2060 = vperm.xlu2 %3093, %v1893_v8   ;;  %v2512_v16 = vadd.f32 %v2511_v57, %v2510_v0  ;;  %v1620_v8 = vperm.slane %v4271_v41, 1 }
 0x41a   : > { %1895 = vst [vmem:[#allocation1 + $0x1] ss:$9 sm:$0xff] %v1612_v33 }
 0x41b   : > { %1896 = vst [vmem:[#allocation1 + $0x2] ss:$9 sm:$0xff] %v1613_v42  ;;  %v2514_v63 = vadd.f32 %v2513_v11, %v2512_v16  ;;  %v4977_v42 = vadd.s32 4294967248, %v3689_v37  ;;  %v1628_v16 = vperm.slane %v5278_v47, 1 }
 0x41c   : > { %1897 = vst [vmem:[#allocation1 + $0x3] ss:$9 sm:$0xff] %v1614_v34  ;;  %v1624_v34 = vperm.slane %v4271_v41, 5 }
 0x41d   : > { %1898 = vst [vmem:[#allocation1 + $0x4] ss:$9 sm:$0xff] %v1615_v22  ;;  %v2516_v4 = vadd.f32 %v2515_v25, %v2514_v63  ;;  %v2120_v22 = vperm.slane %v2022_v14, %v4977_v42  ;;  %v4991_v0 = vpop.f32.mrf.mxu3  ;;  %v1633_v63 = vperm.slane %v5278_v47, 6  ;;  %v1634_v25 = vperm.slane %v5278_v47, 7 }
 0x41e   : > { %1899 = vst [vmem:[#allocation1 + $0x5] ss:$9 sm:$0xff] %v1616_v62  ;;  %v2025_v62 = vpop.permute.xlu0 %2024  ;;  %v5023_v14 = vadd.s32 4294967216, %v3689_v37 }
 0x41f   : > { %1900 = vst [vmem:[#allocation1 + $0x6] ss:$9 sm:$0xff] %v1617_v12  ;;  %v2518_v61 = vadd.f32 %v2517_v48, %v2516_v4  ;;  %v2124_v57 = vperm.slane %v2025_v62, %v4989_v50  ;;  %v2128_v12 = vperm.slane %v2028_v43, %v4984_v24  ;;  %v2122_v56 = vsel %vm2121_vm12, %v2120_v22, %v4941_v51 }
 0x420   : > { %1901 = vst [vmem:[#allocation1 + $0x7] ss:$9 sm:$0xff] %v1618_v2  ;;  %v1627_v2 = vperm.slane %v5278_v47, 0  ;;  %v1630_v51 = vperm.slane %v5278_v47, 3  ;;  %v1635_v4 = vperm.slane %v5279_v31, 0  ;;  %v1636_v48 = vperm.slane %v5279_v31, 1 }
 0x421   : > { %v2520_v15 = vadd.f32 %v2519_v3, %v2518_v61  ;;  %2418 = vst.msk [vmem:[%s4350_s16 + $0xe0] sm:$0xff] %vm371_vm0, %v4991_v0  ;;  %v2126_v41 = vsel %vm2125_vm13, %v2124_v57, %v2122_v56  ;;  %v1637_v61 = vperm.slane %v5279_v31, 2  ;;  %v5014_v3 = vadd.s32 4294967224, %v3689_v37 }
 0x422   : > { %v2130_v38 = vsel %vm2129_vm14, %v2128_v12, %v2126_v41 }
 0x423   : > { %v4974_v59 = vadd.f32 %v2521_v46, %v2520_v15  ;;  %v2031_v15 = vpop.permute.xlu1 %2030  ;;  %v1641_v46 = vperm.slane %v5279_v31, 6 }
 0x427   : > { %v1902_v33 = vld [vmem:[#allocation1] sm:$0xff] }
 0x428   : > { %1903 = vst [vmem:[#allocation1] ss:$9 sm:$0xff] %v1619_v29  ;;  %2063 = vperm.xlu0 %3091, %v1902_v33   ;;  %v1638_v29 = vperm.slane %v5279_v31, 3  ;;  %v1640_v33 = vperm.slane %v5279_v31, 5 }
 0x429   : > { %1904 = vst [vmem:[#allocation1 + $0x1] ss:$9 sm:$0xff] %v1620_v8  ;;  %v1639_v8 = vperm.slane %v5279_v31, 4 }
 0x42a   : > { %1905 = vst [vmem:[#allocation1 + $0x2] ss:$9 sm:$0xff] %v1621_v49  ;;  %v2132_v49 = vperm.slane %v2031_v15, %v5014_v3  ;;  %v3116_v15 = vld [vmem:[%s3475_s21 + $0xb0] sm:$0xff] }
 0x42b   : > { %1906 = vst [vmem:[#allocation1 + $0x3] ss:$9 sm:$0xff] %v1622_v26  ;;  %v1642_v26 = vperm.slane %v5279_v31, 7  ;;  %v1656_v31 = vperm.slane %v4527_v20, 5 }
 0x42c   : > { %1907 = vst [vmem:[#allocation1 + $0x4] ss:$9 sm:$0xff] %v1623_v44  ;;  %v2034_v44 = vpop.permute.xlu0 %2033 }
 0x42d   : > { %1908 = vst [vmem:[#allocation1 + $0x5] ss:$9 sm:$0xff] %v1624_v34  ;;  %v2136_v34 = vperm.slane %v2034_v44, %v5023_v14 }
 0x42e   : > { %1909 = vst [vmem:[#allocation1 + $0x6] ss:$9 sm:$0xff] %v1625_v55  ;;  %v2134_v55 = vsel %vm2133_vm15, %v2132_v49, %v2130_v38 }
 0x42f   : > { %1910 = vst [vmem:[#allocation1 + $0x7] ss:$9 sm:$0xff] %v1626_v32  ;;  %v5028_v22 = vsel %vm2137_vm1, %v2136_v34, %v2134_v55  ;;  %v5280_v32 = vld [vmem:[#allocation15_spill] sm:$0xff] }
 0x430   : > { %v1643_v43 = vperm.slane %v5280_v32, 0  ;;  %v1644_v62 = vperm.slane %v5280_v32, 1  ;;  %v1645_v12 = vperm.slane %v5280_v32, 2  ;;  %v1646_v56 = vperm.slane %v5280_v32, 3 }
 0x431   : > { %v1647_v41 = vperm.slane %v5280_v32, 4  ;;  %v1648_v38 = vperm.slane %v5280_v32, 5  ;;  %v1649_v47 = vperm.slane %v5280_v32, 6 }
 0x436   : > { %v1911_v11 = vld [vmem:[#allocation1] sm:$0xff] }
 0x437   : > { %1912 = vst [vmem:[#allocation1] ss:$9 sm:$0xff] %v1627_v2  ;;  %2066 = vperm.xlu2 %3093, %v1911_v11   ;;  %v1650_v2 = vperm.slane %v5280_v32, 7  ;;  %v1652_v11 = vperm.slane %v4527_v20, 1  ;;  %v3119_v32 = vld [vmem:[%s3475_s21 + $0xc0] sm:$0xff] }
 0x438   : > { %1913 = vst [vmem:[#allocation1 + $0x1] ss:$9 sm:$0xff] %v1628_v16  ;;  %v1651_v16 = vperm.slane %v4527_v20, 0 }
 0x439   : > { %1914 = vst [vmem:[#allocation1 + $0x2] ss:$9 sm:$0xff] %v1629_v36 }
 0x43a   : > { %1915 = vst [vmem:[#allocation1 + $0x3] ss:$9 sm:$0xff] %v1630_v51  ;;  %v1653_v51 = vperm.slane %v4527_v20, 2 }
 0x43b   : > { %1916 = vst [vmem:[#allocation1 + $0x4] ss:$9 sm:$0xff] %v1631_v45  ;;  %v3114_v45 = vld [vmem:[%s3475_s21 + $0x98] sm:$0xff] }
 0x43c   : > { %1917 = vst [vmem:[#allocation1 + $0x5] ss:$9 sm:$0xff] %v1632_v54  ;;  %v2441_v54 = vsub.f32 %v4957_v53, %v3114_v45 }
 0x43d   : > { %1918 = vst [vmem:[#allocation1 + $0x6] ss:$9 sm:$0xff] %v1633_v63  ;;  %v1654_v63 = vperm.slane %v4527_v20, 3 }
 0x43e   : > { %1919 = vst [vmem:[#allocation1 + $0x7] ss:$9 sm:$0xff] %v1634_v25  ;;  %v1655_v25 = vperm.slane %v4527_v20, 4  ;;  %v2473_v53 = vmul.f32 %v2441_v54, %v2441_v54 }
 0x440   : > { %v2523_v44 = vsel %vm371_vm0, %v2473_v53, 0.0  ;;  %v1665_v53 = vperm.slane %v4560_v30, 6 }
 0x441   : > { %v2524_v34 = vadd.f32 %v2523_v44, %v4974_v59  ;;  %v1668_v44 = vperm.slane %v4609_v58, 1 }
 0x445   : > { %v1920_v39 = vld [vmem:[#allocation1] sm:$0xff] }
 0x446   : > { %1921 = vst [vmem:[#allocation1] ss:$9 sm:$0xff] %v1635_v4  ;;  %2069 = vperm.xlu0 %3091, %v1920_v39   ;;  %v1657_v4 = vperm.slane %v4527_v20, 6 }
 0x447   : > { %1922 = vst [vmem:[#allocation1 + $0x1] ss:$9 sm:$0xff] %v1636_v48  ;;  %v3115_v48 = vld [vmem:[%s3475_s21 + $0xa8] sm:$0xff] }
 0x448   : > { %1923 = vst [vmem:[#allocation1 + $0x2] ss:$9 sm:$0xff] %v1637_v61  ;;  %v2443_v39 = vsub.f32 %v4657_v7, %v3115_v48  ;;  %v1658_v61 = vperm.slane %v4527_v20, 7 }
 0x449   : > { %1924 = vst [vmem:[#allocation1 + $0x3] ss:$9 sm:$0xff] %v1638_v29  ;;  %v1415_v29 = vpop.f32.mrf.mxu1 }
 0x44a   : > { %1925 = vst [vmem:[#allocation1 + $0x4] ss:$9 sm:$0xff] %v1639_v8  ;;  %v2444_v8 = vsub.f32 %v4729_v17, %v3116_v15  ;;  %v2475_v49 = vmul.f32 %v2443_v39, %v2443_v39  ;;  %v2446_v17 = vsub.f32 %v4801_v6, %v3119_v32  ;;  %v1671_v32 = vperm.slane %v4609_v58, 4 }
 0x44b   : > { %1926 = vst [vmem:[#allocation1 + $0x5] ss:$9 sm:$0xff] %v1640_v33  ;;  %v3117_v33 = vld [vmem:[%s3475_s21 + $0xa0] sm:$0xff] }
 0x44c   : > { %1927 = vst [vmem:[#allocation1 + $0x6] ss:$9 sm:$0xff] %v1641_v46  ;;  %v2442_v46 = vsub.f32 %v1415_v29, %v3117_v33  ;;  %v2476_v55 = vmul.f32 %v2444_v8, %v2444_v8  ;;  %v5081_v8 = vpop.f32.mrf.mxu3 }
 0x44d   : > { %1928 = vst [vmem:[#allocation1 + $0x7] ss:$9 sm:$0xff] %v1642_v26  ;;  %v3118_v26 = vld [vmem:[%s3475_s21 + $0xb8] sm:$0xff] }
 0x44e   : > { %v2445_v7 = vsub.f32 %v4763_v10, %v3118_v26  ;;  %2410 = vst.msk [vmem:[%s4350_s16 + $0xa0] sm:$0xff] %vm371_vm0, %v1415_v29  ;;  %v2474_v20 = vmul.f32 %v2442_v46, %v2442_v46  ;;  %v2529_v59 = vsel %vm371_vm0, %v2476_v55, 0.0  ;;  %v1666_v29 = vperm.slane %v4560_v30, 7 }
 0x44f   : > { %2419 = vst.msk [vmem:[%s4350_s16 + $0xe8] sm:$0xff] %vm371_vm0, %v5081_v8  ;;  %v1670_v55 = vperm.slane %v4609_v58, 3 }
 0x454   : > { %v1929_v57 = vld [vmem:[#allocation1] sm:$0xff] }
 0x455   : > { %1930 = vst [vmem:[#allocation1] ss:$9 sm:$0xff] %v1643_v43  ;;  %2072 = vperm.xlu2 %3093, %v1929_v57   ;;  %v2525_v43 = vsel %vm371_vm0, %v2474_v20, 0.0  ;;  %v2527_v57 = vsel %vm371_vm0, %v2475_v49, 0.0 }
 0x456   : > { %1931 = vst [vmem:[#allocation1 + $0x1] ss:$9 sm:$0xff] %v1644_v62  ;;  %v2526_v62 = vadd.f32 %v2525_v43, %v2524_v34  ;;  %v1669_v34 = vperm.slane %v4609_v58, 2  ;;  %v1673_v43 = vperm.slane %v4609_v58, 6 }
 0x457   : > { %1932 = vst [vmem:[#allocation1 + $0x2] ss:$9 sm:$0xff] %v1645_v12  ;;  %v2477_v12 = vmul.f32 %v2445_v7, %v2445_v7 }
 0x458   : > { %1933 = vst [vmem:[#allocation1 + $0x3] ss:$9 sm:$0xff] %v1646_v56  ;;  %v3120_v56 = vld [vmem:[%s3475_s21 + $0xc8] sm:$0xff] }
 0x459   : > { %1934 = vst [vmem:[#allocation1 + $0x4] ss:$9 sm:$0xff] %v1647_v41  ;;  %v2447_v10 = vsub.f32 %v4892_v21, %v3120_v56  ;;  %v1659_v41 = vperm.slane %v4560_v30, 0  ;;  %v1662_v21 = vperm.slane %v4560_v30, 3  ;;  %v2531_v45 = vsel %vm371_vm0, %v2477_v12, 0.0 }
 0x45a   : > { %1935 = vst [vmem:[#allocation1 + $0x5] ss:$9 sm:$0xff] %v1648_v38  ;;  %v2528_v38 = vadd.f32 %v2527_v57, %v2526_v62  ;;  %v1674_v62 = vperm.slane %v4609_v58, 7  ;;  %v1675_v57 = vperm.slane %v4648_v28, 0  ;;  %v1676_v12 = vperm.slane %v4648_v28, 1 }
 0x45b   : > { %1936 = vst [vmem:[#allocation1 + $0x6] ss:$9 sm:$0xff] %v1649_v47  ;;  %v1660_v47 = vperm.slane %v4560_v30, 1  ;;  %v2479_v54 = vmul.f32 %v2447_v10, %v2447_v10  ;;  %v1677_v10 = vperm.slane %v4648_v28, 2 }
 0x45c   : > { %1937 = vst [vmem:[#allocation1 + $0x7] ss:$9 sm:$0xff] %v1650_v2  ;;  %v2478_v2 = vmul.f32 %v2446_v17, %v2446_v17  ;;  %v1672_v17 = vperm.slane %v4609_v58, 5 }
 0x45e   : > { %v2533_v48 = vsel %vm371_vm0, %v2478_v2, 0.0  ;;  %v1683_v2 = vperm.slane %v4743_v13, 0 }
 0x463   : > { %v1938_v36 = vld [vmem:[#allocation1] sm:$0xff] }
 0x464   : > { %2075 = vperm.xlu0 %3091, %v1938_v36   ;;  %1939 = vst [vmem:[#allocation1] ss:$9 sm:$0xff] %v1651_v16  ;;  %v3121_v16 = vld [vmem:[%s3475_s21 + $0xd0] sm:$0xff]  ;;  %v1661_v36 = vperm.slane %v4560_v30, 2 }
 0x465   : > { %1940 = vst [vmem:[#allocation1 + $0x1] ss:$9 sm:$0xff] %v1652_v11  ;;  %v2448_v6 = vsub.f32 %v4923_v19, %v3121_v16  ;;  %v1664_v19 = vperm.slane %v4560_v30, 5  ;;  %v1684_v16 = vperm.slane %v4743_v13, 1 }
 0x466   : > { %1941 = vst [vmem:[#allocation1 + $0x2] ss:$9 sm:$0xff] %v1653_v51  ;;  %v2530_v51 = vadd.f32 %v2529_v59, %v2528_v38  ;;  %v1679_v38 = vperm.slane %v4648_v28, 4  ;;  %v1682_v59 = vperm.slane %v4648_v28, 7 }
 0x467   : > { %1942 = vst [vmem:[#allocation1 + $0x3] ss:$9 sm:$0xff] %v1654_v63  ;;  %v3122_v63 = vld [vmem:[%s3475_s21 + $0xd8] sm:$0xff]  ;;  %v2480_v39 = vmul.f32 %v2448_v6, %v2448_v6 }
 0x468   : > { %1943 = vst [vmem:[#allocation1 + $0x4] ss:$9 sm:$0xff] %v1655_v25  ;;  %v2449_v25 = vsub.f32 %v4955_v1, %v3122_v63  ;;  %v2535_v1 = vsel %vm371_vm0, %v2479_v54, 0.0  ;;  %v1689_v54 = vperm.slane %v4743_v13, 6  ;;  %v1690_v63 = vperm.slane %v4743_v13, 7 }
 0x469   : > { %1944 = vst [vmem:[#allocation1 + $0x5] ss:$9 sm:$0xff] %v1656_v31  ;;  %v1663_v31 = vperm.slane %v4560_v30, 4  ;;  %v2537_v46 = vsel %vm371_vm0, %v2480_v39, 0.0  ;;  %v1667_v30 = vperm.slane %v4609_v58, 0  ;;  %v1680_v58 = vperm.slane %v4648_v28, 5 }
 0x46a   : > { %1945 = vst [vmem:[#allocation1 + $0x6] ss:$9 sm:$0xff] %v1657_v4  ;;  %v2532_v4 = vadd.f32 %v2531_v45, %v2530_v51  ;;  %v2481_v15 = vmul.f32 %v2449_v25, %v2449_v25  ;;  %v1687_v51 = vperm.slane %v4743_v13, 4  ;;  %v1688_v45 = vperm.slane %v4743_v13, 5  ;;  %v1445_v25 = vpop.f32.mrf.mxu3 }
 0x46b   : > { %1946 = vst [vmem:[#allocation1 + $0x7] ss:$9 sm:$0xff] %v1658_v61 }
 0x46c   : > { %v2534_v61 = vadd.f32 %v2533_v48, %v2532_v4  ;;  %v2539_v26 = vsel %vm371_vm0, %v2481_v15, 0.0  ;;  %v3124_v4 = vld [vmem:[%s3475_s21 + $0xe8] sm:$0xff]  ;;  %2420 = vst.msk [vmem:[%s4350_s16 + $0xf0] sm:$0xff] %vm371_vm0, %v1445_v25  ;;  %v1692_v15 = vperm.slane %v4786_v23, 1 }
 0x46e   : > { %v2536_v33 = vadd.f32 %v2535_v1, %v2534_v61 }
 0x470   : > { %v2538_v49 = vadd.f32 %v2537_v46, %v2536_v33 }
 0x472   : > { %v1947_v11 = vld [vmem:[#allocation1] sm:$0xff]  ;;  %v5088_v7 = vadd.f32 %v2539_v26, %v2538_v49  ;;  %v1448_v1 = vpop.f32.mrf.mxu3  ;;  %v3126_v49 = vld [vmem:[%s3475_s21 + $0xf8] sm:$0xff] }
 0x473   : > { %2078 = vperm.xlu2 %3093, %v1947_v11   ;;  %1948 = vst [vmem:[#allocation1] ss:$9 sm:$0xff] %v1659_v41  ;;  %v1678_v41 = vperm.slane %v4648_v28, 3  ;;  %v1685_v11 = vperm.slane %v4743_v13, 2  ;;  %v2453_v26 = vsub.f32 %v1448_v1, %v3126_v49 }
 0x474   : > { %1949 = vst [vmem:[#allocation1 + $0x1] ss:$9 sm:$0xff] %v1660_v47  ;;  %v1681_v47 = vperm.slane %v4648_v28, 6  ;;  %v3123_v28 = vld [vmem:[%s3475_s21 + $0xe0] sm:$0xff] }
 0x475   : > { %1950 = vst [vmem:[#allocation1 + $0x2] ss:$9 sm:$0xff] %v1661_v36  ;;  %v1686_v36 = vperm.slane %v4743_v13, 3 }
 0x476   : > { %1951 = vst [vmem:[#allocation1 + $0x3] ss:$9 sm:$0xff] %v1662_v21  ;;  %v2450_v21 = vsub.f32 %v4991_v0, %v3123_v28  ;;  %v3125_v0 = vld [vmem:[%s3475_s21 + $0xf0] sm:$0xff]  ;;  %s271_s21 = sand.u32 1, %s3181_s25  }
 0x477   : > { %1952 = vst [vmem:[#allocation1 + $0x4] ss:$9 sm:$0xff] %v1663_v31  ;;  %v2452_v48 = vsub.f32 %v1445_v25, %v3125_v0  ;;  %s2796_s23 = sshll.u32 %s271_s21, 1  ;;  %s2600_s15 = scalar_lea.sflag [#allocation3], %s271_s21 }
 0x478   : > { %1953 = vst [vmem:[#allocation1 + $0x5] ss:$9 sm:$0xff] %v1664_v19  ;;  %v2482_v31 = vmul.f32 %v2450_v21, %v2450_v21  ;;  %v2451_v19 = vsub.f32 %v5081_v8, %v3124_v4  ;;  %s273_s28 = scalar_lea.vmem [#allocation2], %s2796_s23 }
 0x479   : > { %1954 = vst [vmem:[#allocation1 + $0x6] ss:$9 sm:$0xff] %v1665_v53  ;;  %v2484_v61 = vmul.f32 %v2452_v48, %v2452_v48  ;;  %s2628_s13 = sshll.u32 %s273_s28, 4  ;;  %s2629_s13 = int_to_ptr.vmem [resolvable:$true] %s2628_s13 }
 0x47a   : > { %1955 = vst [vmem:[#allocation1 + $0x7] ss:$9 sm:$0xff] %v1666_v29  ;;  %v2541_v39 = vsel %vm371_vm0, %v2482_v31, 0.0  ;;  %v2483_v53 = vmul.f32 %v2451_v19, %v2451_v19  ;;  %v1691_v29 = vperm.slane %v4786_v23, 0 }
 0x47b   : > { %v2542_v13 = vadd.f32 %v2541_v39, %v5088_v7  ;;  %v2545_v46 = vsel %vm371_vm0, %v2484_v61, 0.0  ;;  %2421 = vst.msk [vmem:[%s4350_s16 + $0xf8] sm:$0xff] %vm371_vm0, %v1448_v1  ;;  %v1694_v7 = vperm.slane %v4786_v23, 3  ;;  %v2139_v61 = vadd.s32 4294967208, %v3689_v37  ;;  %s3141_s16 = sshra.s32 %s2631_s14, 4  ;;  %s3142_s16 = int_to_ptr.hbm [resolvable:$true] %s3141_s16 }
 0x47c   : > { %v2543_v8 = vsel %vm371_vm0, %v2483_v53, 0.0  ;;  %v2147_v1 = vadd.s32 4294967192, %v3689_v37  ;;  %s3143_s18 = scalar_lea.hbm %s3142_s16, 2  ;;  %p3148_p1 = scmp.lt.s32.totalorder %s3142_s16, %s5230_s3 }
 0x47d   : > { %p3144_p12 = scmp.ne.s32.totalorder %s3142_s16, %s3143_s18  ;;  %p3149_p2 = scmp.lt.s32.totalorder %s3147_s22, %s3143_s18 }
 0x47f   : > { %p3145_p13 = pnand %p3144_p12, %p3272_p5  ;;  %p3150_p3 = por %p3149_p2, %p3148_p1 }
 0x481   : > { %v1956_v20 = vld [vmem:[#allocation1] sm:$0xff]  ;;  %p3146_p0 = pneg %p3145_p13 }
 0x482   : > { %2081 = vperm.xlu0 %3091, %v1956_v20   ;;  %1957 = vst [vmem:[#allocation1] ss:$9 sm:$0xff] %v1667_v30  ;;  %v1693_v30 = vperm.slane %v4786_v23, 2  ;;  %v2485_v20 = vmul.f32 %v2453_v26, %v2453_v26 }
 0x483   : > { %1958 = vst [vmem:[#allocation1 + $0x1] ss:$9 sm:$0xff] %v1668_v44  ;;  %v2544_v44 = vadd.f32 %v2543_v8, %v2542_v13  ;;  %p3151_p4 = pnand %p3150_p3, %p3146_p0 }
 0x484   : > { %1959 = vst [vmem:[#allocation1 + $0x2] ss:$9 sm:$0xff] %v1669_v34  ;;  %v1695_v34 = vperm.slane %v4786_v23, 4 }
 0x485   : > { %1960 = vst [vmem:[#allocation1 + $0x3] ss:$9 sm:$0xff] %v1670_v55  ;;  %v2546_v55 = vadd.f32 %v2545_v46, %v2544_v44 }
 0x486   : > { %1961 = vst [vmem:[#allocation1 + $0x4] ss:$9 sm:$0xff] %v1671_v32  ;;  %v1696_v32 = vperm.slane %v4786_v23, 5 }
 0x487   : > { %1962 = vst [vmem:[#allocation1 + $0x5] ss:$9 sm:$0xff] %v1672_v17  ;;  %v2547_v17 = vsel %vm371_vm0, %v2485_v20, 0.0  ;;  %vm2141_vm0 = vcmask 786112  }
 0x488   : > { %1963 = vst [vmem:[#allocation1 + $0x6] ss:$9 sm:$0xff] %v1673_v43  ;;  %v1697_v43 = vperm.slane %v4786_v23, 6 }
 0x489   : > { %1964 = vst [vmem:[#allocation1 + $0x7] ss:$9 sm:$0xff] %v1674_v62  ;;  %v2548_v62 = vadd.f32 %v2547_v17, %v2546_v55 }
 0x48b   : > { %2549 = vadd.xlane.f32.xlu1 %v2548_v62 }
 0x490   : > { %v1965_v56 = vld [vmem:[#allocation1] sm:$0xff] }
 0x491   : > { %2084 = vperm.xlu2 %3093, %v1965_v56   ;;  %1966 = vst [vmem:[#allocation1] ss:$9 sm:$0xff] %v1675_v57  ;;  %v1698_v57 = vperm.slane %v4786_v23, 7  ;;  %v1700_v56 = vperm.slane %v4803_v60, 1  ;;  %v1704_v23 = vperm.slane %v4803_v60, 5 }
 0x492   : > { %1967 = vst [vmem:[#allocation1 + $0x1] ss:$9 sm:$0xff] %v1676_v12  ;;  %v1699_v12 = vperm.slane %v4803_v60, 0 }
 0x493   : > { %1968 = vst [vmem:[#allocation1 + $0x2] ss:$9 sm:$0xff] %v1677_v10 }
 0x494   : > { %1969 = vst [vmem:[#allocation1 + $0x3] ss:$9 sm:$0xff] %v1678_v41  ;;  %v1701_v41 = vperm.slane %v4803_v60, 2 }
 0x495   : > { %1970 = vst [vmem:[#allocation1 + $0x4] ss:$9 sm:$0xff] %v1679_v38  ;;  %v1702_v38 = vperm.slane %v4803_v60, 3 }
 0x496   : > { %1971 = vst [vmem:[#allocation1 + $0x5] ss:$9 sm:$0xff] %v1680_v58  ;;  %v1703_v58 = vperm.slane %v4803_v60, 4 }
 0x497   : > { %1972 = vst [vmem:[#allocation1 + $0x6] ss:$9 sm:$0xff] %v1681_v47  ;;  %v1705_v47 = vperm.slane %v4803_v60, 6 }
 0x498   : > { %1973 = vst [vmem:[#allocation1 + $0x7] ss:$9 sm:$0xff] %v1682_v59  ;;  %v1706_v59 = vperm.slane %v4803_v60, 7 }
 0x49f   : > { %v5108_v6 = vld [vmem:[#allocation1] sm:$0xff] }
 0x4a0   : > { %1975 = vst [vmem:[#allocation1] ss:$9 sm:$0xff] %v1683_v2 }
 0x4a1   : > { %1976 = vst [vmem:[#allocation1 + $0x1] ss:$9 sm:$0xff] %v1684_v16  ;;  %v2037_v16 = vpop.permute.xlu2 %2036 }
 0x4a2   : > { %1977 = vst [vmem:[#allocation1 + $0x2] ss:$9 sm:$0xff] %v1685_v11  ;;  %v2043_v11 = vpop.permute.xlu0 %2042  ;;  %v2140_v46 = vperm.slane %v2037_v16, %v2139_v61 }
 0x4a3   : > { %1978 = vst [vmem:[#allocation1 + $0x3] ss:$9 sm:$0xff] %v1686_v36  ;;  %v2148_v44 = vperm.slane %v2043_v11, %v2147_v1 }
 0x4a4   : > { %1979 = vst [vmem:[#allocation1 + $0x4] ss:$9 sm:$0xff] %v1687_v51  ;;  %2039 = vperm.xlu1 %3092, %v4701_v18   ;;  %v2142_v20 = vsel %vm2141_vm0, %v2140_v46, %v5028_v22 }
 0x4a5   : > { %1980 = vst [vmem:[#allocation1 + $0x5] ss:$9 sm:$0xff] %v1688_v45 }
 0x4a6   : > { %1981 = vst [vmem:[#allocation1 + $0x6] ss:$9 sm:$0xff] %v1689_v54 }
 0x4a7   : > { %1982 = vst [vmem:[#allocation1 + $0x7] ss:$9 sm:$0xff] %v1690_v63 }
 0x4a9   : > { %v5150_v36 = vpop.permute.xlu2 %2045 }
 0x4aa   : > { %v2052_v51 = vpop.permute.xlu0 %2051 }
 0x4ab   : > { %v2159_v39 = vperm.slane %v2052_v51, %v3689_v37 }
 0x4ac   : > { %2048 = vperm.xlu1 %3092, %v4748_v40  }
 0x4ae   : > { %v1983_v33 = vld [vmem:[#allocation1] sm:$0xff] }
 0x4af   : > { %2090 = vperm.xlu0 %3091, %v1983_v33   ;;  %1984 = vst [vmem:[#allocation1] ss:$9 sm:$0xff] %v1691_v29  ;;  %v2143_v29 = vadd.s32 4294967200, %v3689_v37 }
 0x4b0   : > { %1985 = vst [vmem:[#allocation1 + $0x1] ss:$9 sm:$0xff] %v1692_v15 }
 0x4b1   : > { %1986 = vst [vmem:[#allocation1 + $0x2] ss:$9 sm:$0xff] %v1693_v30  ;;  %v2055_v28 = vpop.permute.xlu2 %2054 }
 0x4b2   : > { %1987 = vst [vmem:[#allocation1 + $0x3] ss:$9 sm:$0xff] %v1694_v7  ;;  %v2058_v21 = vpop.permute.xlu0 %2057  ;;  %v2160_v13 = vperm.slane %v2055_v28, %v4842_v5 }
 0x4b3   : > { %1988 = vst [vmem:[#allocation1 + $0x4] ss:$9 sm:$0xff] %v1695_v34  ;;  %v2162_v53 = vperm.slane %v2058_v21, %v4834_v52 }
 0x4b4   : > { %1989 = vst [vmem:[#allocation1 + $0x5] ss:$9 sm:$0xff] %v1696_v32  ;;  %2087 = vperm.xlu1 %3092, %v5108_v6   ;;  %v2161_v15 = vsel %vm2101_vm7, %v2160_v13, %v2159_v39 }
 0x4b5   : > { %1990 = vst [vmem:[#allocation1 + $0x6] ss:$9 sm:$0xff] %v1697_v43  ;;  %v2163_v8 = vsel %vm2105_vm8, %v2162_v53, %v2161_v15 }
 0x4b6   : > { %1991 = vst [vmem:[#allocation1 + $0x7] ss:$9 sm:$0xff] %v1698_v57 }
 0x4b9   : > { %v2061_v45 = vpop.permute.xlu2 %2060 }
 0x4ba   : > { %v2064_v54 = vpop.permute.xlu0 %2063  ;;  %v2164_v49 = vperm.slane %v2061_v45, %v4839_v27 }
 0x4bb   : > { %v2166_v33 = vperm.slane %v2064_v54, %v4919_v35 }
 0x4bc   : > { %v2165_v7 = vsel %vm2109_vm9, %v2164_v49, %v2163_v8 }
 0x4bd   : > { %v1992_v10 = vld [vmem:[#allocation1] sm:$0xff]  ;;  %v2167_v34 = vsel %vm2113_vm10, %v2166_v33, %v2165_v7 }
 0x4be   : > { %2093 = vperm.xlu2 %3093, %v1992_v10   ;;  %1993 = vst [vmem:[#allocation1] ss:$9 sm:$0xff] %v1699_v12 }
 0x4bf   : > { %1994 = vst [vmem:[#allocation1 + $0x1] ss:$9 sm:$0xff] %v1700_v56 }
 0x4c0   : > { %1995 = vst [vmem:[#allocation1 + $0x2] ss:$9 sm:$0xff] %v1701_v41 }
 0x4c1   : > { %1996 = vst [vmem:[#allocation1 + $0x3] ss:$9 sm:$0xff] %v1702_v38  ;;  %v2067_v19 = vpop.permute.xlu2 %2066 }
 0x4c2   : > { %1997 = vst [vmem:[#allocation1 + $0x4] ss:$9 sm:$0xff] %v1703_v58  ;;  %v2070_v18 = vpop.permute.xlu0 %2069  ;;  %v2168_v27 = vperm.slane %v2067_v19, %v4915_v9 }
 0x4c3   : > { %1998 = vst [vmem:[#allocation1 + $0x5] ss:$9 sm:$0xff] %v1704_v23  ;;  %v2170_v35 = vperm.slane %v2070_v18, %v4977_v42  ;;  %v2155_v23 = vadd.s32 4294967176, %v3689_v37 }
 0x4c4   : > { %1999 = vst [vmem:[#allocation1 + $0x6] ss:$9 sm:$0xff] %v1705_v47  ;;  %v2169_v17 = vsel %vm2117_vm11, %v2168_v27, %v2167_v34 }
 0x4c5   : > { %2000 = vst [vmem:[#allocation1 + $0x7] ss:$9 sm:$0xff] %v1706_v59  ;;  %v2171_v43 = vsel %vm2121_vm12, %v2170_v35, %v2169_v17  ;;  %v2151_v59 = vadd.s32 4294967184, %v3689_v37 }
 0x4c7   : > { %v2152_v37 = vperm.slane %v5150_v36, %v2151_v59 }
 0x4c9   : > { %v2073_v6 = vpop.permute.xlu2 %2072 }
 0x4ca   : > { %v2172_v22 = vperm.slane %v2073_v6, %v4989_v50 }
 0x4cc   : > { %v2001_v2 = vld [vmem:[#allocation1] sm:$0xff]  ;;  %v2173_v42 = vsel %vm2125_vm13, %v2172_v22, %v2171_v43 }
 0x4cd   : > { %2096 = vperm.xlu0 %3091, %v2001_v2  }
 0x4d1   : > { %v2079_v26 = vpop.permute.xlu2 %2078 }
 0x4d2   : > { %v2176_v41 = vperm.slane %v2079_v26, %v5014_v3 }
 0x4d6   : > { %v2076_v48 = vpop.permute.xlu0 %2075 }
 0x4d7   : > { %v2174_v62 = vperm.slane %v2076_v48, %v4984_v24 }
 0x4d9   : > { %v2175_v10 = vsel %vm2129_vm14, %v2174_v62, %v2173_v42 }
 0x4da   : > { %v2177_v38 = vsel %vm2133_vm15, %v2176_v41, %v2175_v10 }
 0x4eb   : > { %v2085_v57 = vpop.permute.xlu2 %2084 }
 0x4ec   : > { %v2180_v24 = vperm.slane %v2085_v57, %v2139_v61 }
 0x4f4   : > { %v2082_v30 = vpop.permute.xlu0 %2081 }
 0x4f5   : > { %v2178_v9 = vperm.slane %v2082_v30, %v5023_v14 }
 0x4f7   : > { %v2179_v58 = vsel %vm2137_vm1, %v2178_v9, %v2177_v38 }
 0x4f8   : > { %v2181_v3 = vsel %vm2141_vm0, %v2180_v24, %v2179_v58 }
 0x4fe   : > { %v2550_v60 = vpop.xlane.xlu1 %2549 }
 0x4ff   : > { %v2551_v63 = vrot.slane %v2550_v60, 4 }
 0x501   : > { %v2552_v25 = vadd.f32 %v2551_v63, %v2550_v60 }
 0x503   : > { %v2553_v31 = vrot.slane %v2552_v25, 2 }
 0x505   : > { %v2554_v4 = vadd.f32 %v2553_v31, %v2552_v25  ;;  %v5281_v31 = vlaneseq }
 0x507   : > { %v2555_v0 = vrot.slane %v2554_v4, 1  ;;  %vm2195_vm7 = vcmp.lt.s32.totalorder %v5281_v31, 256 }
 0x509   : > { %v2556_v40 = vadd.f32 %v2555_v0, %v2554_v4 }
 0x50b   : > { %3047 = vpush %v2556_v40 }
 0x516   : > { %v2040_v52 = vpop.permute.xlu1 %2039 }
 0x517   : > { %v2144_v5 = vperm.slane %v2040_v52, %v2143_v29 }
 0x518   : > { %v2094_v50 = vpop.permute.xlu2 %2093 }
 0x519   : > { %v2146_v55 = vsel %vm2145_vm2, %v2144_v5, %v2142_v20  ;;  %v2186_v11 = vperm.slane %v2094_v50, %v2151_v59 }
 0x51a   : > { %v2150_v32 = vsel %vm2149_vm3, %v2148_v44, %v2146_v55 }
 0x51b   : > { %v2154_v63 = vsel %vm2153_vm4, %v2152_v37, %v2150_v32 }
 0x51e   : > { %v2049_v12 = vpop.permute.xlu1 %2048 }
 0x51f   : > { %v2156_v21 = vperm.slane %v2049_v12, %v2155_v23 }
 0x521   : > { %v2091_v56 = vpop.permute.xlu0 %2090  ;;  %v2158_v4 = vsel %vm2157_vm5, %v2156_v21, %v2154_v63 }
 0x522   : > { %v2184_v14 = vperm.slane %v2091_v56, %v2147_v1 }
 0x526   : > { %v2088_v47 = vpop.permute.xlu1 %2087 }
 0x527   : > { %v2182_v16 = vperm.slane %v2088_v47, %v2143_v29 }
 0x529   : > { %v2183_v51 = vsel %vm2145_vm2, %v2182_v16, %v2181_v3 }
 0x52a   : > { %v2185_v45 = vsel %vm2149_vm3, %v2184_v14, %v2183_v51 }
 0x52b   : > { %v2187_v60 = vsel %vm2153_vm4, %v2186_v11, %v2185_v45 }
 0x53f   : > { %v2097_v2 = vpop.permute.xlu0 %2096 }
 0x540   : > { %v2188_v28 = vperm.slane %v2097_v2, %v2155_v23 }
 0x542   : > { %v2189_v54 = vsel %vm2157_vm5, %v2188_v28, %v2187_v60 }
 0x543   : > { %v2190_v25 = vrot.slane %v2189_v54, 7 }
 0x545   : > { %v2192_v19 = vsel %vm2191_vm6, %v2158_v4, %v2190_v25 }
 0x546   : > { %2197 = vst.msk [vmem:[%s273_s28] sm:$0x3] %vm2195_vm7, %v2192_v19 }
 0x547   : > { %3154 = shalt.err (!%p3151_p4)
}
 0x548   : > { %3049 = dma.vmem_to_hbm [thread:$0]  (%p3272_p5), %s2629_s13, 32, %s2631_s14, %s2600_s15   ;;  %vm2559_vm8 = vcmask 0  }
 0x549   : > { %s318_s9 = scalar_lea.vmem %s5233_s6, %s4885_s17  ;;  %s3048_s28 = spop %3047 }
 0x54a   : > { %v2558_v36 = vstv %s3048_s28 }
 0x54b   : > { %2560 = vst.msk [vmem:[%s318_s9] sm:$0x1] %vm2559_vm8, %v2558_v36 }
 0x54c PF: > { %p3055_p7 = scmp.ge.s32.totalorder %s3189_s27, 2  ;;  %s2656_s16 = sand.u32 1, %s3177_s24  }
 0x54d   : > { %s2657_s11 = scalar_lea.sflag [#allocation3], %s2656_s16 }
 0x54e   : > { %p3052_p8 = pnand %p3055_p7, %p3276_p6 }
 0x550   : > { %p3053_p9 = pneg %p3052_p8 }
 0x552   : > { %3172 = dma.done.wait (%p3053_p9), %s2657_s11, 32  }
 0x553   : > { %3174 = vsyncadd (%p3053_p9), %s2657_s11, 4294967264  ;;  %p18_p5 = scmp.ge.s32.totalorder %s3259_s30, 4   ;;  %s5282_s24 = smov %s3181_s25 }
 0x554   : > { %s5283_s25 = smov %s3185_s26  ;;  %s5284_s26 = smov %s3270_s10 }
 0x555   : > { %s5285_s27 = smov %s3259_s30  ;;  %20 = sbr.rel (!%p18_p5) target bundleno = 3 (0x3), region = 122 }
 0x55a   :  { %2691 = vsyncpa [#allocation3], 1 }
 0x55b   :  { %2693 = vsyncpa [#allocation3 + $0x1], 1 }

</bundles_post_ra>
